<compile_context>
chip_gen: v7x
topology: tpu7x:2x2x1
jax: 0.10.0
libtpu: 0.0.40
codegen_flags: <defaults>
</compile_context>

<pallas_src>
import jax
import jax.numpy as jnp
from jax import lax
from jax.experimental import pallas as pl
from jax.experimental.pallas import tpu as pltpu
import numpy as np


# ---------------------------------------------------------------------------
# Pallas kernel: fused single-layer bidirectional GRU (bias=False), PyTorch
# semantics per direction:
#   r = sigmoid(W_ir x + W_hr h);  z = sigmoid(W_iz x + W_hz h)
#   n = tanh(W_in x + r * (W_hn h));  h' = (1 - z) * n + z * h
# Weights are pre-fused in the wrapper with column layout [r_f r_b z_f z_b n_f n_b].
# ---------------------------------------------------------------------------
def _bigru_kernel(x_ref, wih_ref, whh_ref, out_ref, ig_ref):
    """
    x_ref:   (T, N, D)   input sequence tile
    wih_ref: (D, 6H)     input->gate weights
    whh_ref: (2H, 6H)    hidden->gate weights, block-diagonal over directions
                         (rows [h_f | h_b])
    out_ref: (T, N, 2H)  output [forward | backward]
    ig_ref:  (T, N, 6H)  scratch: hoisted input projections
    """
    T, N, _ = x_ref.shape
    H2 = out_ref.shape[-1]
    H = H2 // 2
    H6 = ig_ref.shape[-1]

    # Hoist weight loads out of the time loop.
    wih = wih_ref[...]
    whh = whh_ref[...]

    # Hoisted input projections: independent of the recurrence, so all T MXU
    # pushes pipeline back-to-back before the serial part starts.
    for t in range(T):
        ig_ref[t] = jnp.dot(x_ref[t], wih, preferred_element_type=jnp.float32)

    # Lane mask selecting the forward-direction gate columns of the interleaved
    # [r_f r_b z_f z_b n_f n_b] layout (hoisted out of the loop).
    col = lax.broadcasted_iota(jnp.int32, (N, H6), 1)
    fwd_mask = ((col < H)
                | ((col >= 2 * H) & (col < 3 * H))
                | ((col >= 4 * H) & (col < 5 * H)))

    h_cat = jnp.zeros((N, H2), jnp.float32)      # [h_f | h_b], carried as a value

    # Fully unrolled recurrence (T is small & static): one fused
    # (N, 2H) x (2H, 6H) matmul per step covers both directions and all 3 gates.
    for t in range(T):
        tb = T - 1 - t
        # forward gates use x[t], backward gates use x[T-1-t]
        gi = jnp.where(fwd_mask, ig_ref[t], ig_ref[tb])
        if t == 0:
            gh = jnp.zeros((N, H6), jnp.float32)          # h0 == 0
        else:
            gh = jnp.dot(h_cat, whh, preferred_element_type=jnp.float32)
        r = jax.nn.sigmoid(gi[:, 0:H2] + gh[:, 0:H2])
        z = jax.nn.sigmoid(gi[:, H2:2 * H2] + gh[:, H2:2 * H2])
        n = jnp.tanh(gi[:, 2 * H2:3 * H2] + r * gh[:, 2 * H2:3 * H2])
        h_cat = (1.0 - z) * n + z * h_cat
        out_ref[t, :, 0:H] = h_cat[:, 0:H]        # forward hidden at time t
        out_ref[tb, :, H:H2] = h_cat[:, H:H2]     # backward hidden at time T-1-t


def _fuse_bigru_weights(wih_f, whh_f, wih_b, whh_b):
    """Fuse gates + directions.

    wih_* : (3, D, H), whh_* : (3, H, H); gate order [r, z, n], already transposed
    so that x @ wih_*[g] == x @ W_g^T (PyTorch convention).

    Returns wih_cat (D, 6H) and block-diagonal whh_block (2H, 6H), both with
    column layout [r_f r_b z_f z_b n_f n_b].
    """
    H = whh_f.shape[-1]
    zeros = jnp.zeros((H, H), whh_f.dtype)
    wih_cols, whh_cols = [], []
    for g in range(3):
        wih_cols += [wih_f[g], wih_b[g]]
        whh_cols += [jnp.concatenate([whh_f[g], zeros], axis=0),
                     jnp.concatenate([zeros, whh_b[g]], axis=0)]
    wih_cat = jnp.concatenate(wih_cols, axis=1)     # (D, 6H)
    whh_block = jnp.concatenate(whh_cols, axis=1)   # (2H, 6H)
    return wih_cat, whh_block


def bidir_gru_pallas(x_seq, wih_f, whh_f, wih_b, whh_b, *, block_n=128):
    """x_seq: (T, N, D) float32. Returns (T, N, 2H) = concat(forward, backward)."""
    T, N, D = x_seq.shape
    H = whh_f.shape[-1]
    H2, H6 = 2 * H, 6 * H
    wih_cat, whh_block = _fuse_bigru_weights(wih_f, whh_f, wih_b, whh_b)

    bn = N if N <= block_n else block_n
    assert N % bn == 0, f"N={N} must be a multiple of the batch tile {bn}"

    return pl.pallas_call(
        _bigru_kernel,
        out_shape=jax.ShapeDtypeStruct((T, N, H2), jnp.float32),
        grid_spec=pltpu.PrefetchScalarGridSpec(
            num_scalar_prefetch=0,
            grid=(N // bn,),
            in_specs=[
                pl.BlockSpec((T, bn, D), lambda i: (0, i, 0)),
                pl.BlockSpec((D, H6), lambda i: (0, 0)),
                pl.BlockSpec((H2, H6), lambda i: (0, 0)),
            ],
            out_specs=pl.BlockSpec((T, bn, H2), lambda i: (0, i, 0)),
            scratch_shapes=[pltpu.VMEM((T, bn, H6), jnp.float32)],
        ),
        compiler_params=pltpu.CompilerParams(
            dimension_semantics=("parallel",)),
    )(x_seq, wih_cat, whh_block)


# ---------------------------------------------------------------------------
# Pure-JAX reference (for correctness check of the kernel)
# ---------------------------------------------------------------------------
def _gru_dir_ref(xs, wih, whh, reverse):
    H = whh.shape[-1]

    def step(h, x_t):
        i_r, i_z, i_n = x_t @ wih[0], x_t @ wih[1], x_t @ wih[2]
        h_r, h_z, h_n = h @ whh[0], h @ whh[1], h @ whh[2]
        r = jax.nn.sigmoid(i_r + h_r)
        z = jax.nn.sigmoid(i_z + h_z)
        n = jnp.tanh(i_n + r * h_n)
        h_new = (1.0 - z) * n + z * h
        return h_new, h_new

    h0 = jnp.zeros((xs.shape[1], H), xs.dtype)
    _, ys = lax.scan(step, h0, xs, reverse=reverse)
    return ys


def bidir_gru_ref(x_seq, wih_f, whh_f, wih_b, whh_b):
    yf = _gru_dir_ref(x_seq, wih_f, whh_f, reverse=False)
    yb = _gru_dir_ref(x_seq, wih_b, whh_b, reverse=True)
    return jnp.concatenate([yf, yb], axis=-1)


# ---------------------------------------------------------------------------
# ReNet forward (rearranges in plain JAX, GRUs in Pallas)
# ---------------------------------------------------------------------------
def make_gru_params(key, input_size, hidden):
    """Deterministic orthogonal init (mirrors weights_init). Returns gate-stacked
    (3, D, H) / (3, H, H) matrices for one direction pair (fwd, bwd)."""
    orth = jax.nn.initializers.orthogonal()
    k1, k2, k3, k4 = jax.random.split(key, 4)

    def ih(k):
        w = orth(k, (3 * hidden, input_size), jnp.float32)   # torch: weight_ih (3H, D)
        return jnp.transpose(w.reshape(3, hidden, input_size), (0, 2, 1))

    def hh(k):
        w = orth(k, (3 * hidden, hidden), jnp.float32)        # torch: weight_hh (3H, H)
        return jnp.transpose(w.reshape(3, hidden, hidden), (0, 2, 1))

    return ih(k1), hh(k2), ih(k3), hh(k4)


def renet_forward(x, params_h, params_v, kernel_size=(2, 2), gru_fn=bidir_gru_pallas):
    k_w, k_h = kernel_size
    b, c, h, w = x.shape
    assert h % k_h == 0 and w % k_w == 0, "input size does not match with kernel size"
    h1, w1 = h // k_h, w // k_w

    # rearrange 'b c (h1 h2) (w1 w2) -> h1 (b w1) (c h2 w2)'
    xr = x.reshape(b, c, h1, k_h, w1, k_w)
    xr = jnp.transpose(xr, (2, 0, 4, 1, 3, 5)).reshape(h1, b * w1, c * k_h * k_w)

    # horizontal bidirectional GRU
    xr = gru_fn(xr, *params_h)                                  # (h1, b*w1, 2H)

    # rearrange 'h1 (b w1) (c h2 w2) -> w1 (b h1) (c h2 w2)'
    F = xr.shape[-1]
    xr = xr.reshape(h1, b, w1, F)
    xr = jnp.transpose(xr, (2, 1, 0, 3)).reshape(w1, b * h1, F)

    # vertical bidirectional GRU
    xr = gru_fn(xr, *params_v)                                  # (w1, b*h1, 2H)

    # rearrange 'w1 (b h1) (c h2 w2) -> b (c h2 w2) h1 w1'
    F2 = xr.shape[-1]
    xr = xr.reshape(w1, b, h1, F2)
    out = jnp.transpose(xr, (1, 3, 2, 0))                       # (b, 2H, h1, w1)
    return out


if __name__ == "__main__":
    # small shapes consistent with the module
    b, c, h, w = 2, 4, 16, 16
    hidden = 32
    kernel_size = (2, 2)
    k_w, k_h = kernel_size
    input_size = c * k_h * k_w          # 16: lstm_h input
    input_size_v = 2 * hidden           # 64: lstm_v input

    key = jax.random.PRNGKey(0)
    kx, kh, kv = jax.random.split(key, 3)

    x = jax.random.normal(kx, (b, c, h, w), dtype=jnp.float32)
    params_h = make_gru_params(kh, input_size, hidden)
    params_v = make_gru_params(kv, input_size_v, hidden)

    out = jax.jit(lambda xx: renet_forward(xx, params_h, params_v, kernel_size))(x)
    out = jax.block_until_ready(out)

    # correctness check against a pure-JAX reference of the same forward pass
    out_ref = renet_forward(x, params_h, params_v, kernel_size, gru_fn=bidir_gru_ref)
    out_ref = jax.block_until_ready(out_ref)

    assert out.shape == (b, 2 * hidden, h // k_h, w // k_w), out.shape
    np.testing.assert_allclose(np.asarray(out), np.asarray(out_ref), rtol=1e-4, atol=1e-5)

    print("KERNEL_OK")
</pallas_src>

<mosaic_0001>
module attributes {stable_mosaic.version = 11 : i64} {
  func.func @_bigru_kernel(%arg0: i32, %arg1: memref<8x16x16xf32, #tpu.memory_space<vmem>>, %arg2: memref<16x192xf32, #tpu.memory_space<vmem>>, %arg3: memref<64x192xf32, #tpu.memory_space<vmem>>, %arg4: memref<8x16x64xf32, #tpu.memory_space<vmem>>, %arg5: memref<8x16x192xf32, #tpu.memory_space<vmem>>) attributes {dimension_semantics = [#tpu.dimension_semantics<parallel>], iteration_bounds = array<i64: 1>, scalar_prefetch = 0 : i64, scratch_operands = 1 : i64, tpu.core_type = #tpu.core_type<tc>, window_params = [{transform_indices = @transform_0, window_bounds = array<i64: 8, 16, 16>}, {pipeline_mode = #tpu.pipeline_mode<synchronous>, transform_indices = @transform_1, window_bounds = array<i64: 16, 192>}, {pipeline_mode = #tpu.pipeline_mode<synchronous>, transform_indices = @transform_2, window_bounds = array<i64: 64, 192>}, {transform_indices = @transform_3, window_bounds = array<i64: 8, 16, 64>}]} {
    %c0 = arith.constant 0 : index
    %c0_0 = arith.constant 0 : index
    %0 = vector.load %arg2[%c0, %c0_0] : memref<16x192xf32, #tpu.memory_space<vmem>>, vector<16x192xf32>
    %c0_1 = arith.constant 0 : index
    %c0_2 = arith.constant 0 : index
    %1 = vector.load %arg3[%c0_1, %c0_2] : memref<64x192xf32, #tpu.memory_space<vmem>>, vector<64x192xf32>
    %c0_3 = arith.constant 0 : index
    %c0_4 = arith.constant 0 : index
    %c0_5 = arith.constant 0 : index
    %2 = vector.load %arg1[%c0_3, %c0_4, %c0_5] : memref<8x16x16xf32, #tpu.memory_space<vmem>>, vector<1x16x16xf32>
    %3 = vector.shape_cast %2 : vector<1x16x16xf32> to vector<16x16xf32>
    %cst = arith.constant dense<0.000000e+00> : vector<16x192xf32>
    %4 = tpu.matmul %3, %0, %cst {dimension_numbers = #tpu.dot_dimension_numbers<[1], [0], [0], [1], [0, 0, 1, 1], [], []>} : vector<16x16xf32>, vector<16x192xf32>, vector<16x192xf32> -> vector<16x192xf32>
    %c0_6 = arith.constant 0 : index
    %c0_7 = arith.constant 0 : index
    %c0_8 = arith.constant 0 : index
    %5 = vector.load %arg5[%c0_6, %c0_7, %c0_8] : memref<8x16x192xf32, #tpu.memory_space<vmem>>, vector<1x16x192xf32>
    %6 = vector.shape_cast %5 : vector<1x16x192xf32> to vector<16x192xf32>
    %7 = vector.shape_cast %4 : vector<16x192xf32> to vector<1x16x192xf32>
    tpu.vector_store %arg5[%c0_6, %c0_7, %c0_8], %7 {strides = array<i32>} : memref<8x16x192xf32, #tpu.memory_space<vmem>>, vector<1x16x192xf32>,
    %c1 = arith.constant 1 : index
    %c0_9 = arith.constant 0 : index
    %c0_10 = arith.constant 0 : index
    %8 = vector.load %arg1[%c1, %c0_9, %c0_10] : memref<8x16x16xf32, #tpu.memory_space<vmem>>, vector<1x16x16xf32>
    %9 = vector.shape_cast %8 : vector<1x16x16xf32> to vector<16x16xf32>
    %cst_11 = arith.constant dense<0.000000e+00> : vector<16x192xf32>
    %10 = tpu.matmul %9, %0, %cst_11 {dimension_numbers = #tpu.dot_dimension_numbers<[1], [0], [0], [1], [0, 0, 1, 1], [], []>} : vector<16x16xf32>, vector<16x192xf32>, vector<16x192xf32> -> vector<16x192xf32>
    %c1_12 = arith.constant 1 : index
    %c0_13 = arith.constant 0 : index
    %c0_14 = arith.constant 0 : index
    %11 = vector.load %arg5[%c1_12, %c0_13, %c0_14] : memref<8x16x192xf32, #tpu.memory_space<vmem>>, vector<1x16x192xf32>
    %12 = vector.shape_cast %11 : vector<1x16x192xf32> to vector<16x192xf32>
    %13 = vector.shape_cast %10 : vector<16x192xf32> to vector<1x16x192xf32>
    tpu.vector_store %arg5[%c1_12, %c0_13, %c0_14], %13 {strides = array<i32>} : memref<8x16x192xf32, #tpu.memory_space<vmem>>, vector<1x16x192xf32>,
    %c2 = arith.constant 2 : index
    %c0_15 = arith.constant 0 : index
    %c0_16 = arith.constant 0 : index
    %14 = vector.load %arg1[%c2, %c0_15, %c0_16] : memref<8x16x16xf32, #tpu.memory_space<vmem>>, vector<1x16x16xf32>
    %15 = vector.shape_cast %14 : vector<1x16x16xf32> to vector<16x16xf32>
    %cst_17 = arith.constant dense<0.000000e+00> : vector<16x192xf32>
    %16 = tpu.matmul %15, %0, %cst_17 {dimension_numbers = #tpu.dot_dimension_numbers<[1], [0], [0], [1], [0, 0, 1, 1], [], []>} : vector<16x16xf32>, vector<16x192xf32>, vector<16x192xf32> -> vector<16x192xf32>
    %c2_18 = arith.constant 2 : index
    %c0_19 = arith.constant 0 : index
    %c0_20 = arith.constant 0 : index
    %17 = vector.load %arg5[%c2_18, %c0_19, %c0_20] : memref<8x16x192xf32, #tpu.memory_space<vmem>>, vector<1x16x192xf32>
    %18 = vector.shape_cast %17 : vector<1x16x192xf32> to vector<16x192xf32>
    %19 = vector.shape_cast %16 : vector<16x192xf32> to vector<1x16x192xf32>
    tpu.vector_store %arg5[%c2_18, %c0_19, %c0_20], %19 {strides = array<i32>} : memref<8x16x192xf32, #tpu.memory_space<vmem>>, vector<1x16x192xf32>,
    %c3 = arith.constant 3 : index
    %c0_21 = arith.constant 0 : index
    %c0_22 = arith.constant 0 : index
    %20 = vector.load %arg1[%c3, %c0_21, %c0_22] : memref<8x16x16xf32, #tpu.memory_space<vmem>>, vector<1x16x16xf32>
    %21 = vector.shape_cast %20 : vector<1x16x16xf32> to vector<16x16xf32>
    %cst_23 = arith.constant dense<0.000000e+00> : vector<16x192xf32>
    %22 = tpu.matmul %21, %0, %cst_23 {dimension_numbers = #tpu.dot_dimension_numbers<[1], [0], [0], [1], [0, 0, 1, 1], [], []>} : vector<16x16xf32>, vector<16x192xf32>, vector<16x192xf32> -> vector<16x192xf32>
    %c3_24 = arith.constant 3 : index
    %c0_25 = arith.constant 0 : index
    %c0_26 = arith.constant 0 : index
    %23 = vector.load %arg5[%c3_24, %c0_25, %c0_26] : memref<8x16x192xf32, #tpu.memory_space<vmem>>, vector<1x16x192xf32>
    %24 = vector.shape_cast %23 : vector<1x16x192xf32> to vector<16x192xf32>
    %25 = vector.shape_cast %22 : vector<16x192xf32> to vector<1x16x192xf32>
    tpu.vector_store %arg5[%c3_24, %c0_25, %c0_26], %25 {strides = array<i32>} : memref<8x16x192xf32, #tpu.memory_space<vmem>>, vector<1x16x192xf32>,
    %c4 = arith.constant 4 : index
    %c0_27 = arith.constant 0 : index
    %c0_28 = arith.constant 0 : index
    %26 = vector.load %arg1[%c4, %c0_27, %c0_28] : memref<8x16x16xf32, #tpu.memory_space<vmem>>, vector<1x16x16xf32>
    %27 = vector.shape_cast %26 : vector<1x16x16xf32> to vector<16x16xf32>
    %cst_29 = arith.constant dense<0.000000e+00> : vector<16x192xf32>
    %28 = tpu.matmul %27, %0, %cst_29 {dimension_numbers = #tpu.dot_dimension_numbers<[1], [0], [0], [1], [0, 0, 1, 1], [], []>} : vector<16x16xf32>, vector<16x192xf32>, vector<16x192xf32> -> vector<16x192xf32>
    %c4_30 = arith.constant 4 : index
    %c0_31 = arith.constant 0 : index
    %c0_32 = arith.constant 0 : index
    %29 = vector.load %arg5[%c4_30, %c0_31, %c0_32] : memref<8x16x192xf32, #tpu.memory_space<vmem>>, vector<1x16x192xf32>
    %30 = vector.shape_cast %29 : vector<1x16x192xf32> to vector<16x192xf32>
    %31 = vector.shape_cast %28 : vector<16x192xf32> to vector<1x16x192xf32>
    tpu.vector_store %arg5[%c4_30, %c0_31, %c0_32], %31 {strides = array<i32>} : memref<8x16x192xf32, #tpu.memory_space<vmem>>, vector<1x16x192xf32>,
    %c5 = arith.constant 5 : index
    %c0_33 = arith.constant 0 : index
    %c0_34 = arith.constant 0 : index
    %32 = vector.load %arg1[%c5, %c0_33, %c0_34] : memref<8x16x16xf32, #tpu.memory_space<vmem>>, vector<1x16x16xf32>
    %33 = vector.shape_cast %32 : vector<1x16x16xf32> to vector<16x16xf32>
    %cst_35 = arith.constant dense<0.000000e+00> : vector<16x192xf32>
    %34 = tpu.matmul %33, %0, %cst_35 {dimension_numbers = #tpu.dot_dimension_numbers<[1], [0], [0], [1], [0, 0, 1, 1], [], []>} : vector<16x16xf32>, vector<16x192xf32>, vector<16x192xf32> -> vector<16x192xf32>
    %c5_36 = arith.constant 5 : index
    %c0_37 = arith.constant 0 : index
    %c0_38 = arith.constant 0 : index
    %35 = vector.load %arg5[%c5_36, %c0_37, %c0_38] : memref<8x16x192xf32, #tpu.memory_space<vmem>>, vector<1x16x192xf32>
    %36 = vector.shape_cast %35 : vector<1x16x192xf32> to vector<16x192xf32>
    %37 = vector.shape_cast %34 : vector<16x192xf32> to vector<1x16x192xf32>
    tpu.vector_store %arg5[%c5_36, %c0_37, %c0_38], %37 {strides = array<i32>} : memref<8x16x192xf32, #tpu.memory_space<vmem>>, vector<1x16x192xf32>,
    %c6 = arith.constant 6 : index
    %c0_39 = arith.constant 0 : index
    %c0_40 = arith.constant 0 : index
    %38 = vector.load %arg1[%c6, %c0_39, %c0_40] : memref<8x16x16xf32, #tpu.memory_space<vmem>>, vector<1x16x16xf32>
    %39 = vector.shape_cast %38 : vector<1x16x16xf32> to vector<16x16xf32>
    %cst_41 = arith.constant dense<0.000000e+00> : vector<16x192xf32>
    %40 = tpu.matmul %39, %0, %cst_41 {dimension_numbers = #tpu.dot_dimension_numbers<[1], [0], [0], [1], [0, 0, 1, 1], [], []>} : vector<16x16xf32>, vector<16x192xf32>, vector<16x192xf32> -> vector<16x192xf32>
    %c6_42 = arith.constant 6 : index
    %c0_43 = arith.constant 0 : index
    %c0_44 = arith.constant 0 : index
    %41 = vector.load %arg5[%c6_42, %c0_43, %c0_44] : memref<8x16x192xf32, #tpu.memory_space<vmem>>, vector<1x16x192xf32>
    %42 = vector.shape_cast %41 : vector<1x16x192xf32> to vector<16x192xf32>
    %43 = vector.shape_cast %40 : vector<16x192xf32> to vector<1x16x192xf32>
    tpu.vector_store %arg5[%c6_42, %c0_43, %c0_44], %43 {strides = array<i32>} : memref<8x16x192xf32, #tpu.memory_space<vmem>>, vector<1x16x192xf32>,
    %c7 = arith.constant 7 : index
    %c0_45 = arith.constant 0 : index
    %c0_46 = arith.constant 0 : index
    %44 = vector.load %arg1[%c7, %c0_45, %c0_46] : memref<8x16x16xf32, #tpu.memory_space<vmem>>, vector<1x16x16xf32>
    %45 = vector.shape_cast %44 : vector<1x16x16xf32> to vector<16x16xf32>
    %cst_47 = arith.constant dense<0.000000e+00> : vector<16x192xf32>
    %46 = tpu.matmul %45, %0, %cst_47 {dimension_numbers = #tpu.dot_dimension_numbers<[1], [0], [0], [1], [0, 0, 1, 1], [], []>} : vector<16x16xf32>, vector<16x192xf32>, vector<16x192xf32> -> vector<16x192xf32>
    %c7_48 = arith.constant 7 : index
    %c0_49 = arith.constant 0 : index
    %c0_50 = arith.constant 0 : index
    %47 = vector.load %arg5[%c7_48, %c0_49, %c0_50] : memref<8x16x192xf32, #tpu.memory_space<vmem>>, vector<1x16x192xf32>
    %48 = vector.shape_cast %47 : vector<1x16x192xf32> to vector<16x192xf32>
    %49 = vector.shape_cast %46 : vector<16x192xf32> to vector<1x16x192xf32>
    tpu.vector_store %arg5[%c7_48, %c0_49, %c0_50], %49 {strides = array<i32>} : memref<8x16x192xf32, #tpu.memory_space<vmem>>, vector<1x16x192xf32>,
    %50 = tpu.iota {dimensions = array<i32: 1>} : vector<16x192xi32>
    %c32_i32 = arith.constant 32 : i32
    %51 = vector.broadcast %c32_i32 : i32 to vector<16x192xi32>
    %52 = arith.cmpi slt, %50, %51 : vector<16x192xi32>
    %c64_i32 = arith.constant 64 : i32
    %53 = vector.broadcast %c64_i32 : i32 to vector<16x192xi32>
    %54 = arith.cmpi sge, %50, %53 : vector<16x192xi32>
    %c96_i32 = arith.constant 96 : i32
    %55 = vector.broadcast %c96_i32 : i32 to vector<16x192xi32>
    %56 = arith.cmpi slt, %50, %55 : vector<16x192xi32>
    %57 = arith.andi %54, %56 : vector<16x192xi1>
    %58 = arith.ori %52, %57 : vector<16x192xi1>
    %c128_i32 = arith.constant 128 : i32
    %59 = vector.broadcast %c128_i32 : i32 to vector<16x192xi32>
    %60 = arith.cmpi sge, %50, %59 : vector<16x192xi32>
    %c160_i32 = arith.constant 160 : i32
    %61 = vector.broadcast %c160_i32 : i32 to vector<16x192xi32>
    %62 = arith.cmpi slt, %50, %61 : vector<16x192xi32>
    %63 = arith.andi %60, %62 : vector<16x192xi1>
    %64 = arith.ori %58, %63 : vector<16x192xi1>
    %cst_51 = arith.constant 0.000000e+00 : f32
    %65 = vector.broadcast %cst_51 : f32 to vector<16x64xf32>
    %c0_52 = arith.constant 0 : index
    %c0_53 = arith.constant 0 : index
    %c0_54 = arith.constant 0 : index
    %66 = vector.load %arg5[%c0_52, %c0_53, %c0_54] : memref<8x16x192xf32, #tpu.memory_space<vmem>>, vector<1x16x192xf32>
    %67 = vector.shape_cast %66 : vector<1x16x192xf32> to vector<16x192xf32>
    %c7_55 = arith.constant 7 : index
    %c0_56 = arith.constant 0 : index
    %c0_57 = arith.constant 0 : index
    %68 = vector.load %arg5[%c7_55, %c0_56, %c0_57] : memref<8x16x192xf32, #tpu.memory_space<vmem>>, vector<1x16x192xf32>
    %69 = vector.shape_cast %68 : vector<1x16x192xf32> to vector<16x192xf32>
    %70 = arith.select %64, %67, %69 : vector<16x192xi1>, vector<16x192xf32>
    %cst_58 = arith.constant 0.000000e+00 : f32
    %71 = vector.broadcast %cst_58 : f32 to vector<16x192xf32>
    %72 = vector.extract_strided_slice %70 {offsets = [0, 0], sizes = [16, 64], strides = [1, 1]} : vector<16x192xf32> to vector<16x64xf32>
    %73 = vector.extract_strided_slice %71 {offsets = [0, 0], sizes = [16, 64], strides = [1, 1]} : vector<16x192xf32> to vector<16x64xf32>
    %74 = arith.addf %72, %73 : vector<16x64xf32>
    %75 = arith.negf %74 : vector<16x64xf32>
    %76 = math.exp %75 : vector<16x64xf32>
    %cst_59 = arith.constant 1.000000e+00 : f32
    %77 = vector.broadcast %cst_59 : f32 to vector<16x64xf32>
    %78 = arith.addf %77, %76 : vector<16x64xf32>
    %79 = arith.divf %77, %78 : vector<16x64xf32>
    %80 = vector.extract_strided_slice %70 {offsets = [0, 64], sizes = [16, 64], strides = [1, 1]} : vector<16x192xf32> to vector<16x64xf32>
    %81 = vector.extract_strided_slice %71 {offsets = [0, 64], sizes = [16, 64], strides = [1, 1]} : vector<16x192xf32> to vector<16x64xf32>
    %82 = arith.addf %80, %81 : vector<16x64xf32>
    %83 = arith.negf %82 : vector<16x64xf32>
    %84 = math.exp %83 : vector<16x64xf32>
    %cst_60 = arith.constant 1.000000e+00 : f32
    %85 = vector.broadcast %cst_60 : f32 to vector<16x64xf32>
    %86 = arith.addf %85, %84 : vector<16x64xf32>
    %87 = arith.divf %85, %86 : vector<16x64xf32>
    %88 = vector.extract_strided_slice %70 {offsets = [0, 128], sizes = [16, 64], strides = [1, 1]} : vector<16x192xf32> to vector<16x64xf32>
    %89 = vector.extract_strided_slice %71 {offsets = [0, 128], sizes = [16, 64], strides = [1, 1]} : vector<16x192xf32> to vector<16x64xf32>
    %90 = arith.mulf %79, %89 : vector<16x64xf32>
    %91 = arith.addf %88, %90 : vector<16x64xf32>
    %92 = math.tanh %91 : vector<16x64xf32>
    %cst_61 = arith.constant 1.000000e+00 : f32
    %93 = vector.broadcast %cst_61 : f32 to vector<16x64xf32>
    %94 = arith.subf %93, %87 : vector<16x64xf32>
    %95 = arith.mulf %94, %92 : vector<16x64xf32>
    %96 = arith.mulf %87, %65 : vector<16x64xf32>
    %97 = arith.addf %95, %96 : vector<16x64xf32>
    %98 = vector.extract_strided_slice %97 {offsets = [0, 0], sizes = [16, 32], strides = [1, 1]} : vector<16x64xf32> to vector<16x32xf32>
    %c0_62 = arith.constant 0 : index
    %c0_63 = arith.constant 0 : index
    %c0_64 = arith.constant 0 : index
    %99 = vector.load %arg4[%c0_62, %c0_63, %c0_64] : memref<8x16x64xf32, #tpu.memory_space<vmem>>, vector<1x16x32xf32>
    %100 = vector.shape_cast %99 : vector<1x16x32xf32> to vector<16x32xf32>
    %101 = vector.shape_cast %98 : vector<16x32xf32> to vector<1x16x32xf32>
    tpu.vector_store %arg4[%c0_62, %c0_63, %c0_64], %101 {strides = array<i32>} : memref<8x16x64xf32, #tpu.memory_space<vmem>>, vector<1x16x32xf32>,
    %102 = vector.extract_strided_slice %97 {offsets = [0, 32], sizes = [16, 32], strides = [1, 1]} : vector<16x64xf32> to vector<16x32xf32>
    %c7_65 = arith.constant 7 : index
    %c0_66 = arith.constant 0 : index
    %c32 = arith.constant 32 : index
    %103 = vector.load %arg4[%c7_65, %c0_66, %c32] : memref<8x16x64xf32, #tpu.memory_space<vmem>>, vector<1x16x32xf32>
    %104 = vector.shape_cast %103 : vector<1x16x32xf32> to vector<16x32xf32>
    %105 = vector.shape_cast %102 : vector<16x32xf32> to vector<1x16x32xf32>
    tpu.vector_store %arg4[%c7_65, %c0_66, %c32], %105 {strides = array<i32>} : memref<8x16x64xf32, #tpu.memory_space<vmem>>, vector<1x16x32xf32>,
    %c1_67 = arith.constant 1 : index
    %c0_68 = arith.constant 0 : index
    %c0_69 = arith.constant 0 : index
    %106 = vector.load %arg5[%c1_67, %c0_68, %c0_69] : memref<8x16x192xf32, #tpu.memory_space<vmem>>, vector<1x16x192xf32>
    %107 = vector.shape_cast %106 : vector<1x16x192xf32> to vector<16x192xf32>
    %c6_70 = arith.constant 6 : index
    %c0_71 = arith.constant 0 : index
    %c0_72 = arith.constant 0 : index
    %108 = vector.load %arg5[%c6_70, %c0_71, %c0_72] : memref<8x16x192xf32, #tpu.memory_space<vmem>>, vector<1x16x192xf32>
    %109 = vector.shape_cast %108 : vector<1x16x192xf32> to vector<16x192xf32>
    %110 = arith.select %64, %107, %109 : vector<16x192xi1>, vector<16x192xf32>
    %cst_73 = arith.constant dense<0.000000e+00> : vector<16x192xf32>
    %111 = tpu.matmul %97, %1, %cst_73 {dimension_numbers = #tpu.dot_dimension_numbers<[1], [0], [0], [1], [0, 0, 1, 1], [], []>} : vector<16x64xf32>, vector<64x192xf32>, vector<16x192xf32> -> vector<16x192xf32>
    %112 = vector.extract_strided_slice %110 {offsets = [0, 0], sizes = [16, 64], strides = [1, 1]} : vector<16x192xf32> to vector<16x64xf32>
    %113 = vector.extract_strided_slice %111 {offsets = [0, 0], sizes = [16, 64], strides = [1, 1]} : vector<16x192xf32> to vector<16x64xf32>
    %114 = arith.addf %112, %113 : vector<16x64xf32>
    %115 = arith.negf %114 : vector<16x64xf32>
    %116 = math.exp %115 : vector<16x64xf32>
    %cst_74 = arith.constant 1.000000e+00 : f32
    %117 = vector.broadcast %cst_74 : f32 to vector<16x64xf32>
    %118 = arith.addf %117, %116 : vector<16x64xf32>
    %119 = arith.divf %117, %118 : vector<16x64xf32>
    %120 = vector.extract_strided_slice %110 {offsets = [0, 64], sizes = [16, 64], strides = [1, 1]} : vector<16x192xf32> to vector<16x64xf32>
    %121 = vector.extract_strided_slice %111 {offsets = [0, 64], sizes = [16, 64], strides = [1, 1]} : vector<16x192xf32> to vector<16x64xf32>
    %122 = arith.addf %120, %121 : vector<16x64xf32>
    %123 = arith.negf %122 : vector<16x64xf32>
    %124 = math.exp %123 : vector<16x64xf32>
    %cst_75 = arith.constant 1.000000e+00 : f32
    %125 = vector.broadcast %cst_75 : f32 to vector<16x64xf32>
    %126 = arith.addf %125, %124 : vector<16x64xf32>
    %127 = arith.divf %125, %126 : vector<16x64xf32>
    %128 = vector.extract_strided_slice %110 {offsets = [0, 128], sizes = [16, 64], strides = [1, 1]} : vector<16x192xf32> to vector<16x64xf32>
    %129 = vector.extract_strided_slice %111 {offsets = [0, 128], sizes = [16, 64], strides = [1, 1]} : vector<16x192xf32> to vector<16x64xf32>
    %130 = arith.mulf %119, %129 : vector<16x64xf32>
    %131 = arith.addf %128, %130 : vector<16x64xf32>
    %132 = math.tanh %131 : vector<16x64xf32>
    %cst_76 = arith.constant 1.000000e+00 : f32
    %133 = vector.broadcast %cst_76 : f32 to vector<16x64xf32>
    %134 = arith.subf %133, %127 : vector<16x64xf32>
    %135 = arith.mulf %134, %132 : vector<16x64xf32>
    %136 = arith.mulf %127, %97 : vector<16x64xf32>
    %137 = arith.addf %135, %136 : vector<16x64xf32>
    %138 = vector.extract_strided_slice %137 {offsets = [0, 0], sizes = [16, 32], strides = [1, 1]} : vector<16x64xf32> to vector<16x32xf32>
    %c1_77 = arith.constant 1 : index
    %c0_78 = arith.constant 0 : index
    %c0_79 = arith.constant 0 : index
    %139 = vector.load %arg4[%c1_77, %c0_78, %c0_79] : memref<8x16x64xf32, #tpu.memory_space<vmem>>, vector<1x16x32xf32>
    %140 = vector.shape_cast %139 : vector<1x16x32xf32> to vector<16x32xf32>
    %141 = vector.shape_cast %138 : vector<16x32xf32> to vector<1x16x32xf32>
    tpu.vector_store %arg4[%c1_77, %c0_78, %c0_79], %141 {strides = array<i32>} : memref<8x16x64xf32, #tpu.memory_space<vmem>>, vector<1x16x32xf32>,
    %142 = vector.extract_strided_slice %137 {offsets = [0, 32], sizes = [16, 32], strides = [1, 1]} : vector<16x64xf32> to vector<16x32xf32>
    %c6_80 = arith.constant 6 : index
    %c0_81 = arith.constant 0 : index
    %c32_82 = arith.constant 32 : index
    %143 = vector.load %arg4[%c6_80, %c0_81, %c32_82] : memref<8x16x64xf32, #tpu.memory_space<vmem>>, vector<1x16x32xf32>
    %144 = vector.shape_cast %143 : vector<1x16x32xf32> to vector<16x32xf32>
    %145 = vector.shape_cast %142 : vector<16x32xf32> to vector<1x16x32xf32>
    tpu.vector_store %arg4[%c6_80, %c0_81, %c32_82], %145 {strides = array<i32>} : memref<8x16x64xf32, #tpu.memory_space<vmem>>, vector<1x16x32xf32>,
    %c2_83 = arith.constant 2 : index
    %c0_84 = arith.constant 0 : index
    %c0_85 = arith.constant 0 : index
    %146 = vector.load %arg5[%c2_83, %c0_84, %c0_85] : memref<8x16x192xf32, #tpu.memory_space<vmem>>, vector<1x16x192xf32>
    %147 = vector.shape_cast %146 : vector<1x16x192xf32> to vector<16x192xf32>
    %c5_86 = arith.constant 5 : index
    %c0_87 = arith.constant 0 : index
    %c0_88 = arith.constant 0 : index
    %148 = vector.load %arg5[%c5_86, %c0_87, %c0_88] : memref<8x16x192xf32, #tpu.memory_space<vmem>>, vector<1x16x192xf32>
    %149 = vector.shape_cast %148 : vector<1x16x192xf32> to vector<16x192xf32>
    %150 = arith.select %64, %147, %149 : vector<16x192xi1>, vector<16x192xf32>
    %cst_89 = arith.constant dense<0.000000e+00> : vector<16x192xf32>
    %151 = tpu.matmul %137, %1, %cst_89 {dimension_numbers = #tpu.dot_dimension_numbers<[1], [0], [0], [1], [0, 0, 1, 1], [], []>} : vector<16x64xf32>, vector<64x192xf32>, vector<16x192xf32> -> vector<16x192xf32>
    %152 = vector.extract_strided_slice %150 {offsets = [0, 0], sizes = [16, 64], strides = [1, 1]} : vector<16x192xf32> to vector<16x64xf32>
    %153 = vector.extract_strided_slice %151 {offsets = [0, 0], sizes = [16, 64], strides = [1, 1]} : vector<16x192xf32> to vector<16x64xf32>
    %154 = arith.addf %152, %153 : vector<16x64xf32>
    %155 = arith.negf %154 : vector<16x64xf32>
    %156 = math.exp %155 : vector<16x64xf32>
    %cst_90 = arith.constant 1.000000e+00 : f32
    %157 = vector.broadcast %cst_90 : f32 to vector<16x64xf32>
    %158 = arith.addf %157, %156 : vector<16x64xf32>
    %159 = arith.divf %157, %158 : vector<16x64xf32>
    %160 = vector.extract_strided_slice %150 {offsets = [0, 64], sizes = [16, 64], strides = [1, 1]} : vector<16x192xf32> to vector<16x64xf32>
    %161 = vector.extract_strided_slice %151 {offsets = [0, 64], sizes = [16, 64], strides = [1, 1]} : vector<16x192xf32> to vector<16x64xf32>
    %162 = arith.addf %160, %161 : vector<16x64xf32>
    %163 = arith.negf %162 : vector<16x64xf32>
    %164 = math.exp %163 : vector<16x64xf32>
    %cst_91 = arith.constant 1.000000e+00 : f32
    %165 = vector.broadcast %cst_91 : f32 to vector<16x64xf32>
    %166 = arith.addf %165, %164 : vector<16x64xf32>
    %167 = arith.divf %165, %166 : vector<16x64xf32>
    %168 = vector.extract_strided_slice %150 {offsets = [0, 128], sizes = [16, 64], strides = [1, 1]} : vector<16x192xf32> to vector<16x64xf32>
    %169 = vector.extract_strided_slice %151 {offsets = [0, 128], sizes = [16, 64], strides = [1, 1]} : vector<16x192xf32> to vector<16x64xf32>
    %170 = arith.mulf %159, %169 : vector<16x64xf32>
    %171 = arith.addf %168, %170 : vector<16x64xf32>
    %172 = math.tanh %171 : vector<16x64xf32>
    %cst_92 = arith.constant 1.000000e+00 : f32
    %173 = vector.broadcast %cst_92 : f32 to vector<16x64xf32>
    %174 = arith.subf %173, %167 : vector<16x64xf32>
    %175 = arith.mulf %174, %172 : vector<16x64xf32>
    %176 = arith.mulf %167, %137 : vector<16x64xf32>
    %177 = arith.addf %175, %176 : vector<16x64xf32>
    %178 = vector.extract_strided_slice %177 {offsets = [0, 0], sizes = [16, 32], strides = [1, 1]} : vector<16x64xf32> to vector<16x32xf32>
    %c2_93 = arith.constant 2 : index
    %c0_94 = arith.constant 0 : index
    %c0_95 = arith.constant 0 : index
    %179 = vector.load %arg4[%c2_93, %c0_94, %c0_95] : memref<8x16x64xf32, #tpu.memory_space<vmem>>, vector<1x16x32xf32>
    %180 = vector.shape_cast %179 : vector<1x16x32xf32> to vector<16x32xf32>
    %181 = vector.shape_cast %178 : vector<16x32xf32> to vector<1x16x32xf32>
    tpu.vector_store %arg4[%c2_93, %c0_94, %c0_95], %181 {strides = array<i32>} : memref<8x16x64xf32, #tpu.memory_space<vmem>>, vector<1x16x32xf32>,
    %182 = vector.extract_strided_slice %177 {offsets = [0, 32], sizes = [16, 32], strides = [1, 1]} : vector<16x64xf32> to vector<16x32xf32>
    %c5_96 = arith.constant 5 : index
    %c0_97 = arith.constant 0 : index
    %c32_98 = arith.constant 32 : index
    %183 = vector.load %arg4[%c5_96, %c0_97, %c32_98] : memref<8x16x64xf32, #tpu.memory_space<vmem>>, vector<1x16x32xf32>
    %184 = vector.shape_cast %183 : vector<1x16x32xf32> to vector<16x32xf32>
    %185 = vector.shape_cast %182 : vector<16x32xf32> to vector<1x16x32xf32>
    tpu.vector_store %arg4[%c5_96, %c0_97, %c32_98], %185 {strides = array<i32>} : memref<8x16x64xf32, #tpu.memory_space<vmem>>, vector<1x16x32xf32>,
    %c3_99 = arith.constant 3 : index
    %c0_100 = arith.constant 0 : index
    %c0_101 = arith.constant 0 : index
    %186 = vector.load %arg5[%c3_99, %c0_100, %c0_101] : memref<8x16x192xf32, #tpu.memory_space<vmem>>, vector<1x16x192xf32>
    %187 = vector.shape_cast %186 : vector<1x16x192xf32> to vector<16x192xf32>
    %c4_102 = arith.constant 4 : index
    %c0_103 = arith.constant 0 : index
    %c0_104 = arith.constant 0 : index
    %188 = vector.load %arg5[%c4_102, %c0_103, %c0_104] : memref<8x16x192xf32, #tpu.memory_space<vmem>>, vector<1x16x192xf32>
    %189 = vector.shape_cast %188 : vector<1x16x192xf32> to vector<16x192xf32>
    %190 = arith.select %64, %187, %189 : vector<16x192xi1>, vector<16x192xf32>
    %cst_105 = arith.constant dense<0.000000e+00> : vector<16x192xf32>
    %191 = tpu.matmul %177, %1, %cst_105 {dimension_numbers = #tpu.dot_dimension_numbers<[1], [0], [0], [1], [0, 0, 1, 1], [], []>} : vector<16x64xf32>, vector<64x192xf32>, vector<16x192xf32> -> vector<16x192xf32>
    %192 = vector.extract_strided_slice %190 {offsets = [0, 0], sizes = [16, 64], strides = [1, 1]} : vector<16x192xf32> to vector<16x64xf32>
    %193 = vector.extract_strided_slice %191 {offsets = [0, 0], sizes = [16, 64], strides = [1, 1]} : vector<16x192xf32> to vector<16x64xf32>
    %194 = arith.addf %192, %193 : vector<16x64xf32>
    %195 = arith.negf %194 : vector<16x64xf32>
    %196 = math.exp %195 : vector<16x64xf32>
    %cst_106 = arith.constant 1.000000e+00 : f32
    %197 = vector.broadcast %cst_106 : f32 to vector<16x64xf32>
    %198 = arith.addf %197, %196 : vector<16x64xf32>
    %199 = arith.divf %197, %198 : vector<16x64xf32>
    %200 = vector.extract_strided_slice %190 {offsets = [0, 64], sizes = [16, 64], strides = [1, 1]} : vector<16x192xf32> to vector<16x64xf32>
    %201 = vector.extract_strided_slice %191 {offsets = [0, 64], sizes = [16, 64], strides = [1, 1]} : vector<16x192xf32> to vector<16x64xf32>
    %202 = arith.addf %200, %201 : vector<16x64xf32>
    %203 = arith.negf %202 : vector<16x64xf32>
    %204 = math.exp %203 : vector<16x64xf32>
    %cst_107 = arith.constant 1.000000e+00 : f32
    %205 = vector.broadcast %cst_107 : f32 to vector<16x64xf32>
    %206 = arith.addf %205, %204 : vector<16x64xf32>
    %207 = arith.divf %205, %206 : vector<16x64xf32>
    %208 = vector.extract_strided_slice %190 {offsets = [0, 128], sizes = [16, 64], strides = [1, 1]} : vector<16x192xf32> to vector<16x64xf32>
    %209 = vector.extract_strided_slice %191 {offsets = [0, 128], sizes = [16, 64], strides = [1, 1]} : vector<16x192xf32> to vector<16x64xf32>
    %210 = arith.mulf %199, %209 : vector<16x64xf32>
    %211 = arith.addf %208, %210 : vector<16x64xf32>
    %212 = math.tanh %211 : vector<16x64xf32>
    %cst_108 = arith.constant 1.000000e+00 : f32
    %213 = vector.broadcast %cst_108 : f32 to vector<16x64xf32>
    %214 = arith.subf %213, %207 : vector<16x64xf32>
    %215 = arith.mulf %214, %212 : vector<16x64xf32>
    %216 = arith.mulf %207, %177 : vector<16x64xf32>
    %217 = arith.addf %215, %216 : vector<16x64xf32>
    %218 = vector.extract_strided_slice %217 {offsets = [0, 0], sizes = [16, 32], strides = [1, 1]} : vector<16x64xf32> to vector<16x32xf32>
    %c3_109 = arith.constant 3 : index
    %c0_110 = arith.constant 0 : index
    %c0_111 = arith.constant 0 : index
    %219 = vector.load %arg4[%c3_109, %c0_110, %c0_111] : memref<8x16x64xf32, #tpu.memory_space<vmem>>, vector<1x16x32xf32>
    %220 = vector.shape_cast %219 : vector<1x16x32xf32> to vector<16x32xf32>
    %221 = vector.shape_cast %218 : vector<16x32xf32> to vector<1x16x32xf32>
    tpu.vector_store %arg4[%c3_109, %c0_110, %c0_111], %221 {strides = array<i32>} : memref<8x16x64xf32, #tpu.memory_space<vmem>>, vector<1x16x32xf32>,
    %222 = vector.extract_strided_slice %217 {offsets = [0, 32], sizes = [16, 32], strides = [1, 1]} : vector<16x64xf32> to vector<16x32xf32>
    %c4_112 = arith.constant 4 : index
    %c0_113 = arith.constant 0 : index
    %c32_114 = arith.constant 32 : index
    %223 = vector.load %arg4[%c4_112, %c0_113, %c32_114] : memref<8x16x64xf32, #tpu.memory_space<vmem>>, vector<1x16x32xf32>
    %224 = vector.shape_cast %223 : vector<1x16x32xf32> to vector<16x32xf32>
    %225 = vector.shape_cast %222 : vector<16x32xf32> to vector<1x16x32xf32>
    tpu.vector_store %arg4[%c4_112, %c0_113, %c32_114], %225 {strides = array<i32>} : memref<8x16x64xf32, #tpu.memory_space<vmem>>, vector<1x16x32xf32>,
    %c4_115 = arith.constant 4 : index
    %c0_116 = arith.constant 0 : index
    %c0_117 = arith.constant 0 : index
    %226 = vector.load %arg5[%c4_115, %c0_116, %c0_117] : memref<8x16x192xf32, #tpu.memory_space<vmem>>, vector<1x16x192xf32>
    %227 = vector.shape_cast %226 : vector<1x16x192xf32> to vector<16x192xf32>
    %c3_118 = arith.constant 3 : index
    %c0_119 = arith.constant 0 : index
    %c0_120 = arith.constant 0 : index
    %228 = vector.load %arg5[%c3_118, %c0_119, %c0_120] : memref<8x16x192xf32, #tpu.memory_space<vmem>>, vector<1x16x192xf32>
    %229 = vector.shape_cast %228 : vector<1x16x192xf32> to vector<16x192xf32>
    %230 = arith.select %64, %227, %229 : vector<16x192xi1>, vector<16x192xf32>
    %cst_121 = arith.constant dense<0.000000e+00> : vector<16x192xf32>
    %231 = tpu.matmul %217, %1, %cst_121 {dimension_numbers = #tpu.dot_dimension_numbers<[1], [0], [0], [1], [0, 0, 1, 1], [], []>} : vector<16x64xf32>, vector<64x192xf32>, vector<16x192xf32> -> vector<16x192xf32>
    %232 = vector.extract_strided_slice %230 {offsets = [0, 0], sizes = [16, 64], strides = [1, 1]} : vector<16x192xf32> to vector<16x64xf32>
    %233 = vector.extract_strided_slice %231 {offsets = [0, 0], sizes = [16, 64], strides = [1, 1]} : vector<16x192xf32> to vector<16x64xf32>
    %234 = arith.addf %232, %233 : vector<16x64xf32>
    %235 = arith.negf %234 : vector<16x64xf32>
    %236 = math.exp %235 : vector<16x64xf32>
    %cst_122 = arith.constant 1.000000e+00 : f32
    %237 = vector.broadcast %cst_122 : f32 to vector<16x64xf32>
    %238 = arith.addf %237, %236 : vector<16x64xf32>
    %239 = arith.divf %237, %238 : vector<16x64xf32>
    %240 = vector.extract_strided_slice %230 {offsets = [0, 64], sizes = [16, 64], strides = [1, 1]} : vector<16x192xf32> to vector<16x64xf32>
    %241 = vector.extract_strided_slice %231 {offsets = [0, 64], sizes = [16, 64], strides = [1, 1]} : vector<16x192xf32> to vector<16x64xf32>
    %242 = arith.addf %240, %241 : vector<16x64xf32>
    %243 = arith.negf %242 : vector<16x64xf32>
    %244 = math.exp %243 : vector<16x64xf32>
    %cst_123 = arith.constant 1.000000e+00 : f32
    %245 = vector.broadcast %cst_123 : f32 to vector<16x64xf32>
    %246 = arith.addf %245, %244 : vector<16x64xf32>
    %247 = arith.divf %245, %246 : vector<16x64xf32>
    %248 = vector.extract_strided_slice %230 {offsets = [0, 128], sizes = [16, 64], strides = [1, 1]} : vector<16x192xf32> to vector<16x64xf32>
    %249 = vector.extract_strided_slice %231 {offsets = [0, 128], sizes = [16, 64], strides = [1, 1]} : vector<16x192xf32> to vector<16x64xf32>
    %250 = arith.mulf %239, %249 : vector<16x64xf32>
    %251 = arith.addf %248, %250 : vector<16x64xf32>
    %252 = math.tanh %251 : vector<16x64xf32>
    %cst_124 = arith.constant 1.000000e+00 : f32
    %253 = vector.broadcast %cst_124 : f32 to vector<16x64xf32>
    %254 = arith.subf %253, %247 : vector<16x64xf32>
    %255 = arith.mulf %254, %252 : vector<16x64xf32>
    %256 = arith.mulf %247, %217 : vector<16x64xf32>
    %257 = arith.addf %255, %256 : vector<16x64xf32>
    %258 = vector.extract_strided_slice %257 {offsets = [0, 0], sizes = [16, 32], strides = [1, 1]} : vector<16x64xf32> to vector<16x32xf32>
    %c4_125 = arith.constant 4 : index
    %c0_126 = arith.constant 0 : index
    %c0_127 = arith.constant 0 : index
    %259 = vector.load %arg4[%c4_125, %c0_126, %c0_127] : memref<8x16x64xf32, #tpu.memory_space<vmem>>, vector<1x16x32xf32>
    %260 = vector.shape_cast %259 : vector<1x16x32xf32> to vector<16x32xf32>
    %261 = vector.shape_cast %258 : vector<16x32xf32> to vector<1x16x32xf32>
    tpu.vector_store %arg4[%c4_125, %c0_126, %c0_127], %261 {strides = array<i32>} : memref<8x16x64xf32, #tpu.memory_space<vmem>>, vector<1x16x32xf32>,
    %262 = vector.extract_strided_slice %257 {offsets = [0, 32], sizes = [16, 32], strides = [1, 1]} : vector<16x64xf32> to vector<16x32xf32>
    %c3_128 = arith.constant 3 : index
    %c0_129 = arith.constant 0 : index
    %c32_130 = arith.constant 32 : index
    %263 = vector.load %arg4[%c3_128, %c0_129, %c32_130] : memref<8x16x64xf32, #tpu.memory_space<vmem>>, vector<1x16x32xf32>
    %264 = vector.shape_cast %263 : vector<1x16x32xf32> to vector<16x32xf32>
    %265 = vector.shape_cast %262 : vector<16x32xf32> to vector<1x16x32xf32>
    tpu.vector_store %arg4[%c3_128, %c0_129, %c32_130], %265 {strides = array<i32>} : memref<8x16x64xf32, #tpu.memory_space<vmem>>, vector<1x16x32xf32>,
    %c5_131 = arith.constant 5 : index
    %c0_132 = arith.constant 0 : index
    %c0_133 = arith.constant 0 : index
    %266 = vector.load %arg5[%c5_131, %c0_132, %c0_133] : memref<8x16x192xf32, #tpu.memory_space<vmem>>, vector<1x16x192xf32>
    %267 = vector.shape_cast %266 : vector<1x16x192xf32> to vector<16x192xf32>
    %c2_134 = arith.constant 2 : index
    %c0_135 = arith.constant 0 : index
    %c0_136 = arith.constant 0 : index
    %268 = vector.load %arg5[%c2_134, %c0_135, %c0_136] : memref<8x16x192xf32, #tpu.memory_space<vmem>>, vector<1x16x192xf32>
    %269 = vector.shape_cast %268 : vector<1x16x192xf32> to vector<16x192xf32>
    %270 = arith.select %64, %267, %269 : vector<16x192xi1>, vector<16x192xf32>
    %cst_137 = arith.constant dense<0.000000e+00> : vector<16x192xf32>
    %271 = tpu.matmul %257, %1, %cst_137 {dimension_numbers = #tpu.dot_dimension_numbers<[1], [0], [0], [1], [0, 0, 1, 1], [], []>} : vector<16x64xf32>, vector<64x192xf32>, vector<16x192xf32> -> vector<16x192xf32>
    %272 = vector.extract_strided_slice %270 {offsets = [0, 0], sizes = [16, 64], strides = [1, 1]} : vector<16x192xf32> to vector<16x64xf32>
    %273 = vector.extract_strided_slice %271 {offsets = [0, 0], sizes = [16, 64], strides = [1, 1]} : vector<16x192xf32> to vector<16x64xf32>
    %274 = arith.addf %272, %273 : vector<16x64xf32>
    %275 = arith.negf %274 : vector<16x64xf32>
    %276 = math.exp %275 : vector<16x64xf32>
    %cst_138 = arith.constant 1.000000e+00 : f32
    %277 = vector.broadcast %cst_138 : f32 to vector<16x64xf32>
    %278 = arith.addf %277, %276 : vector<16x64xf32>
    %279 = arith.divf %277, %278 : vector<16x64xf32>
    %280 = vector.extract_strided_slice %270 {offsets = [0, 64], sizes = [16, 64], strides = [1, 1]} : vector<16x192xf32> to vector<16x64xf32>
    %281 = vector.extract_strided_slice %271 {offsets = [0, 64], sizes = [16, 64], strides = [1, 1]} : vector<16x192xf32> to vector<16x64xf32>
    %282 = arith.addf %280, %281 : vector<16x64xf32>
    %283 = arith.negf %282 : vector<16x64xf32>
    %284 = math.exp %283 : vector<16x64xf32>
    %cst_139 = arith.constant 1.000000e+00 : f32
    %285 = vector.broadcast %cst_139 : f32 to vector<16x64xf32>
    %286 = arith.addf %285, %284 : vector<16x64xf32>
    %287 = arith.divf %285, %286 : vector<16x64xf32>
    %288 = vector.extract_strided_slice %270 {offsets = [0, 128], sizes = [16, 64], strides = [1, 1]} : vector<16x192xf32> to vector<16x64xf32>
    %289 = vector.extract_strided_slice %271 {offsets = [0, 128], sizes = [16, 64], strides = [1, 1]} : vector<16x192xf32> to vector<16x64xf32>
    %290 = arith.mulf %279, %289 : vector<16x64xf32>
    %291 = arith.addf %288, %290 : vector<16x64xf32>
    %292 = math.tanh %291 : vector<16x64xf32>
    %cst_140 = arith.constant 1.000000e+00 : f32
    %293 = vector.broadcast %cst_140 : f32 to vector<16x64xf32>
    %294 = arith.subf %293, %287 : vector<16x64xf32>
    %295 = arith.mulf %294, %292 : vector<16x64xf32>
    %296 = arith.mulf %287, %257 : vector<16x64xf32>
    %297 = arith.addf %295, %296 : vector<16x64xf32>
    %298 = vector.extract_strided_slice %297 {offsets = [0, 0], sizes = [16, 32], strides = [1, 1]} : vector<16x64xf32> to vector<16x32xf32>
    %c5_141 = arith.constant 5 : index
    %c0_142 = arith.constant 0 : index
    %c0_143 = arith.constant 0 : index
    %299 = vector.load %arg4[%c5_141, %c0_142, %c0_143] : memref<8x16x64xf32, #tpu.memory_space<vmem>>, vector<1x16x32xf32>
    %300 = vector.shape_cast %299 : vector<1x16x32xf32> to vector<16x32xf32>
    %301 = vector.shape_cast %298 : vector<16x32xf32> to vector<1x16x32xf32>
    tpu.vector_store %arg4[%c5_141, %c0_142, %c0_143], %301 {strides = array<i32>} : memref<8x16x64xf32, #tpu.memory_space<vmem>>, vector<1x16x32xf32>,
    %302 = vector.extract_strided_slice %297 {offsets = [0, 32], sizes = [16, 32], strides = [1, 1]} : vector<16x64xf32> to vector<16x32xf32>
    %c2_144 = arith.constant 2 : index
    %c0_145 = arith.constant 0 : index
    %c32_146 = arith.constant 32 : index
    %303 = vector.load %arg4[%c2_144, %c0_145, %c32_146] : memref<8x16x64xf32, #tpu.memory_space<vmem>>, vector<1x16x32xf32>
    %304 = vector.shape_cast %303 : vector<1x16x32xf32> to vector<16x32xf32>
    %305 = vector.shape_cast %302 : vector<16x32xf32> to vector<1x16x32xf32>
    tpu.vector_store %arg4[%c2_144, %c0_145, %c32_146], %305 {strides = array<i32>} : memref<8x16x64xf32, #tpu.memory_space<vmem>>, vector<1x16x32xf32>,
    %c6_147 = arith.constant 6 : index
    %c0_148 = arith.constant 0 : index
    %c0_149 = arith.constant 0 : index
    %306 = vector.load %arg5[%c6_147, %c0_148, %c0_149] : memref<8x16x192xf32, #tpu.memory_space<vmem>>, vector<1x16x192xf32>
    %307 = vector.shape_cast %306 : vector<1x16x192xf32> to vector<16x192xf32>
    %c1_150 = arith.constant 1 : index
    %c0_151 = arith.constant 0 : index
    %c0_152 = arith.constant 0 : index
    %308 = vector.load %arg5[%c1_150, %c0_151, %c0_152] : memref<8x16x192xf32, #tpu.memory_space<vmem>>, vector<1x16x192xf32>
    %309 = vector.shape_cast %308 : vector<1x16x192xf32> to vector<16x192xf32>
    %310 = arith.select %64, %307, %309 : vector<16x192xi1>, vector<16x192xf32>
    %cst_153 = arith.constant dense<0.000000e+00> : vector<16x192xf32>
    %311 = tpu.matmul %297, %1, %cst_153 {dimension_numbers = #tpu.dot_dimension_numbers<[1], [0], [0], [1], [0, 0, 1, 1], [], []>} : vector<16x64xf32>, vector<64x192xf32>, vector<16x192xf32> -> vector<16x192xf32>
    %312 = vector.extract_strided_slice %310 {offsets = [0, 0], sizes = [16, 64], strides = [1, 1]} : vector<16x192xf32> to vector<16x64xf32>
    %313 = vector.extract_strided_slice %311 {offsets = [0, 0], sizes = [16, 64], strides = [1, 1]} : vector<16x192xf32> to vector<16x64xf32>
    %314 = arith.addf %312, %313 : vector<16x64xf32>
    %315 = arith.negf %314 : vector<16x64xf32>
    %316 = math.exp %315 : vector<16x64xf32>
    %cst_154 = arith.constant 1.000000e+00 : f32
    %317 = vector.broadcast %cst_154 : f32 to vector<16x64xf32>
    %318 = arith.addf %317, %316 : vector<16x64xf32>
    %319 = arith.divf %317, %318 : vector<16x64xf32>
    %320 = vector.extract_strided_slice %310 {offsets = [0, 64], sizes = [16, 64], strides = [1, 1]} : vector<16x192xf32> to vector<16x64xf32>
    %321 = vector.extract_strided_slice %311 {offsets = [0, 64], sizes = [16, 64], strides = [1, 1]} : vector<16x192xf32> to vector<16x64xf32>
    %322 = arith.addf %320, %321 : vector<16x64xf32>
    %323 = arith.negf %322 : vector<16x64xf32>
    %324 = math.exp %323 : vector<16x64xf32>
    %cst_155 = arith.constant 1.000000e+00 : f32
    %325 = vector.broadcast %cst_155 : f32 to vector<16x64xf32>
    %326 = arith.addf %325, %324 : vector<16x64xf32>
    %327 = arith.divf %325, %326 : vector<16x64xf32>
    %328 = vector.extract_strided_slice %310 {offsets = [0, 128], sizes = [16, 64], strides = [1, 1]} : vector<16x192xf32> to vector<16x64xf32>
    %329 = vector.extract_strided_slice %311 {offsets = [0, 128], sizes = [16, 64], strides = [1, 1]} : vector<16x192xf32> to vector<16x64xf32>
    %330 = arith.mulf %319, %329 : vector<16x64xf32>
    %331 = arith.addf %328, %330 : vector<16x64xf32>
    %332 = math.tanh %331 : vector<16x64xf32>
    %cst_156 = arith.constant 1.000000e+00 : f32
    %333 = vector.broadcast %cst_156 : f32 to vector<16x64xf32>
    %334 = arith.subf %333, %327 : vector<16x64xf32>
    %335 = arith.mulf %334, %332 : vector<16x64xf32>
    %336 = arith.mulf %327, %297 : vector<16x64xf32>
    %337 = arith.addf %335, %336 : vector<16x64xf32>
    %338 = vector.extract_strided_slice %337 {offsets = [0, 0], sizes = [16, 32], strides = [1, 1]} : vector<16x64xf32> to vector<16x32xf32>
    %c6_157 = arith.constant 6 : index
    %c0_158 = arith.constant 0 : index
    %c0_159 = arith.constant 0 : index
    %339 = vector.load %arg4[%c6_157, %c0_158, %c0_159] : memref<8x16x64xf32, #tpu.memory_space<vmem>>, vector<1x16x32xf32>
    %340 = vector.shape_cast %339 : vector<1x16x32xf32> to vector<16x32xf32>
    %341 = vector.shape_cast %338 : vector<16x32xf32> to vector<1x16x32xf32>
    tpu.vector_store %arg4[%c6_157, %c0_158, %c0_159], %341 {strides = array<i32>} : memref<8x16x64xf32, #tpu.memory_space<vmem>>, vector<1x16x32xf32>,
    %342 = vector.extract_strided_slice %337 {offsets = [0, 32], sizes = [16, 32], strides = [1, 1]} : vector<16x64xf32> to vector<16x32xf32>
    %c1_160 = arith.constant 1 : index
    %c0_161 = arith.constant 0 : index
    %c32_162 = arith.constant 32 : index
    %343 = vector.load %arg4[%c1_160, %c0_161, %c32_162] : memref<8x16x64xf32, #tpu.memory_space<vmem>>, vector<1x16x32xf32>
    %344 = vector.shape_cast %343 : vector<1x16x32xf32> to vector<16x32xf32>
    %345 = vector.shape_cast %342 : vector<16x32xf32> to vector<1x16x32xf32>
    tpu.vector_store %arg4[%c1_160, %c0_161, %c32_162], %345 {strides = array<i32>} : memref<8x16x64xf32, #tpu.memory_space<vmem>>, vector<1x16x32xf32>,
    %c7_163 = arith.constant 7 : index
    %c0_164 = arith.constant 0 : index
    %c0_165 = arith.constant 0 : index
    %346 = vector.load %arg5[%c7_163, %c0_164, %c0_165] : memref<8x16x192xf32, #tpu.memory_space<vmem>>, vector<1x16x192xf32>
    %347 = vector.shape_cast %346 : vector<1x16x192xf32> to vector<16x192xf32>
    %c0_166 = arith.constant 0 : index
    %c0_167 = arith.constant 0 : index
    %c0_168 = arith.constant 0 : index
    %348 = vector.load %arg5[%c0_166, %c0_167, %c0_168] : memref<8x16x192xf32, #tpu.memory_space<vmem>>, vector<1x16x192xf32>
    %349 = vector.shape_cast %348 : vector<1x16x192xf32> to vector<16x192xf32>
    %350 = arith.select %64, %347, %349 : vector<16x192xi1>, vector<16x192xf32>
    %cst_169 = arith.constant dense<0.000000e+00> : vector<16x192xf32>
    %351 = tpu.matmul %337, %1, %cst_169 {dimension_numbers = #tpu.dot_dimension_numbers<[1], [0], [0], [1], [0, 0, 1, 1], [], []>} : vector<16x64xf32>, vector<64x192xf32>, vector<16x192xf32> -> vector<16x192xf32>
    %352 = vector.extract_strided_slice %350 {offsets = [0, 0], sizes = [16, 64], strides = [1, 1]} : vector<16x192xf32> to vector<16x64xf32>
    %353 = vector.extract_strided_slice %351 {offsets = [0, 0], sizes = [16, 64], strides = [1, 1]} : vector<16x192xf32> to vector<16x64xf32>
    %354 = arith.addf %352, %353 : vector<16x64xf32>
    %355 = arith.negf %354 : vector<16x64xf32>
    %356 = math.exp %355 : vector<16x64xf32>
    %cst_170 = arith.constant 1.000000e+00 : f32
    %357 = vector.broadcast %cst_170 : f32 to vector<16x64xf32>
    %358 = arith.addf %357, %356 : vector<16x64xf32>
    %359 = arith.divf %357, %358 : vector<16x64xf32>
    %360 = vector.extract_strided_slice %350 {offsets = [0, 64], sizes = [16, 64], strides = [1, 1]} : vector<16x192xf32> to vector<16x64xf32>
    %361 = vector.extract_strided_slice %351 {offsets = [0, 64], sizes = [16, 64], strides = [1, 1]} : vector<16x192xf32> to vector<16x64xf32>
    %362 = arith.addf %360, %361 : vector<16x64xf32>
    %363 = arith.negf %362 : vector<16x64xf32>
    %364 = math.exp %363 : vector<16x64xf32>
    %cst_171 = arith.constant 1.000000e+00 : f32
    %365 = vector.broadcast %cst_171 : f32 to vector<16x64xf32>
    %366 = arith.addf %365, %364 : vector<16x64xf32>
    %367 = arith.divf %365, %366 : vector<16x64xf32>
    %368 = vector.extract_strided_slice %350 {offsets = [0, 128], sizes = [16, 64], strides = [1, 1]} : vector<16x192xf32> to vector<16x64xf32>
    %369 = vector.extract_strided_slice %351 {offsets = [0, 128], sizes = [16, 64], strides = [1, 1]} : vector<16x192xf32> to vector<16x64xf32>
    %370 = arith.mulf %359, %369 : vector<16x64xf32>
    %371 = arith.addf %368, %370 : vector<16x64xf32>
    %372 = math.tanh %371 : vector<16x64xf32>
    %cst_172 = arith.constant 1.000000e+00 : f32
    %373 = vector.broadcast %cst_172 : f32 to vector<16x64xf32>
    %374 = arith.subf %373, %367 : vector<16x64xf32>
    %375 = arith.mulf %374, %372 : vector<16x64xf32>
    %376 = arith.mulf %367, %337 : vector<16x64xf32>
    %377 = arith.addf %375, %376 : vector<16x64xf32>
    %378 = vector.extract_strided_slice %377 {offsets = [0, 0], sizes = [16, 32], strides = [1, 1]} : vector<16x64xf32> to vector<16x32xf32>
    %c7_173 = arith.constant 7 : index
    %c0_174 = arith.constant 0 : index
    %c0_175 = arith.constant 0 : index
    %379 = vector.load %arg4[%c7_173, %c0_174, %c0_175] : memref<8x16x64xf32, #tpu.memory_space<vmem>>, vector<1x16x32xf32>
    %380 = vector.shape_cast %379 : vector<1x16x32xf32> to vector<16x32xf32>
    %381 = vector.shape_cast %378 : vector<16x32xf32> to vector<1x16x32xf32>
    tpu.vector_store %arg4[%c7_173, %c0_174, %c0_175], %381 {strides = array<i32>} : memref<8x16x64xf32, #tpu.memory_space<vmem>>, vector<1x16x32xf32>,
    %382 = vector.extract_strided_slice %377 {offsets = [0, 32], sizes = [16, 32], strides = [1, 1]} : vector<16x64xf32> to vector<16x32xf32>
    %c0_176 = arith.constant 0 : index
    %c0_177 = arith.constant 0 : index
    %c32_178 = arith.constant 32 : index
    %383 = vector.load %arg4[%c0_176, %c0_177, %c32_178] : memref<8x16x64xf32, #tpu.memory_space<vmem>>, vector<1x16x32xf32>
    %384 = vector.shape_cast %383 : vector<1x16x32xf32> to vector<16x32xf32>
    %385 = vector.shape_cast %382 : vector<16x32xf32> to vector<1x16x32xf32>
    tpu.vector_store %arg4[%c0_176, %c0_177, %c32_178], %385 {strides = array<i32>} : memref<8x16x64xf32, #tpu.memory_space<vmem>>, vector<1x16x32xf32>,
    return
  }
  func.func @transform_0(%arg0: i32) -> (i32, i32, i32) {
    %c0_i32 = arith.constant 0 : i32
    %c0_i32_0 = arith.constant 0 : i32
    %c0_i32_1 = arith.constant 0 : i32
    return %c0_i32, %arg0, %c0_i32_0 : i32, i32, i32
  }
  func.func @transform_1(%arg0: i32) -> (i32, i32) {
    %c0_i32 = arith.constant 0 : i32
    %c0_i32_0 = arith.constant 0 : i32
    %c0_i32_1 = arith.constant 0 : i32
    return %c0_i32, %c0_i32_0 : i32, i32
  }
  func.func @transform_2(%arg0: i32) -> (i32, i32) {
    %c0_i32 = arith.constant 0 : i32
    %c0_i32_0 = arith.constant 0 : i32
    %c0_i32_1 = arith.constant 0 : i32
    return %c0_i32, %c0_i32_0 : i32, i32
  }
  func.func @transform_3(%arg0: i32) -> (i32, i32, i32) {
    %c0_i32 = arith.constant 0 : i32
    %c0_i32_0 = arith.constant 0 : i32
    %c0_i32_1 = arith.constant 0 : i32
    return %c0_i32, %arg0, %c0_i32_0 : i32, i32, i32
  }
}

module attributes {stable_mosaic.version = 11 : i64} {
  func.func @_bigru_kernel(%arg0: i32, %arg1: memref<8x16x64xf32, #tpu.memory_space<vmem>>, %arg2: memref<64x192xf32, #tpu.memory_space<vmem>>, %arg3: memref<64x192xf32, #tpu.memory_space<vmem>>, %arg4: memref<8x16x64xf32, #tpu.memory_space<vmem>>, %arg5: memref<8x16x192xf32, #tpu.memory_space<vmem>>) attributes {dimension_semantics = [#tpu.dimension_semantics<parallel>], iteration_bounds = array<i64: 1>, scalar_prefetch = 0 : i64, scratch_operands = 1 : i64, tpu.core_type = #tpu.core_type<tc>, window_params = [{transform_indices = @transform_0, window_bounds = array<i64: 8, 16, 64>}, {pipeline_mode = #tpu.pipeline_mode<synchronous>, transform_indices = @transform_1, window_bounds = array<i64: 64, 192>}, {pipeline_mode = #tpu.pipeline_mode<synchronous>, transform_indices = @transform_2, window_bounds = array<i64: 64, 192>}, {transform_indices = @transform_3, window_bounds = array<i64: 8, 16, 64>}]} {
    %c0 = arith.constant 0 : index
    %c0_0 = arith.constant 0 : index
    %0 = vector.load %arg2[%c0, %c0_0] : memref<64x192xf32, #tpu.memory_space<vmem>>, vector<64x192xf32>
    %c0_1 = arith.constant 0 : index
    %c0_2 = arith.constant 0 : index
    %1 = vector.load %arg3[%c0_1, %c0_2] : memref<64x192xf32, #tpu.memory_space<vmem>>, vector<64x192xf32>
    %c0_3 = arith.constant 0 : index
    %c0_4 = arith.constant 0 : index
    %c0_5 = arith.constant 0 : index
    %2 = vector.load %arg1[%c0_3, %c0_4, %c0_5] : memref<8x16x64xf32, #tpu.memory_space<vmem>>, vector<1x16x64xf32>
    %3 = vector.shape_cast %2 : vector<1x16x64xf32> to vector<16x64xf32>
    %cst = arith.constant dense<0.000000e+00> : vector<16x192xf32>
    %4 = tpu.matmul %3, %0, %cst {dimension_numbers = #tpu.dot_dimension_numbers<[1], [0], [0], [1], [0, 0, 1, 1], [], []>} : vector<16x64xf32>, vector<64x192xf32>, vector<16x192xf32> -> vector<16x192xf32>
    %c0_6 = arith.constant 0 : index
    %c0_7 = arith.constant 0 : index
    %c0_8 = arith.constant 0 : index
    %5 = vector.load %arg5[%c0_6, %c0_7, %c0_8] : memref<8x16x192xf32, #tpu.memory_space<vmem>>, vector<1x16x192xf32>
    %6 = vector.shape_cast %5 : vector<1x16x192xf32> to vector<16x192xf32>
    %7 = vector.shape_cast %4 : vector<16x192xf32> to vector<1x16x192xf32>
    tpu.vector_store %arg5[%c0_6, %c0_7, %c0_8], %7 {strides = array<i32>} : memref<8x16x192xf32, #tpu.memory_space<vmem>>, vector<1x16x192xf32>,
    %c1 = arith.constant 1 : index
    %c0_9 = arith.constant 0 : index
    %c0_10 = arith.constant 0 : index
    %8 = vector.load %arg1[%c1, %c0_9, %c0_10] : memref<8x16x64xf32, #tpu.memory_space<vmem>>, vector<1x16x64xf32>
    %9 = vector.shape_cast %8 : vector<1x16x64xf32> to vector<16x64xf32>
    %cst_11 = arith.constant dense<0.000000e+00> : vector<16x192xf32>
    %10 = tpu.matmul %9, %0, %cst_11 {dimension_numbers = #tpu.dot_dimension_numbers<[1], [0], [0], [1], [0, 0, 1, 1], [], []>} : vector<16x64xf32>, vector<64x192xf32>, vector<16x192xf32> -> vector<16x192xf32>
    %c1_12 = arith.constant 1 : index
    %c0_13 = arith.constant 0 : index
    %c0_14 = arith.constant 0 : index
    %11 = vector.load %arg5[%c1_12, %c0_13, %c0_14] : memref<8x16x192xf32, #tpu.memory_space<vmem>>, vector<1x16x192xf32>
    %12 = vector.shape_cast %11 : vector<1x16x192xf32> to vector<16x192xf32>
    %13 = vector.shape_cast %10 : vector<16x192xf32> to vector<1x16x192xf32>
    tpu.vector_store %arg5[%c1_12, %c0_13, %c0_14], %13 {strides = array<i32>} : memref<8x16x192xf32, #tpu.memory_space<vmem>>, vector<1x16x192xf32>,
    %c2 = arith.constant 2 : index
    %c0_15 = arith.constant 0 : index
    %c0_16 = arith.constant 0 : index
    %14 = vector.load %arg1[%c2, %c0_15, %c0_16] : memref<8x16x64xf32, #tpu.memory_space<vmem>>, vector<1x16x64xf32>
    %15 = vector.shape_cast %14 : vector<1x16x64xf32> to vector<16x64xf32>
    %cst_17 = arith.constant dense<0.000000e+00> : vector<16x192xf32>
    %16 = tpu.matmul %15, %0, %cst_17 {dimension_numbers = #tpu.dot_dimension_numbers<[1], [0], [0], [1], [0, 0, 1, 1], [], []>} : vector<16x64xf32>, vector<64x192xf32>, vector<16x192xf32> -> vector<16x192xf32>
    %c2_18 = arith.constant 2 : index
    %c0_19 = arith.constant 0 : index
    %c0_20 = arith.constant 0 : index
    %17 = vector.load %arg5[%c2_18, %c0_19, %c0_20] : memref<8x16x192xf32, #tpu.memory_space<vmem>>, vector<1x16x192xf32>
    %18 = vector.shape_cast %17 : vector<1x16x192xf32> to vector<16x192xf32>
    %19 = vector.shape_cast %16 : vector<16x192xf32> to vector<1x16x192xf32>
    tpu.vector_store %arg5[%c2_18, %c0_19, %c0_20], %19 {strides = array<i32>} : memref<8x16x192xf32, #tpu.memory_space<vmem>>, vector<1x16x192xf32>,
    %c3 = arith.constant 3 : index
    %c0_21 = arith.constant 0 : index
    %c0_22 = arith.constant 0 : index
    %20 = vector.load %arg1[%c3, %c0_21, %c0_22] : memref<8x16x64xf32, #tpu.memory_space<vmem>>, vector<1x16x64xf32>
    %21 = vector.shape_cast %20 : vector<1x16x64xf32> to vector<16x64xf32>
    %cst_23 = arith.constant dense<0.000000e+00> : vector<16x192xf32>
    %22 = tpu.matmul %21, %0, %cst_23 {dimension_numbers = #tpu.dot_dimension_numbers<[1], [0], [0], [1], [0, 0, 1, 1], [], []>} : vector<16x64xf32>, vector<64x192xf32>, vector<16x192xf32> -> vector<16x192xf32>
    %c3_24 = arith.constant 3 : index
    %c0_25 = arith.constant 0 : index
    %c0_26 = arith.constant 0 : index
    %23 = vector.load %arg5[%c3_24, %c0_25, %c0_26] : memref<8x16x192xf32, #tpu.memory_space<vmem>>, vector<1x16x192xf32>
    %24 = vector.shape_cast %23 : vector<1x16x192xf32> to vector<16x192xf32>
    %25 = vector.shape_cast %22 : vector<16x192xf32> to vector<1x16x192xf32>
    tpu.vector_store %arg5[%c3_24, %c0_25, %c0_26], %25 {strides = array<i32>} : memref<8x16x192xf32, #tpu.memory_space<vmem>>, vector<1x16x192xf32>,
    %c4 = arith.constant 4 : index
    %c0_27 = arith.constant 0 : index
    %c0_28 = arith.constant 0 : index
    %26 = vector.load %arg1[%c4, %c0_27, %c0_28] : memref<8x16x64xf32, #tpu.memory_space<vmem>>, vector<1x16x64xf32>
    %27 = vector.shape_cast %26 : vector<1x16x64xf32> to vector<16x64xf32>
    %cst_29 = arith.constant dense<0.000000e+00> : vector<16x192xf32>
    %28 = tpu.matmul %27, %0, %cst_29 {dimension_numbers = #tpu.dot_dimension_numbers<[1], [0], [0], [1], [0, 0, 1, 1], [], []>} : vector<16x64xf32>, vector<64x192xf32>, vector<16x192xf32> -> vector<16x192xf32>
    %c4_30 = arith.constant 4 : index
    %c0_31 = arith.constant 0 : index
    %c0_32 = arith.constant 0 : index
    %29 = vector.load %arg5[%c4_30, %c0_31, %c0_32] : memref<8x16x192xf32, #tpu.memory_space<vmem>>, vector<1x16x192xf32>
    %30 = vector.shape_cast %29 : vector<1x16x192xf32> to vector<16x192xf32>
    %31 = vector.shape_cast %28 : vector<16x192xf32> to vector<1x16x192xf32>
    tpu.vector_store %arg5[%c4_30, %c0_31, %c0_32], %31 {strides = array<i32>} : memref<8x16x192xf32, #tpu.memory_space<vmem>>, vector<1x16x192xf32>,
    %c5 = arith.constant 5 : index
    %c0_33 = arith.constant 0 : index
    %c0_34 = arith.constant 0 : index
    %32 = vector.load %arg1[%c5, %c0_33, %c0_34] : memref<8x16x64xf32, #tpu.memory_space<vmem>>, vector<1x16x64xf32>
    %33 = vector.shape_cast %32 : vector<1x16x64xf32> to vector<16x64xf32>
    %cst_35 = arith.constant dense<0.000000e+00> : vector<16x192xf32>
    %34 = tpu.matmul %33, %0, %cst_35 {dimension_numbers = #tpu.dot_dimension_numbers<[1], [0], [0], [1], [0, 0, 1, 1], [], []>} : vector<16x64xf32>, vector<64x192xf32>, vector<16x192xf32> -> vector<16x192xf32>
    %c5_36 = arith.constant 5 : index
    %c0_37 = arith.constant 0 : index
    %c0_38 = arith.constant 0 : index
    %35 = vector.load %arg5[%c5_36, %c0_37, %c0_38] : memref<8x16x192xf32, #tpu.memory_space<vmem>>, vector<1x16x192xf32>
    %36 = vector.shape_cast %35 : vector<1x16x192xf32> to vector<16x192xf32>
    %37 = vector.shape_cast %34 : vector<16x192xf32> to vector<1x16x192xf32>
    tpu.vector_store %arg5[%c5_36, %c0_37, %c0_38], %37 {strides = array<i32>} : memref<8x16x192xf32, #tpu.memory_space<vmem>>, vector<1x16x192xf32>,
    %c6 = arith.constant 6 : index
    %c0_39 = arith.constant 0 : index
    %c0_40 = arith.constant 0 : index
    %38 = vector.load %arg1[%c6, %c0_39, %c0_40] : memref<8x16x64xf32, #tpu.memory_space<vmem>>, vector<1x16x64xf32>
    %39 = vector.shape_cast %38 : vector<1x16x64xf32> to vector<16x64xf32>
    %cst_41 = arith.constant dense<0.000000e+00> : vector<16x192xf32>
    %40 = tpu.matmul %39, %0, %cst_41 {dimension_numbers = #tpu.dot_dimension_numbers<[1], [0], [0], [1], [0, 0, 1, 1], [], []>} : vector<16x64xf32>, vector<64x192xf32>, vector<16x192xf32> -> vector<16x192xf32>
    %c6_42 = arith.constant 6 : index
    %c0_43 = arith.constant 0 : index
    %c0_44 = arith.constant 0 : index
    %41 = vector.load %arg5[%c6_42, %c0_43, %c0_44] : memref<8x16x192xf32, #tpu.memory_space<vmem>>, vector<1x16x192xf32>
    %42 = vector.shape_cast %41 : vector<1x16x192xf32> to vector<16x192xf32>
    %43 = vector.shape_cast %40 : vector<16x192xf32> to vector<1x16x192xf32>
    tpu.vector_store %arg5[%c6_42, %c0_43, %c0_44], %43 {strides = array<i32>} : memref<8x16x192xf32, #tpu.memory_space<vmem>>, vector<1x16x192xf32>,
    %c7 = arith.constant 7 : index
    %c0_45 = arith.constant 0 : index
    %c0_46 = arith.constant 0 : index
    %44 = vector.load %arg1[%c7, %c0_45, %c0_46] : memref<8x16x64xf32, #tpu.memory_space<vmem>>, vector<1x16x64xf32>
    %45 = vector.shape_cast %44 : vector<1x16x64xf32> to vector<16x64xf32>
    %cst_47 = arith.constant dense<0.000000e+00> : vector<16x192xf32>
    %46 = tpu.matmul %45, %0, %cst_47 {dimension_numbers = #tpu.dot_dimension_numbers<[1], [0], [0], [1], [0, 0, 1, 1], [], []>} : vector<16x64xf32>, vector<64x192xf32>, vector<16x192xf32> -> vector<16x192xf32>
    %c7_48 = arith.constant 7 : index
    %c0_49 = arith.constant 0 : index
    %c0_50 = arith.constant 0 : index
    %47 = vector.load %arg5[%c7_48, %c0_49, %c0_50] : memref<8x16x192xf32, #tpu.memory_space<vmem>>, vector<1x16x192xf32>
    %48 = vector.shape_cast %47 : vector<1x16x192xf32> to vector<16x192xf32>
    %49 = vector.shape_cast %46 : vector<16x192xf32> to vector<1x16x192xf32>
    tpu.vector_store %arg5[%c7_48, %c0_49, %c0_50], %49 {strides = array<i32>} : memref<8x16x192xf32, #tpu.memory_space<vmem>>, vector<1x16x192xf32>,
    %50 = tpu.iota {dimensions = array<i32: 1>} : vector<16x192xi32>
    %c32_i32 = arith.constant 32 : i32
    %51 = vector.broadcast %c32_i32 : i32 to vector<16x192xi32>
    %52 = arith.cmpi slt, %50, %51 : vector<16x192xi32>
    %c64_i32 = arith.constant 64 : i32
    %53 = vector.broadcast %c64_i32 : i32 to vector<16x192xi32>
    %54 = arith.cmpi sge, %50, %53 : vector<16x192xi32>
    %c96_i32 = arith.constant 96 : i32
    %55 = vector.broadcast %c96_i32 : i32 to vector<16x192xi32>
    %56 = arith.cmpi slt, %50, %55 : vector<16x192xi32>
    %57 = arith.andi %54, %56 : vector<16x192xi1>
    %58 = arith.ori %52, %57 : vector<16x192xi1>
    %c128_i32 = arith.constant 128 : i32
    %59 = vector.broadcast %c128_i32 : i32 to vector<16x192xi32>
    %60 = arith.cmpi sge, %50, %59 : vector<16x192xi32>
    %c160_i32 = arith.constant 160 : i32
    %61 = vector.broadcast %c160_i32 : i32 to vector<16x192xi32>
    %62 = arith.cmpi slt, %50, %61 : vector<16x192xi32>
    %63 = arith.andi %60, %62 : vector<16x192xi1>
    %64 = arith.ori %58, %63 : vector<16x192xi1>
    %cst_51 = arith.constant 0.000000e+00 : f32
    %65 = vector.broadcast %cst_51 : f32 to vector<16x64xf32>
    %c0_52 = arith.constant 0 : index
    %c0_53 = arith.constant 0 : index
    %c0_54 = arith.constant 0 : index
    %66 = vector.load %arg5[%c0_52, %c0_53, %c0_54] : memref<8x16x192xf32, #tpu.memory_space<vmem>>, vector<1x16x192xf32>
    %67 = vector.shape_cast %66 : vector<1x16x192xf32> to vector<16x192xf32>
    %c7_55 = arith.constant 7 : index
    %c0_56 = arith.constant 0 : index
    %c0_57 = arith.constant 0 : index
    %68 = vector.load %arg5[%c7_55, %c0_56, %c0_57] : memref<8x16x192xf32, #tpu.memory_space<vmem>>, vector<1x16x192xf32>
    %69 = vector.shape_cast %68 : vector<1x16x192xf32> to vector<16x192xf32>
    %70 = arith.select %64, %67, %69 : vector<16x192xi1>, vector<16x192xf32>
    %cst_58 = arith.constant 0.000000e+00 : f32
    %71 = vector.broadcast %cst_58 : f32 to vector<16x192xf32>
    %72 = vector.extract_strided_slice %70 {offsets = [0, 0], sizes = [16, 64], strides = [1, 1]} : vector<16x192xf32> to vector<16x64xf32>
    %73 = vector.extract_strided_slice %71 {offsets = [0, 0], sizes = [16, 64], strides = [1, 1]} : vector<16x192xf32> to vector<16x64xf32>
    %74 = arith.addf %72, %73 : vector<16x64xf32>
    %75 = arith.negf %74 : vector<16x64xf32>
    %76 = math.exp %75 : vector<16x64xf32>
    %cst_59 = arith.constant 1.000000e+00 : f32
    %77 = vector.broadcast %cst_59 : f32 to vector<16x64xf32>
    %78 = arith.addf %77, %76 : vector<16x64xf32>
    %79 = arith.divf %77, %78 : vector<16x64xf32>
    %80 = vector.extract_strided_slice %70 {offsets = [0, 64], sizes = [16, 64], strides = [1, 1]} : vector<16x192xf32> to vector<16x64xf32>
    %81 = vector.extract_strided_slice %71 {offsets = [0, 64], sizes = [16, 64], strides = [1, 1]} : vector<16x192xf32> to vector<16x64xf32>
    %82 = arith.addf %80, %81 : vector<16x64xf32>
    %83 = arith.negf %82 : vector<16x64xf32>
    %84 = math.exp %83 : vector<16x64xf32>
    %cst_60 = arith.constant 1.000000e+00 : f32
    %85 = vector.broadcast %cst_60 : f32 to vector<16x64xf32>
    %86 = arith.addf %85, %84 : vector<16x64xf32>
    %87 = arith.divf %85, %86 : vector<16x64xf32>
    %88 = vector.extract_strided_slice %70 {offsets = [0, 128], sizes = [16, 64], strides = [1, 1]} : vector<16x192xf32> to vector<16x64xf32>
    %89 = vector.extract_strided_slice %71 {offsets = [0, 128], sizes = [16, 64], strides = [1, 1]} : vector<16x192xf32> to vector<16x64xf32>
    %90 = arith.mulf %79, %89 : vector<16x64xf32>
    %91 = arith.addf %88, %90 : vector<16x64xf32>
    %92 = math.tanh %91 : vector<16x64xf32>
    %cst_61 = arith.constant 1.000000e+00 : f32
    %93 = vector.broadcast %cst_61 : f32 to vector<16x64xf32>
    %94 = arith.subf %93, %87 : vector<16x64xf32>
    %95 = arith.mulf %94, %92 : vector<16x64xf32>
    %96 = arith.mulf %87, %65 : vector<16x64xf32>
    %97 = arith.addf %95, %96 : vector<16x64xf32>
    %98 = vector.extract_strided_slice %97 {offsets = [0, 0], sizes = [16, 32], strides = [1, 1]} : vector<16x64xf32> to vector<16x32xf32>
    %c0_62 = arith.constant 0 : index
    %c0_63 = arith.constant 0 : index
    %c0_64 = arith.constant 0 : index
    %99 = vector.load %arg4[%c0_62, %c0_63, %c0_64] : memref<8x16x64xf32, #tpu.memory_space<vmem>>, vector<1x16x32xf32>
    %100 = vector.shape_cast %99 : vector<1x16x32xf32> to vector<16x32xf32>
    %101 = vector.shape_cast %98 : vector<16x32xf32> to vector<1x16x32xf32>
    tpu.vector_store %arg4[%c0_62, %c0_63, %c0_64], %101 {strides = array<i32>} : memref<8x16x64xf32, #tpu.memory_space<vmem>>, vector<1x16x32xf32>,
    %102 = vector.extract_strided_slice %97 {offsets = [0, 32], sizes = [16, 32], strides = [1, 1]} : vector<16x64xf32> to vector<16x32xf32>
    %c7_65 = arith.constant 7 : index
    %c0_66 = arith.constant 0 : index
    %c32 = arith.constant 32 : index
    %103 = vector.load %arg4[%c7_65, %c0_66, %c32] : memref<8x16x64xf32, #tpu.memory_space<vmem>>, vector<1x16x32xf32>
    %104 = vector.shape_cast %103 : vector<1x16x32xf32> to vector<16x32xf32>
    %105 = vector.shape_cast %102 : vector<16x32xf32> to vector<1x16x32xf32>
    tpu.vector_store %arg4[%c7_65, %c0_66, %c32], %105 {strides = array<i32>} : memref<8x16x64xf32, #tpu.memory_space<vmem>>, vector<1x16x32xf32>,
    %c1_67 = arith.constant 1 : index
    %c0_68 = arith.constant 0 : index
    %c0_69 = arith.constant 0 : index
    %106 = vector.load %arg5[%c1_67, %c0_68, %c0_69] : memref<8x16x192xf32, #tpu.memory_space<vmem>>, vector<1x16x192xf32>
    %107 = vector.shape_cast %106 : vector<1x16x192xf32> to vector<16x192xf32>
    %c6_70 = arith.constant 6 : index
    %c0_71 = arith.constant 0 : index
    %c0_72 = arith.constant 0 : index
    %108 = vector.load %arg5[%c6_70, %c0_71, %c0_72] : memref<8x16x192xf32, #tpu.memory_space<vmem>>, vector<1x16x192xf32>
    %109 = vector.shape_cast %108 : vector<1x16x192xf32> to vector<16x192xf32>
    %110 = arith.select %64, %107, %109 : vector<16x192xi1>, vector<16x192xf32>
    %cst_73 = arith.constant dense<0.000000e+00> : vector<16x192xf32>
    %111 = tpu.matmul %97, %1, %cst_73 {dimension_numbers = #tpu.dot_dimension_numbers<[1], [0], [0], [1], [0, 0, 1, 1], [], []>} : vector<16x64xf32>, vector<64x192xf32>, vector<16x192xf32> -> vector<16x192xf32>
    %112 = vector.extract_strided_slice %110 {offsets = [0, 0], sizes = [16, 64], strides = [1, 1]} : vector<16x192xf32> to vector<16x64xf32>
    %113 = vector.extract_strided_slice %111 {offsets = [0, 0], sizes = [16, 64], strides = [1, 1]} : vector<16x192xf32> to vector<16x64xf32>
    %114 = arith.addf %112, %113 : vector<16x64xf32>
    %115 = arith.negf %114 : vector<16x64xf32>
    %116 = math.exp %115 : vector<16x64xf32>
    %cst_74 = arith.constant 1.000000e+00 : f32
    %117 = vector.broadcast %cst_74 : f32 to vector<16x64xf32>
    %118 = arith.addf %117, %116 : vector<16x64xf32>
    %119 = arith.divf %117, %118 : vector<16x64xf32>
    %120 = vector.extract_strided_slice %110 {offsets = [0, 64], sizes = [16, 64], strides = [1, 1]} : vector<16x192xf32> to vector<16x64xf32>
    %121 = vector.extract_strided_slice %111 {offsets = [0, 64], sizes = [16, 64], strides = [1, 1]} : vector<16x192xf32> to vector<16x64xf32>
    %122 = arith.addf %120, %121 : vector<16x64xf32>
    %123 = arith.negf %122 : vector<16x64xf32>
    %124 = math.exp %123 : vector<16x64xf32>
    %cst_75 = arith.constant 1.000000e+00 : f32
    %125 = vector.broadcast %cst_75 : f32 to vector<16x64xf32>
    %126 = arith.addf %125, %124 : vector<16x64xf32>
    %127 = arith.divf %125, %126 : vector<16x64xf32>
    %128 = vector.extract_strided_slice %110 {offsets = [0, 128], sizes = [16, 64], strides = [1, 1]} : vector<16x192xf32> to vector<16x64xf32>
    %129 = vector.extract_strided_slice %111 {offsets = [0, 128], sizes = [16, 64], strides = [1, 1]} : vector<16x192xf32> to vector<16x64xf32>
    %130 = arith.mulf %119, %129 : vector<16x64xf32>
    %131 = arith.addf %128, %130 : vector<16x64xf32>
    %132 = math.tanh %131 : vector<16x64xf32>
    %cst_76 = arith.constant 1.000000e+00 : f32
    %133 = vector.broadcast %cst_76 : f32 to vector<16x64xf32>
    %134 = arith.subf %133, %127 : vector<16x64xf32>
    %135 = arith.mulf %134, %132 : vector<16x64xf32>
    %136 = arith.mulf %127, %97 : vector<16x64xf32>
    %137 = arith.addf %135, %136 : vector<16x64xf32>
    %138 = vector.extract_strided_slice %137 {offsets = [0, 0], sizes = [16, 32], strides = [1, 1]} : vector<16x64xf32> to vector<16x32xf32>
    %c1_77 = arith.constant 1 : index
    %c0_78 = arith.constant 0 : index
    %c0_79 = arith.constant 0 : index
    %139 = vector.load %arg4[%c1_77, %c0_78, %c0_79] : memref<8x16x64xf32, #tpu.memory_space<vmem>>, vector<1x16x32xf32>
    %140 = vector.shape_cast %139 : vector<1x16x32xf32> to vector<16x32xf32>
    %141 = vector.shape_cast %138 : vector<16x32xf32> to vector<1x16x32xf32>
    tpu.vector_store %arg4[%c1_77, %c0_78, %c0_79], %141 {strides = array<i32>} : memref<8x16x64xf32, #tpu.memory_space<vmem>>, vector<1x16x32xf32>,
    %142 = vector.extract_strided_slice %137 {offsets = [0, 32], sizes = [16, 32], strides = [1, 1]} : vector<16x64xf32> to vector<16x32xf32>
    %c6_80 = arith.constant 6 : index
    %c0_81 = arith.constant 0 : index
    %c32_82 = arith.constant 32 : index
    %143 = vector.load %arg4[%c6_80, %c0_81, %c32_82] : memref<8x16x64xf32, #tpu.memory_space<vmem>>, vector<1x16x32xf32>
    %144 = vector.shape_cast %143 : vector<1x16x32xf32> to vector<16x32xf32>
    %145 = vector.shape_cast %142 : vector<16x32xf32> to vector<1x16x32xf32>
    tpu.vector_store %arg4[%c6_80, %c0_81, %c32_82], %145 {strides = array<i32>} : memref<8x16x64xf32, #tpu.memory_space<vmem>>, vector<1x16x32xf32>,
    %c2_83 = arith.constant 2 : index
    %c0_84 = arith.constant 0 : index
    %c0_85 = arith.constant 0 : index
    %146 = vector.load %arg5[%c2_83, %c0_84, %c0_85] : memref<8x16x192xf32, #tpu.memory_space<vmem>>, vector<1x16x192xf32>
    %147 = vector.shape_cast %146 : vector<1x16x192xf32> to vector<16x192xf32>
    %c5_86 = arith.constant 5 : index
    %c0_87 = arith.constant 0 : index
    %c0_88 = arith.constant 0 : index
    %148 = vector.load %arg5[%c5_86, %c0_87, %c0_88] : memref<8x16x192xf32, #tpu.memory_space<vmem>>, vector<1x16x192xf32>
    %149 = vector.shape_cast %148 : vector<1x16x192xf32> to vector<16x192xf32>
    %150 = arith.select %64, %147, %149 : vector<16x192xi1>, vector<16x192xf32>
    %cst_89 = arith.constant dense<0.000000e+00> : vector<16x192xf32>
    %151 = tpu.matmul %137, %1, %cst_89 {dimension_numbers = #tpu.dot_dimension_numbers<[1], [0], [0], [1], [0, 0, 1, 1], [], []>} : vector<16x64xf32>, vector<64x192xf32>, vector<16x192xf32> -> vector<16x192xf32>
    %152 = vector.extract_strided_slice %150 {offsets = [0, 0], sizes = [16, 64], strides = [1, 1]} : vector<16x192xf32> to vector<16x64xf32>
    %153 = vector.extract_strided_slice %151 {offsets = [0, 0], sizes = [16, 64], strides = [1, 1]} : vector<16x192xf32> to vector<16x64xf32>
    %154 = arith.addf %152, %153 : vector<16x64xf32>
    %155 = arith.negf %154 : vector<16x64xf32>
    %156 = math.exp %155 : vector<16x64xf32>
    %cst_90 = arith.constant 1.000000e+00 : f32
    %157 = vector.broadcast %cst_90 : f32 to vector<16x64xf32>
    %158 = arith.addf %157, %156 : vector<16x64xf32>
    %159 = arith.divf %157, %158 : vector<16x64xf32>
    %160 = vector.extract_strided_slice %150 {offsets = [0, 64], sizes = [16, 64], strides = [1, 1]} : vector<16x192xf32> to vector<16x64xf32>
    %161 = vector.extract_strided_slice %151 {offsets = [0, 64], sizes = [16, 64], strides = [1, 1]} : vector<16x192xf32> to vector<16x64xf32>
    %162 = arith.addf %160, %161 : vector<16x64xf32>
    %163 = arith.negf %162 : vector<16x64xf32>
    %164 = math.exp %163 : vector<16x64xf32>
    %cst_91 = arith.constant 1.000000e+00 : f32
    %165 = vector.broadcast %cst_91 : f32 to vector<16x64xf32>
    %166 = arith.addf %165, %164 : vector<16x64xf32>
    %167 = arith.divf %165, %166 : vector<16x64xf32>
    %168 = vector.extract_strided_slice %150 {offsets = [0, 128], sizes = [16, 64], strides = [1, 1]} : vector<16x192xf32> to vector<16x64xf32>
    %169 = vector.extract_strided_slice %151 {offsets = [0, 128], sizes = [16, 64], strides = [1, 1]} : vector<16x192xf32> to vector<16x64xf32>
    %170 = arith.mulf %159, %169 : vector<16x64xf32>
    %171 = arith.addf %168, %170 : vector<16x64xf32>
    %172 = math.tanh %171 : vector<16x64xf32>
    %cst_92 = arith.constant 1.000000e+00 : f32
    %173 = vector.broadcast %cst_92 : f32 to vector<16x64xf32>
    %174 = arith.subf %173, %167 : vector<16x64xf32>
    %175 = arith.mulf %174, %172 : vector<16x64xf32>
    %176 = arith.mulf %167, %137 : vector<16x64xf32>
    %177 = arith.addf %175, %176 : vector<16x64xf32>
    %178 = vector.extract_strided_slice %177 {offsets = [0, 0], sizes = [16, 32], strides = [1, 1]} : vector<16x64xf32> to vector<16x32xf32>
    %c2_93 = arith.constant 2 : index
    %c0_94 = arith.constant 0 : index
    %c0_95 = arith.constant 0 : index
    %179 = vector.load %arg4[%c2_93, %c0_94, %c0_95] : memref<8x16x64xf32, #tpu.memory_space<vmem>>, vector<1x16x32xf32>
    %180 = vector.shape_cast %179 : vector<1x16x32xf32> to vector<16x32xf32>
    %181 = vector.shape_cast %178 : vector<16x32xf32> to vector<1x16x32xf32>
    tpu.vector_store %arg4[%c2_93, %c0_94, %c0_95], %181 {strides = array<i32>} : memref<8x16x64xf32, #tpu.memory_space<vmem>>, vector<1x16x32xf32>,
    %182 = vector.extract_strided_slice %177 {offsets = [0, 32], sizes = [16, 32], strides = [1, 1]} : vector<16x64xf32> to vector<16x32xf32>
    %c5_96 = arith.constant 5 : index
    %c0_97 = arith.constant 0 : index
    %c32_98 = arith.constant 32 : index
    %183 = vector.load %arg4[%c5_96, %c0_97, %c32_98] : memref<8x16x64xf32, #tpu.memory_space<vmem>>, vector<1x16x32xf32>
    %184 = vector.shape_cast %183 : vector<1x16x32xf32> to vector<16x32xf32>
    %185 = vector.shape_cast %182 : vector<16x32xf32> to vector<1x16x32xf32>
    tpu.vector_store %arg4[%c5_96, %c0_97, %c32_98], %185 {strides = array<i32>} : memref<8x16x64xf32, #tpu.memory_space<vmem>>, vector<1x16x32xf32>,
    %c3_99 = arith.constant 3 : index
    %c0_100 = arith.constant 0 : index
    %c0_101 = arith.constant 0 : index
    %186 = vector.load %arg5[%c3_99, %c0_100, %c0_101] : memref<8x16x192xf32, #tpu.memory_space<vmem>>, vector<1x16x192xf32>
    %187 = vector.shape_cast %186 : vector<1x16x192xf32> to vector<16x192xf32>
    %c4_102 = arith.constant 4 : index
    %c0_103 = arith.constant 0 : index
    %c0_104 = arith.constant 0 : index
    %188 = vector.load %arg5[%c4_102, %c0_103, %c0_104] : memref<8x16x192xf32, #tpu.memory_space<vmem>>, vector<1x16x192xf32>
    %189 = vector.shape_cast %188 : vector<1x16x192xf32> to vector<16x192xf32>
    %190 = arith.select %64, %187, %189 : vector<16x192xi1>, vector<16x192xf32>
    %cst_105 = arith.constant dense<0.000000e+00> : vector<16x192xf32>
    %191 = tpu.matmul %177, %1, %cst_105 {dimension_numbers = #tpu.dot_dimension_numbers<[1], [0], [0], [1], [0, 0, 1, 1], [], []>} : vector<16x64xf32>, vector<64x192xf32>, vector<16x192xf32> -> vector<16x192xf32>
    %192 = vector.extract_strided_slice %190 {offsets = [0, 0], sizes = [16, 64], strides = [1, 1]} : vector<16x192xf32> to vector<16x64xf32>
    %193 = vector.extract_strided_slice %191 {offsets = [0, 0], sizes = [16, 64], strides = [1, 1]} : vector<16x192xf32> to vector<16x64xf32>
    %194 = arith.addf %192, %193 : vector<16x64xf32>
    %195 = arith.negf %194 : vector<16x64xf32>
    %196 = math.exp %195 : vector<16x64xf32>
    %cst_106 = arith.constant 1.000000e+00 : f32
    %197 = vector.broadcast %cst_106 : f32 to vector<16x64xf32>
    %198 = arith.addf %197, %196 : vector<16x64xf32>
    %199 = arith.divf %197, %198 : vector<16x64xf32>
    %200 = vector.extract_strided_slice %190 {offsets = [0, 64], sizes = [16, 64], strides = [1, 1]} : vector<16x192xf32> to vector<16x64xf32>
    %201 = vector.extract_strided_slice %191 {offsets = [0, 64], sizes = [16, 64], strides = [1, 1]} : vector<16x192xf32> to vector<16x64xf32>
    %202 = arith.addf %200, %201 : vector<16x64xf32>
    %203 = arith.negf %202 : vector<16x64xf32>
    %204 = math.exp %203 : vector<16x64xf32>
    %cst_107 = arith.constant 1.000000e+00 : f32
    %205 = vector.broadcast %cst_107 : f32 to vector<16x64xf32>
    %206 = arith.addf %205, %204 : vector<16x64xf32>
    %207 = arith.divf %205, %206 : vector<16x64xf32>
    %208 = vector.extract_strided_slice %190 {offsets = [0, 128], sizes = [16, 64], strides = [1, 1]} : vector<16x192xf32> to vector<16x64xf32>
    %209 = vector.extract_strided_slice %191 {offsets = [0, 128], sizes = [16, 64], strides = [1, 1]} : vector<16x192xf32> to vector<16x64xf32>
    %210 = arith.mulf %199, %209 : vector<16x64xf32>
    %211 = arith.addf %208, %210 : vector<16x64xf32>
    %212 = math.tanh %211 : vector<16x64xf32>
    %cst_108 = arith.constant 1.000000e+00 : f32
    %213 = vector.broadcast %cst_108 : f32 to vector<16x64xf32>
    %214 = arith.subf %213, %207 : vector<16x64xf32>
    %215 = arith.mulf %214, %212 : vector<16x64xf32>
    %216 = arith.mulf %207, %177 : vector<16x64xf32>
    %217 = arith.addf %215, %216 : vector<16x64xf32>
    %218 = vector.extract_strided_slice %217 {offsets = [0, 0], sizes = [16, 32], strides = [1, 1]} : vector<16x64xf32> to vector<16x32xf32>
    %c3_109 = arith.constant 3 : index
    %c0_110 = arith.constant 0 : index
    %c0_111 = arith.constant 0 : index
    %219 = vector.load %arg4[%c3_109, %c0_110, %c0_111] : memref<8x16x64xf32, #tpu.memory_space<vmem>>, vector<1x16x32xf32>
    %220 = vector.shape_cast %219 : vector<1x16x32xf32> to vector<16x32xf32>
    %221 = vector.shape_cast %218 : vector<16x32xf32> to vector<1x16x32xf32>
    tpu.vector_store %arg4[%c3_109, %c0_110, %c0_111], %221 {strides = array<i32>} : memref<8x16x64xf32, #tpu.memory_space<vmem>>, vector<1x16x32xf32>,
    %222 = vector.extract_strided_slice %217 {offsets = [0, 32], sizes = [16, 32], strides = [1, 1]} : vector<16x64xf32> to vector<16x32xf32>
    %c4_112 = arith.constant 4 : index
    %c0_113 = arith.constant 0 : index
    %c32_114 = arith.constant 32 : index
    %223 = vector.load %arg4[%c4_112, %c0_113, %c32_114] : memref<8x16x64xf32, #tpu.memory_space<vmem>>, vector<1x16x32xf32>
    %224 = vector.shape_cast %223 : vector<1x16x32xf32> to vector<16x32xf32>
    %225 = vector.shape_cast %222 : vector<16x32xf32> to vector<1x16x32xf32>
    tpu.vector_store %arg4[%c4_112, %c0_113, %c32_114], %225 {strides = array<i32>} : memref<8x16x64xf32, #tpu.memory_space<vmem>>, vector<1x16x32xf32>,
    %c4_115 = arith.constant 4 : index
    %c0_116 = arith.constant 0 : index
    %c0_117 = arith.constant 0 : index
    %226 = vector.load %arg5[%c4_115, %c0_116, %c0_117] : memref<8x16x192xf32, #tpu.memory_space<vmem>>, vector<1x16x192xf32>
    %227 = vector.shape_cast %226 : vector<1x16x192xf32> to vector<16x192xf32>
    %c3_118 = arith.constant 3 : index
    %c0_119 = arith.constant 0 : index
    %c0_120 = arith.constant 0 : index
    %228 = vector.load %arg5[%c3_118, %c0_119, %c0_120] : memref<8x16x192xf32, #tpu.memory_space<vmem>>, vector<1x16x192xf32>
    %229 = vector.shape_cast %228 : vector<1x16x192xf32> to vector<16x192xf32>
    %230 = arith.select %64, %227, %229 : vector<16x192xi1>, vector<16x192xf32>
    %cst_121 = arith.constant dense<0.000000e+00> : vector<16x192xf32>
    %231 = tpu.matmul %217, %1, %cst_121 {dimension_numbers = #tpu.dot_dimension_numbers<[1], [0], [0], [1], [0, 0, 1, 1], [], []>} : vector<16x64xf32>, vector<64x192xf32>, vector<16x192xf32> -> vector<16x192xf32>
    %232 = vector.extract_strided_slice %230 {offsets = [0, 0], sizes = [16, 64], strides = [1, 1]} : vector<16x192xf32> to vector<16x64xf32>
    %233 = vector.extract_strided_slice %231 {offsets = [0, 0], sizes = [16, 64], strides = [1, 1]} : vector<16x192xf32> to vector<16x64xf32>
    %234 = arith.addf %232, %233 : vector<16x64xf32>
    %235 = arith.negf %234 : vector<16x64xf32>
    %236 = math.exp %235 : vector<16x64xf32>
    %cst_122 = arith.constant 1.000000e+00 : f32
    %237 = vector.broadcast %cst_122 : f32 to vector<16x64xf32>
    %238 = arith.addf %237, %236 : vector<16x64xf32>
    %239 = arith.divf %237, %238 : vector<16x64xf32>
    %240 = vector.extract_strided_slice %230 {offsets = [0, 64], sizes = [16, 64], strides = [1, 1]} : vector<16x192xf32> to vector<16x64xf32>
    %241 = vector.extract_strided_slice %231 {offsets = [0, 64], sizes = [16, 64], strides = [1, 1]} : vector<16x192xf32> to vector<16x64xf32>
    %242 = arith.addf %240, %241 : vector<16x64xf32>
    %243 = arith.negf %242 : vector<16x64xf32>
    %244 = math.exp %243 : vector<16x64xf32>
    %cst_123 = arith.constant 1.000000e+00 : f32
    %245 = vector.broadcast %cst_123 : f32 to vector<16x64xf32>
    %246 = arith.addf %245, %244 : vector<16x64xf32>
    %247 = arith.divf %245, %246 : vector<16x64xf32>
    %248 = vector.extract_strided_slice %230 {offsets = [0, 128], sizes = [16, 64], strides = [1, 1]} : vector<16x192xf32> to vector<16x64xf32>
    %249 = vector.extract_strided_slice %231 {offsets = [0, 128], sizes = [16, 64], strides = [1, 1]} : vector<16x192xf32> to vector<16x64xf32>
    %250 = arith.mulf %239, %249 : vector<16x64xf32>
    %251 = arith.addf %248, %250 : vector<16x64xf32>
    %252 = math.tanh %251 : vector<16x64xf32>
    %cst_124 = arith.constant 1.000000e+00 : f32
    %253 = vector.broadcast %cst_124 : f32 to vector<16x64xf32>
    %254 = arith.subf %253, %247 : vector<16x64xf32>
    %255 = arith.mulf %254, %252 : vector<16x64xf32>
    %256 = arith.mulf %247, %217 : vector<16x64xf32>
    %257 = arith.addf %255, %256 : vector<16x64xf32>
    %258 = vector.extract_strided_slice %257 {offsets = [0, 0], sizes = [16, 32], strides = [1, 1]} : vector<16x64xf32> to vector<16x32xf32>
    %c4_125 = arith.constant 4 : index
    %c0_126 = arith.constant 0 : index
    %c0_127 = arith.constant 0 : index
    %259 = vector.load %arg4[%c4_125, %c0_126, %c0_127] : memref<8x16x64xf32, #tpu.memory_space<vmem>>, vector<1x16x32xf32>
    %260 = vector.shape_cast %259 : vector<1x16x32xf32> to vector<16x32xf32>
    %261 = vector.shape_cast %258 : vector<16x32xf32> to vector<1x16x32xf32>
    tpu.vector_store %arg4[%c4_125, %c0_126, %c0_127], %261 {strides = array<i32>} : memref<8x16x64xf32, #tpu.memory_space<vmem>>, vector<1x16x32xf32>,
    %262 = vector.extract_strided_slice %257 {offsets = [0, 32], sizes = [16, 32], strides = [1, 1]} : vector<16x64xf32> to vector<16x32xf32>
    %c3_128 = arith.constant 3 : index
    %c0_129 = arith.constant 0 : index
    %c32_130 = arith.constant 32 : index
    %263 = vector.load %arg4[%c3_128, %c0_129, %c32_130] : memref<8x16x64xf32, #tpu.memory_space<vmem>>, vector<1x16x32xf32>
    %264 = vector.shape_cast %263 : vector<1x16x32xf32> to vector<16x32xf32>
    %265 = vector.shape_cast %262 : vector<16x32xf32> to vector<1x16x32xf32>
    tpu.vector_store %arg4[%c3_128, %c0_129, %c32_130], %265 {strides = array<i32>} : memref<8x16x64xf32, #tpu.memory_space<vmem>>, vector<1x16x32xf32>,
    %c5_131 = arith.constant 5 : index
    %c0_132 = arith.constant 0 : index
    %c0_133 = arith.constant 0 : index
    %266 = vector.load %arg5[%c5_131, %c0_132, %c0_133] : memref<8x16x192xf32, #tpu.memory_space<vmem>>, vector<1x16x192xf32>
    %267 = vector.shape_cast %266 : vector<1x16x192xf32> to vector<16x192xf32>
    %c2_134 = arith.constant 2 : index
    %c0_135 = arith.constant 0 : index
    %c0_136 = arith.constant 0 : index
    %268 = vector.load %arg5[%c2_134, %c0_135, %c0_136] : memref<8x16x192xf32, #tpu.memory_space<vmem>>, vector<1x16x192xf32>
    %269 = vector.shape_cast %268 : vector<1x16x192xf32> to vector<16x192xf32>
    %270 = arith.select %64, %267, %269 : vector<16x192xi1>, vector<16x192xf32>
    %cst_137 = arith.constant dense<0.000000e+00> : vector<16x192xf32>
    %271 = tpu.matmul %257, %1, %cst_137 {dimension_numbers = #tpu.dot_dimension_numbers<[1], [0], [0], [1], [0, 0, 1, 1], [], []>} : vector<16x64xf32>, vector<64x192xf32>, vector<16x192xf32> -> vector<16x192xf32>
    %272 = vector.extract_strided_slice %270 {offsets = [0, 0], sizes = [16, 64], strides = [1, 1]} : vector<16x192xf32> to vector<16x64xf32>
    %273 = vector.extract_strided_slice %271 {offsets = [0, 0], sizes = [16, 64], strides = [1, 1]} : vector<16x192xf32> to vector<16x64xf32>
    %274 = arith.addf %272, %273 : vector<16x64xf32>
    %275 = arith.negf %274 : vector<16x64xf32>
    %276 = math.exp %275 : vector<16x64xf32>
    %cst_138 = arith.constant 1.000000e+00 : f32
    %277 = vector.broadcast %cst_138 : f32 to vector<16x64xf32>
    %278 = arith.addf %277, %276 : vector<16x64xf32>
    %279 = arith.divf %277, %278 : vector<16x64xf32>
    %280 = vector.extract_strided_slice %270 {offsets = [0, 64], sizes = [16, 64], strides = [1, 1]} : vector<16x192xf32> to vector<16x64xf32>
    %281 = vector.extract_strided_slice %271 {offsets = [0, 64], sizes = [16, 64], strides = [1, 1]} : vector<16x192xf32> to vector<16x64xf32>
    %282 = arith.addf %280, %281 : vector<16x64xf32>
    %283 = arith.negf %282 : vector<16x64xf32>
    %284 = math.exp %283 : vector<16x64xf32>
    %cst_139 = arith.constant 1.000000e+00 : f32
    %285 = vector.broadcast %cst_139 : f32 to vector<16x64xf32>
    %286 = arith.addf %285, %284 : vector<16x64xf32>
    %287 = arith.divf %285, %286 : vector<16x64xf32>
    %288 = vector.extract_strided_slice %270 {offsets = [0, 128], sizes = [16, 64], strides = [1, 1]} : vector<16x192xf32> to vector<16x64xf32>
    %289 = vector.extract_strided_slice %271 {offsets = [0, 128], sizes = [16, 64], strides = [1, 1]} : vector<16x192xf32> to vector<16x64xf32>
    %290 = arith.mulf %279, %289 : vector<16x64xf32>
    %291 = arith.addf %288, %290 : vector<16x64xf32>
    %292 = math.tanh %291 : vector<16x64xf32>
    %cst_140 = arith.constant 1.000000e+00 : f32
    %293 = vector.broadcast %cst_140 : f32 to vector<16x64xf32>
    %294 = arith.subf %293, %287 : vector<16x64xf32>
    %295 = arith.mulf %294, %292 : vector<16x64xf32>
    %296 = arith.mulf %287, %257 : vector<16x64xf32>
    %297 = arith.addf %295, %296 : vector<16x64xf32>
    %298 = vector.extract_strided_slice %297 {offsets = [0, 0], sizes = [16, 32], strides = [1, 1]} : vector<16x64xf32> to vector<16x32xf32>
    %c5_141 = arith.constant 5 : index
    %c0_142 = arith.constant 0 : index
    %c0_143 = arith.constant 0 : index
    %299 = vector.load %arg4[%c5_141, %c0_142, %c0_143] : memref<8x16x64xf32, #tpu.memory_space<vmem>>, vector<1x16x32xf32>
    %300 = vector.shape_cast %299 : vector<1x16x32xf32> to vector<16x32xf32>
    %301 = vector.shape_cast %298 : vector<16x32xf32> to vector<1x16x32xf32>
    tpu.vector_store %arg4[%c5_141, %c0_142, %c0_143], %301 {strides = array<i32>} : memref<8x16x64xf32, #tpu.memory_space<vmem>>, vector<1x16x32xf32>,
    %302 = vector.extract_strided_slice %297 {offsets = [0, 32], sizes = [16, 32], strides = [1, 1]} : vector<16x64xf32> to vector<16x32xf32>
    %c2_144 = arith.constant 2 : index
    %c0_145 = arith.constant 0 : index
    %c32_146 = arith.constant 32 : index
    %303 = vector.load %arg4[%c2_144, %c0_145, %c32_146] : memref<8x16x64xf32, #tpu.memory_space<vmem>>, vector<1x16x32xf32>
    %304 = vector.shape_cast %303 : vector<1x16x32xf32> to vector<16x32xf32>
    %305 = vector.shape_cast %302 : vector<16x32xf32> to vector<1x16x32xf32>
    tpu.vector_store %arg4[%c2_144, %c0_145, %c32_146], %305 {strides = array<i32>} : memref<8x16x64xf32, #tpu.memory_space<vmem>>, vector<1x16x32xf32>,
    %c6_147 = arith.constant 6 : index
    %c0_148 = arith.constant 0 : index
    %c0_149 = arith.constant 0 : index
    %306 = vector.load %arg5[%c6_147, %c0_148, %c0_149] : memref<8x16x192xf32, #tpu.memory_space<vmem>>, vector<1x16x192xf32>
    %307 = vector.shape_cast %306 : vector<1x16x192xf32> to vector<16x192xf32>
    %c1_150 = arith.constant 1 : index
    %c0_151 = arith.constant 0 : index
    %c0_152 = arith.constant 0 : index
    %308 = vector.load %arg5[%c1_150, %c0_151, %c0_152] : memref<8x16x192xf32, #tpu.memory_space<vmem>>, vector<1x16x192xf32>
    %309 = vector.shape_cast %308 : vector<1x16x192xf32> to vector<16x192xf32>
    %310 = arith.select %64, %307, %309 : vector<16x192xi1>, vector<16x192xf32>
    %cst_153 = arith.constant dense<0.000000e+00> : vector<16x192xf32>
    %311 = tpu.matmul %297, %1, %cst_153 {dimension_numbers = #tpu.dot_dimension_numbers<[1], [0], [0], [1], [0, 0, 1, 1], [], []>} : vector<16x64xf32>, vector<64x192xf32>, vector<16x192xf32> -> vector<16x192xf32>
    %312 = vector.extract_strided_slice %310 {offsets = [0, 0], sizes = [16, 64], strides = [1, 1]} : vector<16x192xf32> to vector<16x64xf32>
    %313 = vector.extract_strided_slice %311 {offsets = [0, 0], sizes = [16, 64], strides = [1, 1]} : vector<16x192xf32> to vector<16x64xf32>
    %314 = arith.addf %312, %313 : vector<16x64xf32>
    %315 = arith.negf %314 : vector<16x64xf32>
    %316 = math.exp %315 : vector<16x64xf32>
    %cst_154 = arith.constant 1.000000e+00 : f32
    %317 = vector.broadcast %cst_154 : f32 to vector<16x64xf32>
    %318 = arith.addf %317, %316 : vector<16x64xf32>
    %319 = arith.divf %317, %318 : vector<16x64xf32>
    %320 = vector.extract_strided_slice %310 {offsets = [0, 64], sizes = [16, 64], strides = [1, 1]} : vector<16x192xf32> to vector<16x64xf32>
    %321 = vector.extract_strided_slice %311 {offsets = [0, 64], sizes = [16, 64], strides = [1, 1]} : vector<16x192xf32> to vector<16x64xf32>
    %322 = arith.addf %320, %321 : vector<16x64xf32>
    %323 = arith.negf %322 : vector<16x64xf32>
    %324 = math.exp %323 : vector<16x64xf32>
    %cst_155 = arith.constant 1.000000e+00 : f32
    %325 = vector.broadcast %cst_155 : f32 to vector<16x64xf32>
    %326 = arith.addf %325, %324 : vector<16x64xf32>
    %327 = arith.divf %325, %326 : vector<16x64xf32>
    %328 = vector.extract_strided_slice %310 {offsets = [0, 128], sizes = [16, 64], strides = [1, 1]} : vector<16x192xf32> to vector<16x64xf32>
    %329 = vector.extract_strided_slice %311 {offsets = [0, 128], sizes = [16, 64], strides = [1, 1]} : vector<16x192xf32> to vector<16x64xf32>
    %330 = arith.mulf %319, %329 : vector<16x64xf32>
    %331 = arith.addf %328, %330 : vector<16x64xf32>
    %332 = math.tanh %331 : vector<16x64xf32>
    %cst_156 = arith.constant 1.000000e+00 : f32
    %333 = vector.broadcast %cst_156 : f32 to vector<16x64xf32>
    %334 = arith.subf %333, %327 : vector<16x64xf32>
    %335 = arith.mulf %334, %332 : vector<16x64xf32>
    %336 = arith.mulf %327, %297 : vector<16x64xf32>
    %337 = arith.addf %335, %336 : vector<16x64xf32>
    %338 = vector.extract_strided_slice %337 {offsets = [0, 0], sizes = [16, 32], strides = [1, 1]} : vector<16x64xf32> to vector<16x32xf32>
    %c6_157 = arith.constant 6 : index
    %c0_158 = arith.constant 0 : index
    %c0_159 = arith.constant 0 : index
    %339 = vector.load %arg4[%c6_157, %c0_158, %c0_159] : memref<8x16x64xf32, #tpu.memory_space<vmem>>, vector<1x16x32xf32>
    %340 = vector.shape_cast %339 : vector<1x16x32xf32> to vector<16x32xf32>
    %341 = vector.shape_cast %338 : vector<16x32xf32> to vector<1x16x32xf32>
    tpu.vector_store %arg4[%c6_157, %c0_158, %c0_159], %341 {strides = array<i32>} : memref<8x16x64xf32, #tpu.memory_space<vmem>>, vector<1x16x32xf32>,
    %342 = vector.extract_strided_slice %337 {offsets = [0, 32], sizes = [16, 32], strides = [1, 1]} : vector<16x64xf32> to vector<16x32xf32>
    %c1_160 = arith.constant 1 : index
    %c0_161 = arith.constant 0 : index
    %c32_162 = arith.constant 32 : index
    %343 = vector.load %arg4[%c1_160, %c0_161, %c32_162] : memref<8x16x64xf32, #tpu.memory_space<vmem>>, vector<1x16x32xf32>
    %344 = vector.shape_cast %343 : vector<1x16x32xf32> to vector<16x32xf32>
    %345 = vector.shape_cast %342 : vector<16x32xf32> to vector<1x16x32xf32>
    tpu.vector_store %arg4[%c1_160, %c0_161, %c32_162], %345 {strides = array<i32>} : memref<8x16x64xf32, #tpu.memory_space<vmem>>, vector<1x16x32xf32>,
    %c7_163 = arith.constant 7 : index
    %c0_164 = arith.constant 0 : index
    %c0_165 = arith.constant 0 : index
    %346 = vector.load %arg5[%c7_163, %c0_164, %c0_165] : memref<8x16x192xf32, #tpu.memory_space<vmem>>, vector<1x16x192xf32>
    %347 = vector.shape_cast %346 : vector<1x16x192xf32> to vector<16x192xf32>
    %c0_166 = arith.constant 0 : index
    %c0_167 = arith.constant 0 : index
    %c0_168 = arith.constant 0 : index
    %348 = vector.load %arg5[%c0_166, %c0_167, %c0_168] : memref<8x16x192xf32, #tpu.memory_space<vmem>>, vector<1x16x192xf32>
    %349 = vector.shape_cast %348 : vector<1x16x192xf32> to vector<16x192xf32>
    %350 = arith.select %64, %347, %349 : vector<16x192xi1>, vector<16x192xf32>
    %cst_169 = arith.constant dense<0.000000e+00> : vector<16x192xf32>
    %351 = tpu.matmul %337, %1, %cst_169 {dimension_numbers = #tpu.dot_dimension_numbers<[1], [0], [0], [1], [0, 0, 1, 1], [], []>} : vector<16x64xf32>, vector<64x192xf32>, vector<16x192xf32> -> vector<16x192xf32>
    %352 = vector.extract_strided_slice %350 {offsets = [0, 0], sizes = [16, 64], strides = [1, 1]} : vector<16x192xf32> to vector<16x64xf32>
    %353 = vector.extract_strided_slice %351 {offsets = [0, 0], sizes = [16, 64], strides = [1, 1]} : vector<16x192xf32> to vector<16x64xf32>
    %354 = arith.addf %352, %353 : vector<16x64xf32>
    %355 = arith.negf %354 : vector<16x64xf32>
    %356 = math.exp %355 : vector<16x64xf32>
    %cst_170 = arith.constant 1.000000e+00 : f32
    %357 = vector.broadcast %cst_170 : f32 to vector<16x64xf32>
    %358 = arith.addf %357, %356 : vector<16x64xf32>
    %359 = arith.divf %357, %358 : vector<16x64xf32>
    %360 = vector.extract_strided_slice %350 {offsets = [0, 64], sizes = [16, 64], strides = [1, 1]} : vector<16x192xf32> to vector<16x64xf32>
    %361 = vector.extract_strided_slice %351 {offsets = [0, 64], sizes = [16, 64], strides = [1, 1]} : vector<16x192xf32> to vector<16x64xf32>
    %362 = arith.addf %360, %361 : vector<16x64xf32>
    %363 = arith.negf %362 : vector<16x64xf32>
    %364 = math.exp %363 : vector<16x64xf32>
    %cst_171 = arith.constant 1.000000e+00 : f32
    %365 = vector.broadcast %cst_171 : f32 to vector<16x64xf32>
    %366 = arith.addf %365, %364 : vector<16x64xf32>
    %367 = arith.divf %365, %366 : vector<16x64xf32>
    %368 = vector.extract_strided_slice %350 {offsets = [0, 128], sizes = [16, 64], strides = [1, 1]} : vector<16x192xf32> to vector<16x64xf32>
    %369 = vector.extract_strided_slice %351 {offsets = [0, 128], sizes = [16, 64], strides = [1, 1]} : vector<16x192xf32> to vector<16x64xf32>
    %370 = arith.mulf %359, %369 : vector<16x64xf32>
    %371 = arith.addf %368, %370 : vector<16x64xf32>
    %372 = math.tanh %371 : vector<16x64xf32>
    %cst_172 = arith.constant 1.000000e+00 : f32
    %373 = vector.broadcast %cst_172 : f32 to vector<16x64xf32>
    %374 = arith.subf %373, %367 : vector<16x64xf32>
    %375 = arith.mulf %374, %372 : vector<16x64xf32>
    %376 = arith.mulf %367, %337 : vector<16x64xf32>
    %377 = arith.addf %375, %376 : vector<16x64xf32>
    %378 = vector.extract_strided_slice %377 {offsets = [0, 0], sizes = [16, 32], strides = [1, 1]} : vector<16x64xf32> to vector<16x32xf32>
    %c7_173 = arith.constant 7 : index
    %c0_174 = arith.constant 0 : index
    %c0_175 = arith.constant 0 : index
    %379 = vector.load %arg4[%c7_173, %c0_174, %c0_175] : memref<8x16x64xf32, #tpu.memory_space<vmem>>, vector<1x16x32xf32>
    %380 = vector.shape_cast %379 : vector<1x16x32xf32> to vector<16x32xf32>
    %381 = vector.shape_cast %378 : vector<16x32xf32> to vector<1x16x32xf32>
    tpu.vector_store %arg4[%c7_173, %c0_174, %c0_175], %381 {strides = array<i32>} : memref<8x16x64xf32, #tpu.memory_space<vmem>>, vector<1x16x32xf32>,
    %382 = vector.extract_strided_slice %377 {offsets = [0, 32], sizes = [16, 32], strides = [1, 1]} : vector<16x64xf32> to vector<16x32xf32>
    %c0_176 = arith.constant 0 : index
    %c0_177 = arith.constant 0 : index
    %c32_178 = arith.constant 32 : index
    %383 = vector.load %arg4[%c0_176, %c0_177, %c32_178] : memref<8x16x64xf32, #tpu.memory_space<vmem>>, vector<1x16x32xf32>
    %384 = vector.shape_cast %383 : vector<1x16x32xf32> to vector<16x32xf32>
    %385 = vector.shape_cast %382 : vector<16x32xf32> to vector<1x16x32xf32>
    tpu.vector_store %arg4[%c0_176, %c0_177, %c32_178], %385 {strides = array<i32>} : memref<8x16x64xf32, #tpu.memory_space<vmem>>, vector<1x16x32xf32>,
    return
  }
  func.func @transform_0(%arg0: i32) -> (i32, i32, i32) {
    %c0_i32 = arith.constant 0 : i32
    %c0_i32_0 = arith.constant 0 : i32
    %c0_i32_1 = arith.constant 0 : i32
    return %c0_i32, %arg0, %c0_i32_0 : i32, i32, i32
  }
  func.func @transform_1(%arg0: i32) -> (i32, i32) {
    %c0_i32 = arith.constant 0 : i32
    %c0_i32_0 = arith.constant 0 : i32
    %c0_i32_1 = arith.constant 0 : i32
    return %c0_i32, %c0_i32_0 : i32, i32
  }
  func.func @transform_2(%arg0: i32) -> (i32, i32) {
    %c0_i32 = arith.constant 0 : i32
    %c0_i32_0 = arith.constant 0 : i32
    %c0_i32_1 = arith.constant 0 : i32
    return %c0_i32, %c0_i32_0 : i32, i32
  }
  func.func @transform_3(%arg0: i32) -> (i32, i32, i32) {
    %c0_i32 = arith.constant 0 : i32
    %c0_i32_0 = arith.constant 0 : i32
    %c0_i32_1 = arith.constant 0 : i32
    return %c0_i32, %arg0, %c0_i32_0 : i32, i32, i32
  }
}

</mosaic_0001>

<bundles_post_ra>
// kernel: _lambda_.3
= control target key start
LH: loop header
LB: loop body
LE: loop exit
PB: predicated region body
PF: predicated region fallthrough
CT: control target
= control target key end

     0   :  { %v2286_v3 = vmov 0.0   ;;  %vm48_vm0 = vcmask 523264   ;;  %v773_v51 = vlaneseq  ;;  %s2287_s12 = smov 64   ;;  %vm848_vm7 = vcmask 261120   ;;  %s3131_s1 = inlined_call_operand.vmem [shape: f32[64,192], index: 1, kind: input, shape index: {}]   ;;  %s3132_s0 = inlined_call_operand.vmem [shape: f32[8,16,64], index: 0, kind: input, shape index: {}]   ;;  %s3133_s2 = inlined_call_operand.vmem [shape: f32[64,192], index: 2, kind: input, shape index: {}]   ;;  %s3134_s3 = inlined_call_operand.vmem [shape: f32[8,16,64], index: 3, kind: output, shape index: {}]  }
   0x1   :  { %v15_v0 = vld [vmem:[%s3131_s1 + $0x8] sm:$0xff]  ;;  %v17_v1 = vld [vmem:[%s3131_s1 + $0x18] sm:$0xff]  ;;  %v14_v2 = vld [vmem:[%s3131_s1] sm:$0xff]  ;;  %209 = vmatprep.mubr.f32.mxu1 %v2286_v3  ;;  %119 = vmatprep.mubr.f32.mxu0 %v2286_v3  ;;  %vm852_vm8 = vcmask 523520  }
   0x2   :  { %v2319_v4 = vpack.c.bf16 %v17_v1, %v15_v0  ;;  %v16_v5 = vld [vmem:[%s3131_s1 + $0x10] sm:$0xff]  ;;  %v19_v6 = vld [vmem:[%s3131_s1 + $0x28] sm:$0xff]  ;;  %v21_v7 = vld [vmem:[%s3131_s1 + $0x38] sm:$0xff]  ;;  %v774_v56 = vand.u32 127, %v773_v51 }
   0x3   :  { %v2330_v8 = vpack.c.bf16 %v16_v5, %v14_v2  ;;  %v2332_v9 = vpack.c.bf16 %v21_v7, %v19_v6  ;;  %v18_v10 = vld [vmem:[%s3131_s1 + $0x20] sm:$0xff]  ;;  %v20_v11 = vld [vmem:[%s3131_s1 + $0x30] sm:$0xff]  ;;  %v23_v12 = vld [vmem:[%s3131_s1 + $0x48] sm:$0xff] }
   0x4   :  { %1941 = vmatprep.subr.bf16.mxu0 %v2319_v4  ;;  %1957 = vmatprep.subr.bf16.mxu1 %v2319_v4  ;;  %v25_v13 = vld [vmem:[%s3131_s1 + $0x58] sm:$0xff]  ;;  %v2350_v14 = vpack.c.bf16 %v20_v11, %v18_v10  ;;  %v22_v16 = vld [vmem:[%s3131_s1 + $0x40] sm:$0xff]  ;;  %v24_v17 = vld [vmem:[%s3131_s1 + $0x50] sm:$0xff]  ;;  %vm778_vm1 = vcmp.ge.s32.totalorder %v774_v56, 64  ;;  %vm780_vm2 = vcmp.lt.s32.totalorder %v774_v56, 96  ;;  %vm776_vm3 = vcmp.lt.s32.totalorder %v774_v56, 32 }
   0x5   :  { %1943 = vmatpush1.bf16.msra.mxu0 %v2330_v8  ;;  %1959 = vmatpush1.bf16.msra.mxu1 %v2330_v8  ;;  %v2354_v15 = vpack.c.bf16 %v25_v13, %v23_v12  ;;  %v27_v18 = vld [vmem:[%s3131_s1 + $0x68] sm:$0xff]  ;;  %v29_v19 = vld [vmem:[%s3131_s1 + $0x78] sm:$0xff]  ;;  %v2370_v20 = vpack.c.bf16 %v24_v17, %v22_v16  ;;  %v26_v22 = vld [vmem:[%s3131_s1 + $0x60] sm:$0xff]  ;;  %v2570_v5 = vadd.s32 128, %v774_v56 }
   0x6   :  { %1945 = vmatprep.subr.bf16.mxu0 %v2332_v9  ;;  %1961 = vmatprep.subr.bf16.mxu1 %v2332_v9  ;;  %v2374_v21 = vpack.c.bf16 %v29_v19, %v27_v18  ;;  %v28_v23 = vld [vmem:[%s3131_s1 + $0x70] sm:$0xff]  ;;  %v46_v26 = vld [vmem:[%s3132_s0] sm:$0xff]  ;;  %v1855_v27 = vld [vmem:[%s3132_s0 + $0x18] sm:$0xff] }
   0x7   :  { %v2384_v24 = vpack.c.bf16 %v28_v23, %v26_v22  ;;  %v1854_v25 = vld [vmem:[%s3132_s0 + $0x10] sm:$0xff]  ;;  %v47_v28 = vld [vmem:[%s3132_s0 + $0x8] sm:$0xff]  ;;  %v1858_v30 = vld [vmem:[%s3132_s0 + $0x20] sm:$0xff]  ;;  %vm789_vm6 = vcmp.lt.s32.totalorder %v2570_v5, 160 }
   0x8   :  { %v1862_v29 = vld [vmem:[%s3132_s0 + $0x30] sm:$0xff]  ;;  %v1859_v31 = vld [vmem:[%s3132_s0 + $0x28] sm:$0xff]  ;;  %v1863_v32 = vld [vmem:[%s3132_s0 + $0x38] sm:$0xff] }
   0x9   :  { %1947 = vmatpush1.bf16.msra.mxu0 %v2350_v14  ;;  %1963 = vmatpush1.bf16.msra.mxu1 %v2350_v14  ;;  %v1866_v33 = vld [vmem:[%s3132_s0 + $0x40] sm:$0xff]  ;;  %v1870_v34 = vld [vmem:[%s3132_s0 + $0x50] sm:$0xff]  ;;  %v1867_v35 = vld [vmem:[%s3132_s0 + $0x48] sm:$0xff] }
   0xa   :  { %1949 = vmatprep.subr.bf16.mxu0 %v2354_v15  ;;  %1965 = vmatprep.subr.bf16.mxu1 %v2354_v15  ;;  %v1871_v36 = vld [vmem:[%s3132_s0 + $0x58] sm:$0xff]  ;;  %v1874_v37 = vld [vmem:[%s3132_s0 + $0x60] sm:$0xff]  ;;  %v1878_v38 = vld [vmem:[%s3132_s0 + $0x70] sm:$0xff] }
   0xb   :  { %v1875_v39 = vld [vmem:[%s3132_s0 + $0x68] sm:$0xff]  ;;  %v1879_v40 = vld [vmem:[%s3132_s0 + $0x78] sm:$0xff]  ;;  %vm782_vm4 = vmand %vm778_vm1, %vm780_vm2 }
   0xc   :  { %vm2544_vm5 = vmor %vm776_vm3, %vm782_vm4  ;;  %v44_v12 = vld [vmem:[%s3133_s2 + $0x70] sm:$0xff] }
   0xd   :  { %1951 = vmatpush1.bf16.msra.mxu0 %v2370_v20  ;;  %1967 = vmatpush1.bf16.msra.mxu1 %v2370_v20 }
   0xe   :  { %1953 = vmatprep.subr.bf16.mxu0 %v2374_v21  ;;  %1969 = vmatprep.subr.bf16.mxu1 %v2374_v21 }
  0x11   :  { %1955 = vmatpush1.bf16.msra.mxu0 %v2384_v24  ;;  %1971 = vmatpush1.bf16.msra.mxu1 %v2384_v24 }
  0x12   :  { %1973 = vmatprep.subr.bf16.mxu0 %v2319_v4  ;;  %1989 = vmatprep.subr.bf16.mxu1 %v2319_v4 }
  0x14   :  { %1856 = vmatmul.mubr.msk.f32.vlgmr.msra.gmra.mrb[0].mxu1 %vm48_vm0, %v1854_v25  ;;  %1852 = vmatmul.mubr.msk.f32.vlgmr.msra.gmra.mrb[0].mxu0 %vm48_vm0, %v46_v26 }
  0x15   :  { %1975 = vmatpush1.bf16.msra.mxu0 %v2330_v8  ;;  %1991 = vmatpush1.bf16.msra.mxu1 %v2330_v8 }
  0x16   :  { %1977 = vmatprep.subr.bf16.mxu0 %v2332_v9  ;;  %1993 = vmatprep.subr.bf16.mxu1 %v2332_v9 }
  0x17   :  { %215 = vmatprep.mubr.f32.mxu1 %v2286_v3  ;;  %125 = vmatprep.mubr.f32.mxu0 %v2286_v3 }
  0x18   :  { %1857 = vmatmul.mubr.msk.f32.gmra.mrb[2].mxu1 %vm48_vm0, %v1855_v27  ;;  %1853 = vmatmul.mubr.msk.f32.gmra.mrb[2].mxu0 %vm48_vm0, %v47_v28 }
  0x19   :  { %1979 = vmatpush1.bf16.msra.mxu0 %v2350_v14  ;;  %1995 = vmatpush1.bf16.msra.mxu1 %v2350_v14 }
  0x1a   :  { %1981 = vmatprep.subr.bf16.mxu0 %v2354_v15  ;;  %1997 = vmatprep.subr.bf16.mxu1 %v2354_v15 }
  0x1b   :  { %391 = vmatprep.mubr.f32.mxu1 %v2286_v3  ;;  %300 = vmatprep.mubr.f32.mxu0 %v2286_v3 }
  0x1d   :  { %1983 = vmatpush1.bf16.msra.mxu0 %v2370_v20  ;;  %1999 = vmatpush1.bf16.msra.mxu1 %v2370_v20 }
  0x1e   :  { %1985 = vmatprep.subr.bf16.mxu0 %v2374_v21  ;;  %2001 = vmatprep.subr.bf16.mxu1 %v2374_v21 }
  0x21   :  { %1987 = vmatpush1.bf16.msra.mxu0 %v2384_v24  ;;  %2003 = vmatpush1.bf16.msra.mxu1 %v2384_v24 }
  0x22   :  { %2005 = vmatprep.subr.bf16.mxu0 %v2319_v4  ;;  %2021 = vmatprep.subr.bf16.mxu1 %v2319_v4 }
  0x24   :  { %1864 = vmatmul.mubr.msk.f32.vlgmr.msra.gmra.mrb[4].mxu1 %vm48_vm0, %v1862_v29  ;;  %1860 = vmatmul.mubr.msk.f32.vlgmr.msra.gmra.mrb[4].mxu0 %vm48_vm0, %v1858_v30 }
  0x25   :  { %2007 = vmatpush1.bf16.msra.mxu0 %v2330_v8  ;;  %2023 = vmatpush1.bf16.msra.mxu1 %v2330_v8 }
  0x26   :  { %2009 = vmatprep.subr.bf16.mxu0 %v2332_v9  ;;  %2025 = vmatprep.subr.bf16.mxu1 %v2332_v9 }
  0x27   :  { %306 = vmatprep.mubr.f32.mxu0 %v2286_v3  ;;  %397 = vmatprep.mubr.f32.mxu1 %v2286_v3 }
  0x28   :  { %1861 = vmatmul.mubr.msk.f32.gmra.mrb[6].mxu0 %vm48_vm0, %v1859_v31  ;;  %1865 = vmatmul.mubr.msk.f32.gmra.mrb[6].mxu1 %vm48_vm0, %v1863_v32 }
  0x29   :  { %2011 = vmatpush1.bf16.msra.mxu0 %v2350_v14  ;;  %2027 = vmatpush1.bf16.msra.mxu1 %v2350_v14 }
  0x2a   :  { %2013 = vmatprep.subr.bf16.mxu0 %v2354_v15  ;;  %2029 = vmatprep.subr.bf16.mxu1 %v2354_v15 }
  0x2b   :  { %482 = vmatprep.mubr.f32.mxu0 %v2286_v3  ;;  %573 = vmatprep.mubr.f32.mxu1 %v2286_v3 }
  0x2d   :  { %2015 = vmatpush1.bf16.msra.mxu0 %v2370_v20  ;;  %2031 = vmatpush1.bf16.msra.mxu1 %v2370_v20 }
  0x2e   :  { %2017 = vmatprep.subr.bf16.mxu0 %v2374_v21  ;;  %2033 = vmatprep.subr.bf16.mxu1 %v2374_v21 }
  0x31   :  { %2019 = vmatpush1.bf16.msra.mxu0 %v2384_v24  ;;  %2035 = vmatpush1.bf16.msra.mxu1 %v2384_v24 }
  0x32   :  { %2037 = vmatprep.subr.bf16.mxu0 %v2319_v4  ;;  %2053 = vmatprep.subr.bf16.mxu1 %v2319_v4  ;;  %v42_v4 = vld [vmem:[%s3133_s2 + $0x60] sm:$0xff] }
  0x34   :  { %1868 = vmatmul.mubr.msk.f32.vlgmr.msra.gmra.mrb[8].mxu0 %vm48_vm0, %v1866_v33  ;;  %1872 = vmatmul.mubr.msk.f32.vlgmr.msra.gmra.mrb[8].mxu1 %vm48_vm0, %v1870_v34 }
  0x35   :  { %2039 = vmatpush1.bf16.msra.mxu0 %v2330_v8  ;;  %2055 = vmatpush1.bf16.msra.mxu1 %v2330_v8 }
  0x36   :  { %488 = vmatprep.mubr.f32.mxu0 %v2286_v3  ;;  %2041 = vmatprep.subr.bf16.mxu0 %v2332_v9 }
  0x37   :  { %2057 = vmatprep.subr.bf16.mxu1 %v2332_v9  ;;  %579 = vmatprep.mubr.f32.mxu1 %v2286_v3 }
  0x38   :  { %1869 = vmatmul.mubr.msk.f32.gmra.mrb[10].mxu0 %vm48_vm0, %v1867_v35  ;;  %1873 = vmatmul.mubr.msk.f32.gmra.mrb[10].mxu1 %vm48_vm0, %v1871_v36 }
  0x39   :  { %2043 = vmatpush1.bf16.msra.mxu0 %v2350_v14  ;;  %2059 = vmatpush1.bf16.msra.mxu1 %v2350_v14 }
  0x3a   :  { %2045 = vmatprep.subr.bf16.mxu0 %v2354_v15  ;;  %2061 = vmatprep.subr.bf16.mxu1 %v2354_v15 }
  0x3b   :  { %664 = vmatprep.mubr.f32.mxu0 %v2286_v3  ;;  %755 = vmatprep.mubr.f32.mxu1 %v2286_v3 }
  0x3d   :  { %2047 = vmatpush1.bf16.msra.mxu0 %v2370_v20  ;;  %2063 = vmatpush1.bf16.msra.mxu1 %v2370_v20 }
  0x3e   :  { %2049 = vmatprep.subr.bf16.mxu0 %v2374_v21  ;;  %2065 = vmatprep.subr.bf16.mxu1 %v2374_v21 }
  0x41   :  { %2051 = vmatpush1.bf16.msra.mxu0 %v2384_v24  ;;  %2067 = vmatpush1.bf16.msra.mxu1 %v2384_v24 }
  0x44   :  { %1876 = vmatmul.mubr.msk.f32.vlgmr.msra.gmra.mrb[12].mxu0 %vm48_vm0, %v1874_v37  ;;  %1880 = vmatmul.mubr.msk.f32.vlgmr.msra.gmra.mrb[12].mxu1 %vm48_vm0, %v1878_v38 }
  0x45   :  { %670 = vmatprep.mubr.f32.mxu0 %v2286_v3  ;;  %761 = vmatprep.mubr.f32.mxu1 %v2286_v3 }
  0x48   :  { %1877 = vmatmul.mubr.msk.f32.gmra.mrb[14].mxu0 %vm48_vm0, %v1875_v39  ;;  %1881 = vmatmul.mubr.msk.f32.gmra.mrb[14].mxu1 %vm48_vm0, %v1879_v40 }
  0x49   :  { %935 = vmatprep.mubr.f32.mxu0 %v2286_v3  ;;  %1078 = vmatprep.mubr.f32.mxu1 %v2286_v3 }
  0xe7   :  { %v2518_v41 = vpop.f32.mrb[0].mxu1  ;;  %v2520_v42 = vpop.f32.mrb[0].mxu0 }
  0xe8   :  { %v213_v43 = vpop.f32.mrb[1].mxu1  ;;  %132 = vst [vmem:[#allocation2] sm:$0xff] %v2520_v42  ;;  %v123_v44 = vpop.f32.mrb[1].mxu0 }
  0xe9   :  { %224 = vst.msk [vmem:[#allocation2 + $0x28] sm:$0xff] %vm48_vm0, %v213_v43  ;;  %133 = vst.msk [vmem:[#allocation2 + $0x8] sm:$0xff] %vm48_vm0, %v123_v44 }
  0xeb   :  { %v2525_v45 = vpop.f32.mrb[2].mxu1  ;;  %v2527_v46 = vpop.f32.mrb[2].mxu0 }
  0xec   :  { %v219_v47 = vpop.f32.mrb[3].mxu1  ;;  %134 = vst [vmem:[#allocation2 + $0x10] sm:$0xff] %v2527_v46  ;;  %v129_v48 = vpop.f32.mrb[3].mxu0 }
  0xed   :  { %226 = vst.msk [vmem:[#allocation2 + $0x38] sm:$0xff] %vm48_vm0, %v219_v47  ;;  %135 = vst.msk [vmem:[#allocation2 + $0x18] sm:$0xff] %vm48_vm0, %v129_v48 }
  0xef   :  { %v2635_v26 = vld [vmem:[#allocation2] sm:$0xff] }
  0xf3   :  { %v2659_v36 = vld [vmem:[#allocation2 + $0x10] sm:$0xff] }
  0xf7   :  { %v2532_v49 = vpop.f32.mrb[4].mxu1  ;;  %v2534_v50 = vpop.f32.mrb[4].mxu0 }
  0xf8   :  { %v395_v52 = vpop.f32.mrb[5].mxu1  ;;  %v304_v53 = vpop.f32.mrb[5].mxu0 }
  0xf9   :  { %406 = vst.msk [vmem:[#allocation2 + $0x68] sm:$0xff] %vm48_vm0, %v395_v52  ;;  %315 = vst.msk [vmem:[#allocation2 + $0x48] sm:$0xff] %vm48_vm0, %v304_v53  ;;  %v2683_v52 = vld [vmem:[#allocation2 + $0x28] sm:$0xff] }
  0xfb   :  { %v2538_v54 = vpop.f32.mrb[6].mxu1  ;;  %v2540_v55 = vpop.f32.mrb[6].mxu0 }
  0xfc   :  { %v401_v57 = vpop.f32.mrb[7].mxu1  ;;  %v310_v58 = vpop.f32.mrb[7].mxu0 }
  0xfd   :  { %408 = vst.msk [vmem:[#allocation2 + $0x78] sm:$0xff] %vm48_vm0, %v401_v57  ;;  %317 = vst.msk [vmem:[#allocation2 + $0x58] sm:$0xff] %vm48_vm0, %v310_v58  ;;  %v797_v58 = vld [vmem:[#allocation2 + $0x18] sm:$0xff] }
 0x100   :  { %v2595_v14 = vld [vmem:[#allocation2 + $0x48] sm:$0xff] }
 0x101   :  { %v2599_v16 = vld [vmem:[#allocation2 + $0x68] sm:$0xff] }
 0x104   :  { %v2615_v20 = vld [vmem:[#allocation2 + $0x58] sm:$0xff] }
 0x105   :  { %v2619_v22 = vld [vmem:[#allocation2 + $0x78] sm:$0xff] }
 0x107   :  { %v2548_v60 = vpop.f32.mrb[8].mxu0  ;;  %v2550_v61 = vpop.f32.mrb[8].mxu1 }
 0x108   :  { %v486_v62 = vpop.f32.mrb[9].mxu0  ;;  %v577_v63 = vpop.f32.mrb[9].mxu1 }
 0x109   :  { %497 = vst.msk [vmem:[#allocation2 + $0x88] sm:$0xff] %vm48_vm0, %v486_v62  ;;  %588 = vst.msk [vmem:[#allocation2 + $0xa8] sm:$0xff] %vm48_vm0, %v577_v63  ;;  %v2697_v63 = vld [vmem:[#allocation2 + $0x38] sm:$0xff] }
 0x10b   :  { %v2572_v6 = vpop.f32.mrb[10].mxu0  ;;  %v2574_v7 = vpop.f32.mrb[10].mxu1 }
 0x10c   :  { %v492_v8 = vpop.f32.mrb[11].mxu0  ;;  %v583_v9 = vpop.f32.mrb[11].mxu1 }
 0x10d   :  { %499 = vst.msk [vmem:[#allocation2 + $0x98] sm:$0xff] %vm48_vm0, %v492_v8  ;;  %590 = vst.msk [vmem:[#allocation2 + $0xb8] sm:$0xff] %vm48_vm0, %v583_v9 }
 0x110   :  { %v2597_v15 = vld [vmem:[#allocation2 + $0xa8] sm:$0xff] }
 0x111   :  { %v2601_v17 = vld [vmem:[#allocation2 + $0x88] sm:$0xff]  ;;  %v2613_v19 = vsel %vm789_vm6, %v2597_v15, %v2595_v14 }
 0x112   :  { %v2607_v18 = vsel %vm789_vm6, %v2601_v17, %v2599_v16 }
 0x114   :  { %v2617_v21 = vld [vmem:[#allocation2 + $0xb8] sm:$0xff] }
 0x115   :  { %v2621_v23 = vld [vmem:[#allocation2 + $0x98] sm:$0xff]  ;;  %v2633_v25 = vsel %vm789_vm6, %v2617_v21, %v2615_v20 }
 0x116   :  { %v2627_v24 = vsel %vm789_vm6, %v2621_v23, %v2619_v22 }
 0x117   :  { %v2637_v27 = vpop.f32.mrb[12].mxu0  ;;  %v2639_v28 = vpop.f32.mrb[12].mxu1 }
 0x118   :  { %v668_v29 = vpop.f32.mrb[13].mxu0  ;;  %v759_v30 = vpop.f32.mrb[13].mxu1  ;;  %v802_v31 = vsel %vm2544_vm5, %v2520_v42, %v2639_v28  ;;  %v863_v32 = vsel %vm2544_vm5, %v2518_v41, %v2637_v27 }
 0x119   :  { %679 = vst.msk [vmem:[#allocation2 + $0xc8] sm:$0xff] %vm48_vm0, %v668_v29  ;;  %770 = vst.msk [vmem:[#allocation2 + $0xe8] sm:$0xff] %vm48_vm0, %v759_v30  ;;  %v1882_v35 = vmul.f32 -1.442695, %v802_v31 }
 0x11b   :  { %v2661_v37 = vpop.f32.mrb[14].mxu0  ;;  %v2663_v38 = vpop.f32.mrb[14].mxu1  ;;  %2190 = vpow2.f32 %v1882_v35 }
 0x11c   :  { %v804_v39 = vsel %vm2544_vm5, %v2527_v46, %v2663_v38  ;;  %v674_v40 = vpop.f32.mrb[15].mxu0  ;;  %v765_v42 = vpop.f32.mrb[15].mxu1  ;;  %v865_v43 = vsel %vm2544_vm5, %v2525_v45, %v2661_v37  ;;  %v795_v46 = vld [vmem:[#allocation2 + $0x8] sm:$0xff] }
 0x11d   :  { %v1883_v48 = vmul.f32 -1.442695, %v804_v39  ;;  %681 = vst.msk [vmem:[#allocation2 + $0xd8] sm:$0xff] %vm48_vm0, %v674_v40  ;;  %772 = vst.msk [vmem:[#allocation2 + $0xf8] sm:$0xff] %vm48_vm0, %v765_v42 }
 0x11f   :  { %2192 = vpow2.f32 %v1883_v48 }
 0x120   :  { %v799_v51 = vld [vmem:[#allocation2 + $0xe8] sm:$0xff] }
 0x121   :  { %v2685_v53 = vld [vmem:[#allocation2 + $0xc8] sm:$0xff]  ;;  %v2695_v57 = vsel %vm789_vm6, %v799_v51, %v795_v46  ;;  %v803_v48 = vsel %vm789_vm6, %v795_v46, %v799_v51  ;;  %v30_v46 = vld [vmem:[%s3133_s2] sm:$0xff] }
 0x122   :  { %v2691_v56 = vsel %vm789_vm6, %v2685_v53, %v2683_v52 }
 0x124   :  { %v801_v62 = vld [vmem:[#allocation2 + $0xf8] sm:$0xff] }
 0x125   :  { %v2699_v8 = vld [vmem:[#allocation2 + $0xd8] sm:$0xff]  ;;  %v2191_v9 = vpop.eup %2190  ;;  %v2709_v30 = vsel %vm789_vm6, %v801_v62, %v797_v58  ;;  %v805_v33 = vsel %vm789_vm6, %v797_v58, %v801_v62 }
 0x126   :  { %v2705_v29 = vsel %vm789_vm6, %v2699_v8, %v2697_v63  ;;  %v814_v31 = vadd.f32 1.0, %v2191_v9  ;;  %v31_v9 = vld [vmem:[%s3133_s2 + $0x8] sm:$0xff] }
 0x128   :  { %2194 = vrcp.f32 %v814_v31  ;;  %v33_v31 = vld [vmem:[%s3133_s2 + $0x18] sm:$0xff] }
 0x129   :  { %v2193_v35 = vpop.eup %2192  ;;  %v2724_v51 = vpack.c.bf16 %v33_v31, %v31_v9  ;;  %v41_v31 = vld [vmem:[%s3133_s2 + $0x58] sm:$0xff] }
 0x12a   :  { %v815_v39 = vadd.f32 1.0, %v2193_v35  ;;  %v34_v35 = vld [vmem:[%s3133_s2 + $0x20] sm:$0xff] }
 0x12b   :  { %2069 = vmatprep.subr.bf16.mxu0 %v2724_v51  ;;  %2085 = vmatprep.subr.bf16.mxu1 %v2724_v51 }
 0x12c   :  { %2196 = vrcp.f32 %v815_v39  ;;  %v36_v39 = vld [vmem:[%s3133_s2 + $0x30] sm:$0xff] }
 0x132   :  { %v2195_v40 = vpop.eup %2194 }
 0x133   :  { %v820_v42 = vmul.f32 0.0, %v2195_v40 }
 0x135   :  { %v822_v47 = vadd.f32 %v820_v42, %v803_v48  ;;  %v39_v48 = vld [vmem:[%s3133_s2 + $0x48] sm:$0xff] }
 0x136   :  { %v2197_v34 = vpop.eup %2196 }
 0x137   :  { %2198 = vtanh.f32 %v822_v47  ;;  %v821_v44 = vmul.f32 0.0, %v2197_v34  ;;  %v32_v47 = vld [vmem:[%s3133_s2 + $0x10] sm:$0xff] }
 0x138   :  { %v2735_v58 = vpack.c.bf16 %v32_v47, %v30_v46  ;;  %v2755_v46 = vpack.c.bf16 %v36_v39, %v34_v35  ;;  %v2758_v47 = vpack.c.bf16 %v41_v31, %v39_v48  ;;  %v45_v35 = vld [vmem:[%s3133_s2 + $0x78] sm:$0xff] }
 0x139   :  { %v823_v13 = vadd.f32 %v821_v44, %v805_v33  ;;  %v37_v33 = vld [vmem:[%s3133_s2 + $0x38] sm:$0xff] }
 0x13a   :  { %2071 = vmatpush1.bf16.msra.mxu0 %v2735_v58  ;;  %2087 = vmatpush1.bf16.msra.mxu1 %v2735_v58 }
 0x13b   :  { %2200 = vtanh.f32 %v823_v13  ;;  %v35_v13 = vld [vmem:[%s3133_s2 + $0x28] sm:$0xff] }
 0x13c   :  { %v2737_v62 = vpack.c.bf16 %v37_v33, %v35_v13  ;;  %v38_v13 = vld [vmem:[%s3133_s2 + $0x40] sm:$0xff]  ;;  %v40_v33 = vld [vmem:[%s3133_s2 + $0x50] sm:$0xff] }
 0x13d   :  { %v2776_v48 = vpack.c.bf16 %v40_v33, %v38_v13  ;;  %v2790_v13 = vpack.c.bf16 %v44_v12, %v42_v4  ;;  %v826_v33 = vsub.f32 1.0, %v2195_v40 }
 0x13e   :  { %2073 = vmatprep.subr.bf16.mxu0 %v2737_v62  ;;  %2089 = vmatprep.subr.bf16.mxu1 %v2737_v62 }
 0x13f   :  { %2075 = vmatpush1.bf16.msra.mxu0 %v2755_v46  ;;  %2091 = vmatpush1.bf16.msra.mxu1 %v2755_v46 }
 0x140   :  { %2077 = vmatprep.subr.bf16.mxu0 %v2758_v47  ;;  %2093 = vmatprep.subr.bf16.mxu1 %v2758_v47 }
 0x141   :  { %v2199_v9 = vpop.eup %2198 }
 0x142   :  { %830 = vrot.lane.b32.xlu0 %v2199_v9, %s2287_s12  ;;  %v43_v9 = vld [vmem:[%s3133_s2 + $0x68] sm:$0xff] }
 0x143   :  { %v2779_v31 = vpack.c.bf16 %v45_v35, %v43_v9  ;;  %2079 = vmatpush1.bf16.msra.mxu0 %v2776_v48  ;;  %2095 = vmatpush1.bf16.msra.mxu1 %v2776_v48 }
 0x145   :  { %v2201_v39 = vpop.eup %2200  ;;  %2081 = vmatprep.subr.bf16.mxu0 %v2779_v31  ;;  %2097 = vmatprep.subr.bf16.mxu1 %v2779_v31 }
 0x146   :  { %832 = vrot.lane.b32.xlu0 %v2201_v39, %s2287_s12  ;;  %v827_v39 = vsub.f32 1.0, %v2197_v34 }
 0x147   :  { %2083 = vmatpush1.bf16.msra.mxu0 %v2790_v13  ;;  %2099 = vmatpush1.bf16.msra.mxu1 %v2790_v13 }
 0x148   :  { %2101 = vmatprep.subr.bf16.mxu0 %v2724_v51  ;;  %2117 = vmatprep.subr.bf16.mxu1 %v2724_v51 }
 0x1b4   :  { %v831_v9 = vpop.permute.xlu0 %830 }
 0x1b5   :  { %v836_v35 = vmul.f32 %v831_v9, %v826_v33 }
 0x1b7   :  { %v838_v4 = vadd.f32 %v836_v35, %v820_v42 }
 0x1b8   :  { %v833_v12 = vpop.permute.xlu0 %832 }
 0x1b9   :  { %v837_v2 = vmul.f32 %v833_v12, %v827_v39  ;;  %842 = vrot.lane.b32.xlu1 %v838_v4, %s2287_s12 }
 0x1bb   :  { %v839_v11 = vadd.f32 %v837_v2, %v821_v44 }
 0x1bd   :  { %844 = vrot.lane.b32.xlu1 %v839_v11, %s2287_s12 }
 0x22b   :  { %v843_v1 = vpop.permute.xlu1 %842 }
 0x22c   :  { %849 = vst.msk [vmem:[%s3134_s3] sm:$0xff] %vm848_vm7, %v843_v1  ;;  %1886 = vmatmul.mubr.msk.f32.vlgmr.msra.gmra.mrb[16].mxu0 %vm48_vm0, %v843_v1 }
 0x22d   :  { %1884 = vst.msk [vmem:[%s3134_s3 + $0x70] sm:$0xff] %vm852_vm8, %v843_v1  ;;  %941 = vmatprep.mubr.f32.mxu0 %v2286_v3  ;;  %2103 = vmatpush1.bf16.msra.mxu0 %v2735_v58 }
 0x22e   :  { %2105 = vmatprep.subr.bf16.mxu0 %v2737_v62 }
 0x22f   :  { %v845_v2 = vpop.permute.xlu1 %844 }
 0x230   :  { %850 = vst.msk [vmem:[%s3134_s3 + $0x8] sm:$0xff] %vm848_vm7, %v845_v2  ;;  %1887 = vmatmul.mubr.msk.f32.gmra.mrb[18].mxu0 %vm48_vm0, %v845_v2 }
 0x231   :  { %1885 = vst.msk [vmem:[%s3134_s3 + $0x78] sm:$0xff] %vm852_vm8, %v845_v2  ;;  %2107 = vmatpush1.bf16.msra.mxu0 %v2755_v46  ;;  %1221 = vmatprep.mubr.f32.mxu0 %v2286_v3 }
 0x232   :  { %2109 = vmatprep.subr.bf16.mxu0 %v2758_v47 }
 0x235   :  { %2111 = vmatpush1.bf16.msra.mxu0 %v2776_v48 }
 0x236   :  { %2113 = vmatprep.subr.bf16.mxu0 %v2779_v31 }
 0x239   :  { %2115 = vmatpush1.bf16.msra.mxu0 %v2790_v13 }
 0x23a   :  { %2133 = vmatprep.subr.bf16.mxu0 %v2724_v51 }
 0x2ff   :  { %v937_v1 = vpop.f32.mrb[16].mxu0 }
 0x300   :  { %v948_v34 = vadd.f32 %v937_v1, %v863_v32  ;;  %v939_v44 = vpop.f32.mrb[17].mxu0 }
 0x302   :  { %v1888_v40 = vmul.f32 -1.442695, %v948_v34  ;;  %v864_v34 = vsel %vm789_vm6, %v2683_v52, %v2685_v53 }
 0x303   :  { %v943_v42 = vpop.f32.mrb[18].mxu0 }
 0x304   :  { %2202 = vpow2.f32 %v1888_v40  ;;  %v949_v33 = vadd.f32 %v943_v42, %v865_v43  ;;  %v945_v9 = vpop.f32.mrb[19].mxu0  ;;  %v866_v42 = vsel %vm789_vm6, %v2697_v63, %v2699_v8 }
 0x306   :  { %v1889_v35 = vmul.f32 -1.442695, %v949_v33 }
 0x308   :  { %2204 = vpow2.f32 %v1889_v35 }
 0x30e   :  { %v2203_v39 = vpop.eup %2202 }
 0x30f   :  { %v956_v12 = vadd.f32 1.0, %v2203_v39 }
 0x311   :  { %2206 = vrcp.f32 %v956_v12 }
 0x312   :  { %v2205_v2 = vpop.eup %2204 }
 0x313   :  { %v957_v10 = vadd.f32 1.0, %v2205_v2 }
 0x315   :  { %2208 = vrcp.f32 %v957_v10 }
 0x31b   :  { %v2207_v32 = vpop.eup %2206 }
 0x31c   :  { %v962_v1 = vmul.f32 %v2207_v32, %v939_v44  ;;  %v968_v44 = vsub.f32 1.0, %v2207_v32  ;;  %v980_v52 = vmul.f32 %v2207_v32, %v838_v4  ;;  %v3137_v4 = vsel %vm2544_vm5, %v2534_v50, %v2550_v61 }
 0x31e   :  { %v964_v40 = vadd.f32 %v962_v1, %v864_v34 }
 0x31f   :  { %v2209_v0 = vpop.eup %2208 }
 0x320   :  { %2210 = vtanh.f32 %v964_v40  ;;  %v963_v43 = vmul.f32 %v2209_v0, %v945_v9  ;;  %v969_v2 = vsub.f32 1.0, %v2209_v0  ;;  %v981_v1 = vmul.f32 %v2209_v0, %v839_v11 }
 0x322   :  { %v965_v33 = vadd.f32 %v963_v43, %v866_v42 }
 0x324   :  { %2212 = vtanh.f32 %v965_v33  ;;  %v3138_v33 = vsel %vm2544_vm5, %v2540_v55, %v2574_v7 }
 0x32a   :  { %v2211_v35 = vpop.eup %2210 }
 0x32b   :  { %972 = vrot.lane.b32.xlu0 %v2211_v35, %s2287_s12 }
 0x32e   :  { %v2213_v10 = vpop.eup %2212 }
 0x32f   :  { %974 = vrot.lane.b32.xlu1 %v2213_v10, %s2287_s12 }
 0x39d   :  { %v973_v39 = vpop.permute.xlu0 %972 }
 0x39e   :  { %v978_v53 = vmul.f32 %v973_v39, %v968_v44 }
 0x3a0   :  { %v982_v12 = vadd.f32 %v980_v52, %v978_v53 }
 0x3a1   :  { %v975_v9 = vpop.permute.xlu1 %974 }
 0x3a2   :  { %v979_v34 = vmul.f32 %v975_v9, %v969_v2  ;;  %986 = vrot.lane.b32.xlu0 %v982_v12, %s2287_s12 }
 0x3a4   :  { %v983_v63 = vadd.f32 %v981_v1, %v979_v34  ;;  %v1007_v34 = vsel %vm789_vm6, %v2595_v14, %v2597_v15 }
 0x3a6   :  { %988 = vrot.lane.b32.xlu1 %v983_v63, %s2287_s12 }
 0x414   :  { %v987_v8 = vpop.permute.xlu0 %986 }
 0x415   :  { %1890 = vst.msk [vmem:[%s3134_s3 + $0x10] sm:$0xff] %vm848_vm7, %v987_v8  ;;  %1894 = vmatmul.mubr.msk.f32.vlgmr.msra.gmra.mrb[16].mxu1 %vm48_vm0, %v987_v8 }
 0x416   :  { %1892 = vst.msk [vmem:[%s3134_s3 + $0x60] sm:$0xff] %vm852_vm8, %v987_v8  ;;  %1084 = vmatprep.mubr.f32.mxu1 %v2286_v3  ;;  %2119 = vmatpush1.bf16.msra.mxu1 %v2735_v58 }
 0x417   :  { %2121 = vmatprep.subr.bf16.mxu1 %v2737_v62 }
 0x418   :  { %v989_v0 = vpop.permute.xlu1 %988 }
 0x419   :  { %1891 = vst.msk [vmem:[%s3134_s3 + $0x18] sm:$0xff] %vm848_vm7, %v989_v0  ;;  %1895 = vmatmul.mubr.msk.f32.gmra.mrb[18].mxu1 %vm48_vm0, %v989_v0 }
 0x41a   :  { %1893 = vst.msk [vmem:[%s3134_s3 + $0x68] sm:$0xff] %vm852_vm8, %v989_v0  ;;  %2123 = vmatpush1.bf16.msra.mxu1 %v2755_v46  ;;  %1364 = vmatprep.mubr.f32.mxu1 %v2286_v3 }
 0x41b   :  { %2125 = vmatprep.subr.bf16.mxu1 %v2758_v47 }
 0x41e   :  { %2127 = vmatpush1.bf16.msra.mxu1 %v2776_v48 }
 0x41f   :  { %2129 = vmatprep.subr.bf16.mxu1 %v2779_v31 }
 0x422   :  { %2131 = vmatpush1.bf16.msra.mxu1 %v2790_v13 }
 0x423   :  { %2149 = vmatprep.subr.bf16.mxu1 %v2724_v51 }
 0x4e8   :  { %v1080_v11 = vpop.f32.mrb[16].mxu1 }
 0x4e9   :  { %v1091_v32 = vadd.f32 %v1080_v11, %v3137_v4  ;;  %v1082_v40 = vpop.f32.mrb[17].mxu1  ;;  %v1009_v4 = vsel %vm789_vm6, %v2615_v20, %v2617_v21 }
 0x4eb   :  { %v1896_v43 = vmul.f32 -1.442695, %v1091_v32 }
 0x4ec   :  { %v1086_v42 = vpop.f32.mrb[18].mxu1 }
 0x4ed   :  { %2214 = vpow2.f32 %v1896_v43  ;;  %v1092_v35 = vadd.f32 %v1086_v42, %v3138_v33  ;;  %v1088_v10 = vpop.f32.mrb[19].mxu1 }
 0x4ef   :  { %v1897_v44 = vmul.f32 -1.442695, %v1092_v35 }
 0x4f1   :  { %2216 = vpow2.f32 %v1897_v44 }
 0x4f7   :  { %v2215_v39 = vpop.eup %2214 }
 0x4f8   :  { %v1099_v52 = vadd.f32 1.0, %v2215_v39 }
 0x4fa   :  { %2218 = vrcp.f32 %v1099_v52 }
 0x4fb   :  { %v2217_v53 = vpop.eup %2216 }
 0x4fc   :  { %v1100_v2 = vadd.f32 1.0, %v2217_v53  ;;  %v3139_v53 = vsel %vm2544_vm5, %v2532_v49, %v2548_v60 }
 0x4fe   :  { %2220 = vrcp.f32 %v1100_v2 }
 0x504   :  { %v2219_v9 = vpop.eup %2218 }
 0x505   :  { %v1105_v1 = vmul.f32 %v2219_v9, %v1082_v40  ;;  %v1111_v42 = vsub.f32 1.0, %v2219_v9  ;;  %v1123_v14 = vmul.f32 %v2219_v9, %v982_v12 }
 0x507   :  { %v1107_v8 = vadd.f32 %v1105_v1, %v1007_v34 }
 0x508   :  { %v2221_v0 = vpop.eup %2220 }
 0x509   :  { %2222 = vtanh.f32 %v1107_v8  ;;  %v1106_v11 = vmul.f32 %v2221_v0, %v1088_v10  ;;  %v1112_v44 = vsub.f32 1.0, %v2221_v0  ;;  %v1124_v39 = vmul.f32 %v2221_v0, %v983_v63 }
 0x50a   :  { %v3140_v8 = vsel %vm2544_vm5, %v2538_v54, %v2572_v6 }
 0x50b   :  { %v1108_v32 = vadd.f32 %v1106_v11, %v1009_v4 }
 0x50d   :  { %2224 = vtanh.f32 %v1108_v32 }
 0x513   :  { %v2223_v43 = vpop.eup %2222 }
 0x514   :  { %1115 = vrot.lane.b32.xlu0 %v2223_v43, %s2287_s12 }
 0x517   :  { %v2225_v40 = vpop.eup %2224 }
 0x518   :  { %1117 = vrot.lane.b32.xlu1 %v2225_v40, %s2287_s12 }
 0x586   :  { %v1116_v33 = vpop.permute.xlu0 %1115 }
 0x587   :  { %v1121_v15 = vmul.f32 %v1116_v33, %v1111_v42 }
 0x589   :  { %v1125_v35 = vadd.f32 %v1123_v14, %v1121_v15  ;;  %v1150_v15 = vsel %vm789_vm6, %v2599_v16, %v2601_v17 }
 0x58a   :  { %v1118_v10 = vpop.permute.xlu1 %1117 }
 0x58b   :  { %v1122_v52 = vmul.f32 %v1118_v10, %v1112_v44  ;;  %1129 = vrot.lane.b32.xlu0 %v1125_v35, %s2287_s12 }
 0x58d   :  { %v1126_v20 = vadd.f32 %v1124_v39, %v1122_v52  ;;  %v1152_v52 = vsel %vm789_vm6, %v2619_v22, %v2621_v23 }
 0x58f   :  { %1131 = vrot.lane.b32.xlu1 %v1126_v20, %s2287_s12 }
 0x5fd   :  { %v1130_v21 = vpop.permute.xlu0 %1129 }
 0x5fe   :  { %1898 = vst.msk [vmem:[%s3134_s3 + $0x20] sm:$0xff] %vm848_vm7, %v1130_v21  ;;  %1902 = vmatmul.mubr.msk.f32.vlgmr.msra.gmra.mrb[20].mxu0 %vm48_vm0, %v1130_v21 }
 0x5ff   :  { %1900 = vst.msk [vmem:[%s3134_s3 + $0x50] sm:$0xff] %vm852_vm8, %v1130_v21  ;;  %1227 = vmatprep.mubr.f32.mxu0 %v2286_v3  ;;  %2135 = vmatpush1.bf16.msra.mxu0 %v2735_v58 }
 0x600   :  { %2137 = vmatprep.subr.bf16.mxu0 %v2737_v62 }
 0x601   :  { %v1132_v12 = vpop.permute.xlu1 %1131 }
 0x602   :  { %1899 = vst.msk [vmem:[%s3134_s3 + $0x28] sm:$0xff] %vm848_vm7, %v1132_v12  ;;  %1903 = vmatmul.mubr.msk.f32.gmra.mrb[22].mxu0 %vm48_vm0, %v1132_v12 }
 0x603   :  { %1901 = vst.msk [vmem:[%s3134_s3 + $0x58] sm:$0xff] %vm852_vm8, %v1132_v12  ;;  %2139 = vmatpush1.bf16.msra.mxu0 %v2755_v46  ;;  %1505 = vmatprep.mubr.f32.mxu0 %v2286_v3 }
 0x604   :  { %2141 = vmatprep.subr.bf16.mxu0 %v2758_v47 }
 0x607   :  { %2143 = vmatpush1.bf16.msra.mxu0 %v2776_v48 }
 0x608   :  { %2145 = vmatprep.subr.bf16.mxu0 %v2779_v31 }
 0x60b   :  { %2147 = vmatpush1.bf16.msra.mxu0 %v2790_v13 }
 0x60c   :  { %2165 = vmatprep.subr.bf16.mxu0 %v2724_v51 }
 0x6d1   :  { %v1223_v63 = vpop.f32.mrb[20].mxu0 }
 0x6d2   :  { %v1234_v2 = vadd.f32 %v1223_v63, %v3139_v53  ;;  %v1225_v9 = vpop.f32.mrb[21].mxu0 }
 0x6d4   :  { %v1904_v1 = vmul.f32 -1.442695, %v1234_v2 }
 0x6d5   :  { %v1229_v34 = vpop.f32.mrb[22].mxu0 }
 0x6d6   :  { %2226 = vpow2.f32 %v1904_v1  ;;  %v1235_v0 = vadd.f32 %v1229_v34, %v3140_v8  ;;  %v1231_v11 = vpop.f32.mrb[23].mxu0 }
 0x6d8   :  { %v1905_v4 = vmul.f32 -1.442695, %v1235_v0 }
 0x6da   :  { %2228 = vpow2.f32 %v1905_v4 }
 0x6e0   :  { %v2227_v32 = vpop.eup %2226 }
 0x6e1   :  { %v1242_v43 = vadd.f32 1.0, %v2227_v32 }
 0x6e3   :  { %2230 = vrcp.f32 %v1242_v43 }
 0x6e4   :  { %v2229_v40 = vpop.eup %2228 }
 0x6e5   :  { %v1243_v42 = vadd.f32 1.0, %v2229_v40  ;;  %v3142_v40 = vsel %vm2544_vm5, %v2572_v6, %v2538_v54 }
 0x6e7   :  { %2232 = vrcp.f32 %v1243_v42 }
 0x6ed   :  { %v2231_v33 = vpop.eup %2230 }
 0x6ee   :  { %v1248_v14 = vmul.f32 %v2231_v33, %v1225_v9  ;;  %v1254_v53 = vsub.f32 1.0, %v2231_v33  ;;  %v1266_v16 = vmul.f32 %v2231_v33, %v1125_v35 }
 0x6f0   :  { %v1250_v44 = vadd.f32 %v1248_v14, %v1150_v15 }
 0x6f1   :  { %v2233_v10 = vpop.eup %2232 }
 0x6f2   :  { %2234 = vtanh.f32 %v1250_v44  ;;  %v1249_v39 = vmul.f32 %v2233_v10, %v1231_v11  ;;  %v1255_v1 = vsub.f32 1.0, %v2233_v10  ;;  %v1267_v8 = vmul.f32 %v2233_v10, %v1126_v20 }
 0x6f3   :  { %v3141_v20 = vsel %vm2544_vm5, %v2548_v60, %v2532_v49 }
 0x6f4   :  { %v1251_v21 = vadd.f32 %v1249_v39, %v1152_v52 }
 0x6f6   :  { %2236 = vtanh.f32 %v1251_v21 }
 0x6fc   :  { %v2235_v12 = vpop.eup %2234 }
 0x6fd   :  { %1258 = vrot.lane.b32.xlu0 %v2235_v12, %s2287_s12 }
 0x700   :  { %v2237_v63 = vpop.eup %2236 }
 0x701   :  { %1260 = vrot.lane.b32.xlu1 %v2237_v63, %s2287_s12 }
 0x76f   :  { %v1259_v2 = vpop.permute.xlu0 %1258 }
 0x770   :  { %v1264_v17 = vmul.f32 %v1259_v2, %v1254_v53 }
 0x772   :  { %v1268_v9 = vadd.f32 %v1266_v16, %v1264_v17 }
 0x773   :  { %v1261_v34 = vpop.permute.xlu1 %1260 }
 0x774   :  { %v1265_v0 = vmul.f32 %v1261_v34, %v1255_v1  ;;  %1272 = vrot.lane.b32.xlu0 %v1268_v9, %s2287_s12 }
 0x776   :  { %v1269_v5 = vadd.f32 %v1267_v8, %v1265_v0 }
 0x778   :  { %1274 = vrot.lane.b32.xlu1 %v1269_v5, %s2287_s12 }
 0x7e6   :  { %v1273_v22 = vpop.permute.xlu0 %1272 }
 0x7e7   :  { %1906 = vst.msk [vmem:[%s3134_s3 + $0x30] sm:$0xff] %vm848_vm7, %v1273_v22  ;;  %1910 = vmatmul.mubr.msk.f32.vlgmr.msra.gmra.mrb[20].mxu1 %vm48_vm0, %v1273_v22 }
 0x7e8   :  { %1908 = vst.msk [vmem:[%s3134_s3 + $0x40] sm:$0xff] %vm852_vm8, %v1273_v22  ;;  %1370 = vmatprep.mubr.f32.mxu1 %v2286_v3  ;;  %2151 = vmatpush1.bf16.msra.mxu1 %v2735_v58  ;;  %v3143_v22 = vsel %vm2544_vm5, %v2550_v61, %v2534_v50 }
 0x7e9   :  { %2153 = vmatprep.subr.bf16.mxu1 %v2737_v62 }
 0x7ea   :  { %v1275_v23 = vpop.permute.xlu1 %1274 }
 0x7eb   :  { %1907 = vst.msk [vmem:[%s3134_s3 + $0x38] sm:$0xff] %vm848_vm7, %v1275_v23  ;;  %1911 = vmatmul.mubr.msk.f32.gmra.mrb[22].mxu1 %vm48_vm0, %v1275_v23 }
 0x7ec   :  { %1909 = vst.msk [vmem:[%s3134_s3 + $0x48] sm:$0xff] %vm852_vm8, %v1275_v23  ;;  %2155 = vmatpush1.bf16.msra.mxu1 %v2755_v46  ;;  %1646 = vmatprep.mubr.f32.mxu1 %v2286_v3 }
 0x7ed   :  { %2157 = vmatprep.subr.bf16.mxu1 %v2758_v47 }
 0x7f0   :  { %2159 = vmatpush1.bf16.msra.mxu1 %v2776_v48 }
 0x7f1   :  { %2161 = vmatprep.subr.bf16.mxu1 %v2779_v31 }
 0x7f4   :  { %2163 = vmatpush1.bf16.msra.mxu1 %v2790_v13 }
 0x7f5   :  { %2180 = vmatprep.subr.bf16.mxu1 %v2724_v51 }
 0x8ba   :  { %v1366_v35 = vpop.f32.mrb[20].mxu1 }
 0x8bb   :  { %v1377_v11 = vadd.f32 %v1366_v35, %v3141_v20  ;;  %v1368_v4 = vpop.f32.mrb[21].mxu1 }
 0x8bd   :  { %v1912_v32 = vmul.f32 -1.442695, %v1377_v11 }
 0x8be   :  { %v1372_v43 = vpop.f32.mrb[22].mxu1 }
 0x8bf   :  { %2238 = vpow2.f32 %v1912_v32  ;;  %v1378_v42 = vadd.f32 %v1372_v43, %v3142_v40  ;;  %v1374_v33 = vpop.f32.mrb[23].mxu1 }
 0x8c1   :  { %v1913_v14 = vmul.f32 -1.442695, %v1378_v42 }
 0x8c3   :  { %2240 = vpow2.f32 %v1913_v14 }
 0x8c9   :  { %v2239_v51 = vpop.eup %2238 }
 0x8ca   :  { %v1385_v15 = vadd.f32 1.0, %v2239_v51 }
 0x8cc   :  { %2242 = vrcp.f32 %v1385_v15 }
 0x8cd   :  { %v2241_v44 = vpop.eup %2240 }
 0x8ce   :  { %v1386_v10 = vadd.f32 1.0, %v2241_v44 }
 0x8d0   :  { %2244 = vrcp.f32 %v1386_v10 }
 0x8d6   :  { %v2243_v49 = vpop.eup %2242 }
 0x8d7   :  { %v1391_v60 = vmul.f32 %v2243_v49, %v1368_v4  ;;  %v1397_v63 = vsub.f32 1.0, %v2243_v49  ;;  %v1409_v2 = vmul.f32 %v2243_v49, %v1268_v9  ;;  %v3144_v4 = vsel %vm2544_vm5, %v2574_v7, %v2540_v55 }
 0x8d9   :  { %v1393_v39 = vadd.f32 %v1391_v60, %v2607_v18 }
 0x8da   :  { %v2245_v52 = vpop.eup %2244 }
 0x8db   :  { %2246 = vtanh.f32 %v1393_v39  ;;  %v1392_v21 = vmul.f32 %v2245_v52, %v1374_v33  ;;  %v1398_v1 = vsub.f32 1.0, %v2245_v52  ;;  %v1410_v18 = vmul.f32 %v2245_v52, %v1269_v5 }
 0x8dd   :  { %v1394_v12 = vadd.f32 %v1392_v21, %v2627_v24 }
 0x8df   :  { %2248 = vtanh.f32 %v1394_v12 }
 0x8e5   :  { %v2247_v54 = vpop.eup %2246 }
 0x8e6   :  { %1401 = vrot.lane.b32.xlu0 %v2247_v54, %s2287_s12 }
 0x8e9   :  { %v2249_v6 = vpop.eup %2248 }
 0x8ea   :  { %1403 = vrot.lane.b32.xlu1 %v2249_v6, %s2287_s12 }
 0x958   :  { %v1402_v53 = vpop.permute.xlu0 %1401 }
 0x959   :  { %v1407_v16 = vmul.f32 %v1402_v53, %v1397_v63 }
 0x95b   :  { %v1411_v17 = vadd.f32 %v1409_v2, %v1407_v16 }
 0x95c   :  { %v1404_v34 = vpop.permute.xlu1 %1403 }
 0x95d   :  { %v1408_v8 = vmul.f32 %v1404_v34, %v1398_v1  ;;  %1415 = vrot.lane.b32.xlu0 %v1411_v17, %s2287_s12 }
 0x95f   :  { %v1412_v0 = vadd.f32 %v1410_v18, %v1408_v8 }
 0x961   :  { %1417 = vrot.lane.b32.xlu1 %v1412_v0, %s2287_s12 }
 0x9cf   :  { %v1416_v24 = vpop.permute.xlu0 %1415 }
 0x9d0   :  { %1914 = vst.msk [vmem:[%s3134_s3 + $0x40] sm:$0xff] %vm848_vm7, %v1416_v24  ;;  %1918 = vmatmul.mubr.msk.f32.vlgmr.msra.gmra.mrb[24].mxu0 %vm48_vm0, %v1416_v24 }
 0x9d1   :  { %1916 = vst.msk [vmem:[%s3134_s3 + $0x30] sm:$0xff] %vm852_vm8, %v1416_v24  ;;  %1511 = vmatprep.mubr.f32.mxu0 %v2286_v3  ;;  %2167 = vmatpush1.bf16.msra.mxu0 %v2735_v58 }
 0x9d2   :  { %2169 = vmatprep.subr.bf16.mxu0 %v2737_v62 }
 0x9d3   :  { %v1418_v9 = vpop.permute.xlu1 %1417 }
 0x9d4   :  { %1915 = vst.msk [vmem:[%s3134_s3 + $0x48] sm:$0xff] %vm848_vm7, %v1418_v9  ;;  %1919 = vmatmul.mubr.msk.f32.gmra.mrb[26].mxu0 %vm48_vm0, %v1418_v9 }
 0x9d5   :  { %1917 = vst.msk [vmem:[%s3134_s3 + $0x38] sm:$0xff] %vm852_vm8, %v1418_v9  ;;  %2171 = vmatpush1.bf16.msra.mxu0 %v2755_v46  ;;  %1787 = vmatprep.mubr.f32.mxu0 %v2286_v3 }
 0x9d6   :  { %2173 = vmatprep.subr.bf16.mxu0 %v2758_v47 }
 0x9d9   :  { %2175 = vmatpush1.bf16.msra.mxu0 %v2776_v48 }
 0x9da   :  { %2177 = vmatprep.subr.bf16.mxu0 %v2779_v31 }
 0x9dd   :  { %2179 = vmatpush1.bf16.msra.mxu0 %v2790_v13 }
 0xaa3   :  { %v1507_v5 = vpop.f32.mrb[24].mxu0 }
 0xaa4   :  { %v1518_v23 = vadd.f32 %v1507_v5, %v3143_v22  ;;  %v1509_v35 = vpop.f32.mrb[25].mxu0 }
 0xaa6   :  { %v1920_v20 = vmul.f32 -1.442695, %v1518_v23 }
 0xaa7   :  { %v1513_v11 = vpop.f32.mrb[26].mxu0 }
 0xaa8   :  { %2250 = vpow2.f32 %v1920_v20  ;;  %v1519_v32 = vadd.f32 %v1513_v11, %v3144_v4  ;;  %v1515_v43 = vpop.f32.mrb[27].mxu0 }
 0xaaa   :  { %v1921_v40 = vmul.f32 -1.442695, %v1519_v32 }
 0xaac   :  { %2252 = vpow2.f32 %v1921_v40 }
 0xab2   :  { %v2251_v42 = vpop.eup %2250 }
 0xab3   :  { %v1526_v33 = vadd.f32 1.0, %v2251_v42 }
 0xab5   :  { %2254 = vrcp.f32 %v1526_v33 }
 0xab6   :  { %v2253_v14 = vpop.eup %2252 }
 0xab7   :  { %v1527_v51 = vadd.f32 1.0, %v2253_v14  ;;  %v3147_v14 = vsel %vm2544_vm5, %v2639_v28, %v2635_v26 }
 0xab9   :  { %2256 = vrcp.f32 %v1527_v51 }
 0xabf   :  { %v2255_v50 = vpop.eup %2254 }
 0xac0   :  { %v1532_v61 = vmul.f32 %v2255_v50, %v1509_v35  ;;  %v1538_v60 = vsub.f32 1.0, %v2255_v50  ;;  %v1550_v52 = vmul.f32 %v2255_v50, %v1411_v17 }
 0xac2   :  { %v1534_v15 = vadd.f32 %v1532_v61, %v2613_v19 }
 0xac3   :  { %v2257_v44 = vpop.eup %2256 }
 0xac4   :  { %2258 = vtanh.f32 %v1534_v15  ;;  %v1533_v10 = vmul.f32 %v2257_v44, %v1515_v43  ;;  %v1539_v54 = vsub.f32 1.0, %v2257_v44  ;;  %v1551_v19 = vmul.f32 %v2257_v44, %v1412_v0 }
 0xac5   :  { %v3148_v44 = vsel %vm2544_vm5, %v2663_v38, %v2659_v36 }
 0xac6   :  { %v1535_v49 = vadd.f32 %v1533_v10, %v2633_v25 }
 0xac8   :  { %2260 = vtanh.f32 %v1535_v49 }
 0xace   :  { %v2259_v55 = vpop.eup %2258 }
 0xacf   :  { %1542 = vrot.lane.b32.xlu0 %v2259_v55, %s2287_s12 }
 0xad2   :  { %v2261_v7 = vpop.eup %2260 }
 0xad3   :  { %1544 = vrot.lane.b32.xlu1 %v2261_v7, %s2287_s12 }
 0xb41   :  { %v1543_v39 = vpop.permute.xlu0 %1542 }
 0xb42   :  { %v1548_v21 = vmul.f32 %v1543_v39, %v1538_v60 }
 0xb44   :  { %v1552_v12 = vadd.f32 %v1550_v52, %v1548_v21 }
 0xb45   :  { %v1545_v6 = vpop.permute.xlu1 %1544 }
 0xb46   :  { %v1549_v63 = vmul.f32 %v1545_v6, %v1539_v54  ;;  %1556 = vrot.lane.b32.xlu0 %v1552_v12, %s2287_s12 }
 0xb48   :  { %v1553_v53 = vadd.f32 %v1551_v19, %v1549_v63 }
 0xb4a   :  { %1558 = vrot.lane.b32.xlu1 %v1553_v53, %s2287_s12 }
 0xbb8   :  { %v1557_v25 = vpop.permute.xlu0 %1556 }
 0xbb9   :  { %1922 = vst.msk [vmem:[%s3134_s3 + $0x50] sm:$0xff] %vm848_vm7, %v1557_v25  ;;  %1926 = vmatmul.mubr.msk.f32.vlgmr.msra.gmra.mrb[24].mxu1 %vm48_vm0, %v1557_v25 }
 0xbba   :  { %1924 = vst.msk [vmem:[%s3134_s3 + $0x20] sm:$0xff] %vm852_vm8, %v1557_v25  ;;  %1652 = vmatprep.mubr.f32.mxu1 %v2286_v3  ;;  %2184 = vmatpush1.bf16.msra.mxu1 %v2735_v58 }
 0xbbb   :  { %2181 = vmatprep.subr.bf16.mxu1 %v2737_v62  ;;  %v3145_v62 = vsel %vm2544_vm5, %v2637_v27, %v2518_v41 }
 0xbbc   :  { %v1559_v2 = vpop.permute.xlu1 %1558 }
 0xbbd   :  { %1923 = vst.msk [vmem:[%s3134_s3 + $0x58] sm:$0xff] %vm848_vm7, %v1559_v2  ;;  %1927 = vmatmul.mubr.msk.f32.gmra.mrb[26].mxu1 %vm48_vm0, %v1559_v2 }
 0xbbe   :  { %1925 = vst.msk [vmem:[%s3134_s3 + $0x28] sm:$0xff] %vm852_vm8, %v1559_v2  ;;  %2185 = vmatpush1.bf16.msra.mxu1 %v2755_v46  ;;  %1793 = vmatprep.mubr.f32.mxu1 %v2286_v3  ;;  %v3146_v3 = vsel %vm2544_vm5, %v2661_v37, %v2525_v45 }
 0xbbf   :  { %2182 = vmatprep.subr.bf16.mxu1 %v2758_v47 }
 0xbc2   :  { %2186 = vmatpush1.bf16.msra.mxu1 %v2776_v48 }
 0xbc3   :  { %2183 = vmatprep.subr.bf16.mxu1 %v2779_v31 }
 0xbc6   :  { %2187 = vmatpush1.bf16.msra.mxu1 %v2790_v13 }
 0xc8c   :  { %v1648_v58 = vpop.f32.mrb[24].mxu1 }
 0xc8d   :  { %v1659_v16 = vadd.f32 %v1648_v58, %v3145_v62  ;;  %v1650_v17 = vpop.f32.mrb[25].mxu1 }
 0xc8f   :  { %v1928_v1 = vmul.f32 -1.442695, %v1659_v16 }
 0xc90   :  { %v1654_v46 = vpop.f32.mrb[26].mxu1 }
 0xc91   :  { %2262 = vpow2.f32 %v1928_v1  ;;  %v1660_v47 = vadd.f32 %v1654_v46, %v3146_v3  ;;  %v1656_v48 = vpop.f32.mrb[27].mxu1 }
 0xc93   :  { %v1929_v31 = vmul.f32 -1.442695, %v1660_v47 }
 0xc95   :  { %2264 = vpow2.f32 %v1929_v31 }
 0xc9b   :  { %v2263_v13 = vpop.eup %2262 }
 0xc9c   :  { %v1667_v34 = vadd.f32 1.0, %v2263_v13 }
 0xc9e   :  { %2266 = vrcp.f32 %v1667_v34 }
 0xc9f   :  { %v2265_v18 = vpop.eup %2264 }
 0xca0   :  { %v1668_v8 = vadd.f32 1.0, %v2265_v18 }
 0xca2   :  { %2268 = vrcp.f32 %v1668_v8 }
 0xca8   :  { %v2267_v41 = vpop.eup %2266 }
 0xca9   :  { %v1673_v27 = vmul.f32 %v2267_v41, %v1650_v17  ;;  %v1679_v22 = vsub.f32 1.0, %v2267_v41  ;;  %v1691_v35 = vmul.f32 %v2267_v41, %v1552_v12 }
 0xcab   :  { %v1675_v0 = vadd.f32 %v1673_v27, %v2691_v56 }
 0xcac   :  { %v2269_v24 = vpop.eup %2268 }
 0xcad   :  { %2270 = vtanh.f32 %v1675_v0  ;;  %v1674_v9 = vmul.f32 %v2269_v24, %v1656_v48  ;;  %v1680_v4 = vsub.f32 1.0, %v2269_v24  ;;  %v1692_v56 = vmul.f32 %v2269_v24, %v1553_v53 }
 0xcaf   :  { %v1676_v5 = vadd.f32 %v1674_v9, %v2705_v29 }
 0xcb1   :  { %2272 = vtanh.f32 %v1676_v5 }
 0xcb7   :  { %v2271_v45 = vpop.eup %2270 }
 0xcb8   :  { %1683 = vrot.lane.b32.xlu0 %v2271_v45, %s2287_s12 }
 0xcbb   :  { %v2273_v37 = vpop.eup %2272 }
 0xcbc   :  { %1685 = vrot.lane.b32.xlu1 %v2273_v37, %s2287_s12 }
 0xd2a   :  { %v1684_v23 = vpop.permute.xlu0 %1683 }
 0xd2b   :  { %v1689_v20 = vmul.f32 %v1684_v23, %v1679_v22 }
 0xd2d   :  { %v1693_v11 = vadd.f32 %v1691_v35, %v1689_v20 }
 0xd2e   :  { %v1686_v32 = vpop.permute.xlu1 %1685 }
 0xd2f   :  { %v1690_v43 = vmul.f32 %v1686_v32, %v1680_v4  ;;  %1697 = vrot.lane.b32.xlu0 %v1693_v11, %s2287_s12 }
 0xd31   :  { %v1694_v40 = vadd.f32 %v1692_v56, %v1690_v43 }
 0xd33   :  { %1699 = vrot.lane.b32.xlu1 %v1694_v40, %s2287_s12 }
 0xda1   :  { %v1698_v29 = vpop.permute.xlu0 %1697 }
 0xda2   :  { %1930 = vst.msk [vmem:[%s3134_s3 + $0x60] sm:$0xff] %vm848_vm7, %v1698_v29  ;;  %1934 = vmatmul.mubr.msk.f32.vlgmr.msra.gmra.mrb[28].mxu0 %vm48_vm0, %v1698_v29 }
 0xda3   :  { %1932 = vst.msk [vmem:[%s3134_s3 + $0x10] sm:$0xff] %vm852_vm8, %v1698_v29 }
 0xda5   :  { %v1700_v42 = vpop.permute.xlu1 %1699 }
 0xda6   :  { %1931 = vst.msk [vmem:[%s3134_s3 + $0x68] sm:$0xff] %vm848_vm7, %v1700_v42  ;;  %1935 = vmatmul.mubr.msk.f32.vlgmr.msra.gmra.mrb[28].mxu1 %vm48_vm0, %v1700_v42 }
 0xda7   :  { %1933 = vst.msk [vmem:[%s3134_s3 + $0x18] sm:$0xff] %vm852_vm8, %v1700_v42 }
 0xe75   :  { %v1789_v33 = vpop.f32.mrb[28].mxu0 }
 0xe76   :  { %v1800_v51 = vadd.f32 %v1789_v33, %v3147_v14  ;;  %v1791_v50 = vpop.f32.mrb[29].mxu0 }
 0xe78   :  { %v1936_v61 = vmul.f32 -1.442695, %v1800_v51 }
 0xe79   :  { %v1795_v15 = vpop.f32.mrb[28].mxu1 }
 0xe7a   :  { %2274 = vpow2.f32 %v1936_v61  ;;  %v1801_v10 = vadd.f32 %v1795_v15, %v3148_v44  ;;  %v1797_v49 = vpop.f32.mrb[29].mxu1 }
 0xe7c   :  { %v1937_v55 = vmul.f32 -1.442695, %v1801_v10 }
 0xe7e   :  { %2276 = vpow2.f32 %v1937_v55 }
 0xe84   :  { %v2275_v7 = vpop.eup %2274 }
 0xe85   :  { %v1808_v60 = vadd.f32 1.0, %v2275_v7 }
 0xe87   :  { %2278 = vrcp.f32 %v1808_v60 }
 0xe88   :  { %v2277_v39 = vpop.eup %2276 }
 0xe89   :  { %v1809_v52 = vadd.f32 1.0, %v2277_v39 }
 0xe8b   :  { %2280 = vrcp.f32 %v1809_v52 }
 0xe91   :  { %v2279_v26 = vpop.eup %2278 }
 0xe92   :  { %v1814_v28 = vmul.f32 %v2279_v26, %v1791_v50  ;;  %v1820_v6 = vsub.f32 1.0, %v2279_v26  ;;  %v1832_v63 = vmul.f32 %v2279_v26, %v1693_v11 }
 0xe94   :  { %v1816_v21 = vadd.f32 %v1814_v28, %v2695_v57 }
 0xe95   :  { %v2281_v12 = vpop.eup %2280 }
 0xe96   :  { %2282 = vtanh.f32 %v1816_v21  ;;  %v1815_v59 = vmul.f32 %v2281_v12, %v1797_v49  ;;  %v1821_v2 = vsub.f32 1.0, %v2281_v12  ;;  %v1833_v57 = vmul.f32 %v2281_v12, %v1694_v40 }
 0xe98   :  { %v1817_v54 = vadd.f32 %v1815_v59, %v2709_v30 }
 0xe9a   :  { %2284 = vtanh.f32 %v1817_v54 }
 0xea0   :  { %v2283_v36 = vpop.eup %2282 }
 0xea1   :  { %1824 = vrot.lane.b32.xlu0 %v2283_v36, %s2287_s12 }
 0xea4   :  { %v2285_v38 = vpop.eup %2284 }
 0xea5   :  { %1826 = vrot.lane.b32.xlu1 %v2285_v38, %s2287_s12 }
 0xf13   :  { %v1825_v19 = vpop.permute.xlu0 %1824 }
 0xf14   :  { %v1830_v53 = vmul.f32 %v1825_v19, %v1820_v6 }
 0xf16   :  { %v1834_v25 = vadd.f32 %v1832_v63, %v1830_v53 }
 0xf17   :  { %v1827_v58 = vpop.permute.xlu1 %1826 }
 0xf18   :  { %v1831_v62 = vmul.f32 %v1827_v58, %v1821_v2  ;;  %1838 = vrot.lane.b32.xlu0 %v1834_v25, %s2287_s12 }
 0xf1a   :  { %v1835_v16 = vadd.f32 %v1833_v57, %v1831_v62 }
 0xf1c   :  { %1840 = vrot.lane.b32.xlu1 %v1835_v16, %s2287_s12 }
 0xf8a   :  { %v1839_v30 = vpop.permute.xlu0 %1838 }
 0xf8b   :  { %1938 = vst.msk [vmem:[%s3134_s3 + $0x70] sm:$0xff] %vm848_vm7, %v1839_v30 }
 0xf8c   :  { %1846 = vst.msk [vmem:[%s3134_s3] sm:$0xff] %vm852_vm8, %v1839_v30 }
 0xf8e   :  { %v1841_v17 = vpop.permute.xlu1 %1840 }
 0xf8f   :  { %1939 = vst.msk [vmem:[%s3134_s3 + $0x78] sm:$0xff] %vm848_vm7, %v1841_v17 }
 0xf90   :  { %1847 = vst.msk [vmem:[%s3134_s3 + $0x8] sm:$0xff] %vm852_vm8, %v1841_v17 }

// kernel: _lambda_.2
= control target key start
LH: loop header
LB: loop body
LE: loop exit
PB: predicated region body
PF: predicated region fallthrough
CT: control target
= control target key end

     0   :  { %v2171_v3 = vmov 0.0   ;;  %vm36_vm0 = vcmask 130048   ;;  %vm121_vm1 = vcmask 523264   ;;  %v762_v25 = vlaneseq  ;;  %s2172_s15 = smov 64   ;;  %s2892_s1 = inlined_call_operand.vmem [shape: f32[16,192], index: 1, kind: input, shape index: {}]   ;;  %s2893_s0 = inlined_call_operand.vmem [shape: f32[8,16,16], index: 0, kind: input, shape index: {}]   ;;  %s2894_s2 = inlined_call_operand.vmem [shape: f32[64,192], index: 2, kind: input, shape index: {}]   ;;  %s2895_s3 = inlined_call_operand.vmem [shape: f32[8,16,64], index: 3, kind: output, shape index: {}]  }
   0x1   :  { %v15_v0 = vld [vmem:[%s2892_s1 + $0x8] sm:$0xff]  ;;  %v17_v1 = vld [vmem:[%s2892_s1 + $0x18] sm:$0xff]  ;;  %v14_v2 = vld [vmem:[%s2892_s1] sm:$0xff]  ;;  %107 = vmatprep.mubr.f32.mxu1 %v2171_v3  ;;  %289 = vmatprep.mubr.f32.mxu0 %v2171_v3  ;;  %vm837_vm8 = vcmask 261120   ;;  %vm841_vm9 = vcmask 523520  }
   0x2   :  { %v1929_v4 = vpack.c.bf16 %v17_v1, %v15_v0  ;;  %v16_v5 = vld [vmem:[%s2892_s1 + $0x10] sm:$0xff]  ;;  %v34_v7 = vld [vmem:[%s2893_s0] sm:$0xff]  ;;  %v35_v9 = vld [vmem:[%s2893_s0 + $0x8] sm:$0xff]  ;;  %v763_v30 = vand.u32 127, %v762_v25 }
   0x3   :  { %v1931_v6 = vpack.c.bf16 %v16_v5, %v14_v2  ;;  %v1847_v8 = vld [vmem:[%s2893_s0 + $0x20] sm:$0xff]  ;;  %v1848_v10 = vld [vmem:[%s2893_s0 + $0x28] sm:$0xff]  ;;  %v1843_v11 = vld [vmem:[%s2893_s0 + $0x10] sm:$0xff] }
   0x4   :  { %1930 = vmatprep.subr.bf16.mxu1 %v1929_v4  ;;  %1938 = vmatprep.subr.bf16.mxu0 %v1929_v4  ;;  %v1855_v12 = vld [vmem:[%s2893_s0 + $0x40] sm:$0xff]  ;;  %v1844_v13 = vld [vmem:[%s2893_s0 + $0x18] sm:$0xff]  ;;  %v1856_v14 = vld [vmem:[%s2893_s0 + $0x48] sm:$0xff]  ;;  %vm767_vm2 = vcmp.ge.s32.totalorder %v763_v30, 64  ;;  %vm769_vm3 = vcmp.lt.s32.totalorder %v763_v30, 96  ;;  %vm765_vm4 = vcmp.lt.s32.totalorder %v763_v30, 32 }
   0x5   :  { %1932 = vmatpush1.bf16.msra.mxu1 %v1931_v6  ;;  %1940 = vmatpush1.bf16.msra.mxu0 %v1931_v6  ;;  %v1851_v15 = vld [vmem:[%s2893_s0 + $0x30] sm:$0xff]  ;;  %v1863_v16 = vld [vmem:[%s2893_s0 + $0x60] sm:$0xff]  ;;  %v1852_v17 = vld [vmem:[%s2893_s0 + $0x38] sm:$0xff]  ;;  %v2339_v50 = vadd.s32 128, %v763_v30 }
   0x6   :  { %1934 = vmatprep.subr.bf16.mxu1 %v1929_v4  ;;  %1946 = vmatprep.subr.bf16.mxu0 %v1929_v4  ;;  %v1864_v18 = vld [vmem:[%s2893_s0 + $0x68] sm:$0xff]  ;;  %v1859_v19 = vld [vmem:[%s2893_s0 + $0x50] sm:$0xff]  ;;  %v1860_v20 = vld [vmem:[%s2893_s0 + $0x58] sm:$0xff] }
   0x7   :  { %v1867_v21 = vld [vmem:[%s2893_s0 + $0x70] sm:$0xff]  ;;  %v1868_v22 = vld [vmem:[%s2893_s0 + $0x78] sm:$0xff]  ;;  %vm771_vm5 = vmand %vm767_vm2, %vm769_vm3  ;;  %vm778_vm7 = vcmp.lt.s32.totalorder %v2339_v50, 160 }
   0x8   :  { %1841 = vmatmul.mubr.msk.f32.vlgmr.msra.gmra.mrb[0].mxu1 %vm36_vm0, %v34_v7  ;;  %1849 = vmatmul.mubr.msk.f32.vlgmr.msra.gmra.mrb[0].mxu0 %vm36_vm0, %v1847_v8  ;;  %vm2313_vm6 = vmor %vm765_vm4, %vm771_vm5  ;;  %v30_v2 = vld [vmem:[%s2894_s2 + $0x60] sm:$0xff]  ;;  %v32_v57 = vld [vmem:[%s2894_s2 + $0x70] sm:$0xff] }
   0x9   :  { %1936 = vmatpush1.bf16.msra.mxu1 %v1931_v6  ;;  %113 = vmatprep.mubr.f32.mxu1 %v2171_v3 }
   0xa   :  { %295 = vmatprep.mubr.f32.mxu0 %v2171_v3  ;;  %1948 = vmatpush1.bf16.msra.mxu0 %v1931_v6 }
   0xb   :  { %1942 = vmatprep.subr.bf16.mxu1 %v1929_v4  ;;  %1954 = vmatprep.subr.bf16.mxu0 %v1929_v4 }
   0xc   :  { %1842 = vmatmul.mubr.msk.f32.gmra.mrb[2].mxu1 %vm36_vm0, %v35_v9  ;;  %1850 = vmatmul.mubr.msk.f32.gmra.mrb[2].mxu0 %vm36_vm0, %v1848_v10 }
   0xd   :  { %198 = vmatprep.mubr.f32.mxu1 %v2171_v3  ;;  %471 = vmatprep.mubr.f32.mxu0 %v2171_v3 }
  0x10   :  { %1845 = vmatmul.mubr.msk.f32.vlgmr.msra.gmra.mrb[4].mxu1 %vm36_vm0, %v1843_v11  ;;  %1857 = vmatmul.mubr.msk.f32.vlgmr.msra.gmra.mrb[4].mxu0 %vm36_vm0, %v1855_v12 }
  0x11   :  { %1944 = vmatpush1.bf16.msra.mxu1 %v1931_v6  ;;  %204 = vmatprep.mubr.f32.mxu1 %v2171_v3 }
  0x12   :  { %477 = vmatprep.mubr.f32.mxu0 %v2171_v3  ;;  %1956 = vmatpush1.bf16.msra.mxu0 %v1931_v6 }
  0x13   :  { %1950 = vmatprep.subr.bf16.mxu1 %v1929_v4 }
  0x14   :  { %1846 = vmatmul.mubr.msk.f32.gmra.mrb[6].mxu1 %vm36_vm0, %v1844_v13  ;;  %1858 = vmatmul.mubr.msk.f32.gmra.mrb[6].mxu0 %vm36_vm0, %v1856_v14 }
  0x15   :  { %380 = vmatprep.mubr.f32.mxu1 %v2171_v3  ;;  %653 = vmatprep.mubr.f32.mxu0 %v2171_v3 }
  0x18   :  { %1853 = vmatmul.mubr.msk.f32.vlgmr.msra.gmra.mrb[8].mxu1 %vm36_vm0, %v1851_v15  ;;  %1865 = vmatmul.mubr.msk.f32.vlgmr.msra.gmra.mrb[8].mxu0 %vm36_vm0, %v1863_v16 }
  0x19   :  { %1952 = vmatpush1.bf16.msra.mxu1 %v1931_v6  ;;  %386 = vmatprep.mubr.f32.mxu1 %v2171_v3 }
  0x1a   :  { %659 = vmatprep.mubr.f32.mxu0 %v2171_v3  ;;  %1958 = vmatprep.subr.bf16.mxu1 %v1929_v4 }
  0x1c   :  { %1854 = vmatmul.mubr.msk.f32.gmra.mrb[10].mxu1 %vm36_vm0, %v1852_v17  ;;  %1866 = vmatmul.mubr.msk.f32.gmra.mrb[10].mxu0 %vm36_vm0, %v1864_v18 }
  0x1d   :  { %562 = vmatprep.mubr.f32.mxu1 %v2171_v3  ;;  %924 = vmatprep.mubr.f32.mxu0 %v2171_v3 }
  0x20   :  { %1861 = vmatmul.mubr.msk.f32.vlgmr.msra.gmra.mrb[12].mxu1 %vm36_vm0, %v1859_v19 }
  0x21   :  { %1960 = vmatpush1.bf16.msra.mxu1 %v1931_v6  ;;  %568 = vmatprep.mubr.f32.mxu1 %v2171_v3 }
  0x24   :  { %1862 = vmatmul.mubr.msk.f32.gmra.mrb[14].mxu1 %vm36_vm0, %v1860_v20 }
  0x25   :  { %744 = vmatprep.mubr.f32.mxu1 %v2171_v3 }
  0x28   :  { %1869 = vmatmul.mubr.msk.f32.vlgmr.msra.gmra.mrb[16].mxu1 %vm36_vm0, %v1867_v21 }
  0x29   :  { %750 = vmatprep.mubr.f32.mxu1 %v2171_v3 }
  0x2c   :  { %1870 = vmatmul.mubr.msk.f32.gmra.mrb[18].mxu1 %vm36_vm0, %v1868_v22 }
  0x2d   :  { %1067 = vmatprep.mubr.f32.mxu1 %v2171_v3 }
  0xdb   :  { %v2287_v23 = vpop.f32.mrb[0].mxu1  ;;  %v2289_v24 = vpop.f32.mrb[0].mxu0 }
  0xdc   :  { %120 = vst [vmem:[#allocation2] sm:$0xff] %v2287_v23  ;;  %v111_v26 = vpop.f32.mrb[1].mxu1  ;;  %v293_v27 = vpop.f32.mrb[1].mxu0 }
  0xdd   :  { %122 = vst.msk [vmem:[#allocation2 + $0x8] sm:$0xff] %vm121_vm1, %v111_v26  ;;  %304 = vst.msk [vmem:[#allocation2 + $0x48] sm:$0xff] %vm121_vm1, %v293_v27 }
  0xdf   :  { %v2294_v28 = vpop.f32.mrb[2].mxu1  ;;  %v2296_v29 = vpop.f32.mrb[2].mxu0 }
  0xe0   :  { %123 = vst [vmem:[#allocation2 + $0x10] sm:$0xff] %v2294_v28  ;;  %v117_v31 = vpop.f32.mrb[3].mxu1  ;;  %v299_v32 = vpop.f32.mrb[3].mxu0 }
  0xe1   :  { %124 = vst.msk [vmem:[#allocation2 + $0x18] sm:$0xff] %vm121_vm1, %v117_v31  ;;  %306 = vst.msk [vmem:[#allocation2 + $0x58] sm:$0xff] %vm121_vm1, %v299_v32 }
  0xe3   :  { %v2301_v33 = vpop.f32.mrb[4].mxu1  ;;  %v2303_v34 = vpop.f32.mrb[4].mxu0  ;;  %v2430_v18 = vld [vmem:[#allocation2] sm:$0xff] }
  0xe4   :  { %v202_v35 = vpop.f32.mrb[5].mxu1  ;;  %v475_v36 = vpop.f32.mrb[5].mxu0  ;;  %v2426_v16 = vld [vmem:[#allocation2 + $0x48] sm:$0xff] }
  0xe5   :  { %213 = vst.msk [vmem:[#allocation2 + $0x28] sm:$0xff] %vm121_vm1, %v202_v35  ;;  %486 = vst.msk [vmem:[#allocation2 + $0x88] sm:$0xff] %vm121_vm1, %v475_v36 }
  0xe7   :  { %v2307_v37 = vpop.f32.mrb[6].mxu1  ;;  %v2309_v38 = vpop.f32.mrb[6].mxu0 }
  0xe8   :  { %v208_v39 = vpop.f32.mrb[7].mxu1  ;;  %v481_v40 = vpop.f32.mrb[7].mxu0  ;;  %v2449_v27 = vld [vmem:[#allocation2 + $0x58] sm:$0xff] }
  0xe9   :  { %215 = vst.msk [vmem:[#allocation2 + $0x38] sm:$0xff] %vm121_vm1, %v208_v39  ;;  %488 = vst.msk [vmem:[#allocation2 + $0x98] sm:$0xff] %vm121_vm1, %v481_v40 }
  0xeb   :  { %v2317_v42 = vpop.f32.mrb[8].mxu1  ;;  %v2319_v43 = vpop.f32.mrb[8].mxu0 }
  0xec   :  { %v384_v44 = vpop.f32.mrb[9].mxu1  ;;  %v657_v45 = vpop.f32.mrb[9].mxu0  ;;  %v852_v46 = vsel %vm2313_vm6, %v2301_v33, %v2319_v43  ;;  %v2364_v59 = vld [vmem:[#allocation2 + $0x88] sm:$0xff] }
  0xed   :  { %395 = vst.msk [vmem:[#allocation2 + $0x68] sm:$0xff] %vm121_vm1, %v384_v44  ;;  %668 = vst.msk [vmem:[#allocation2 + $0xc8] sm:$0xff] %vm121_vm1, %v657_v45  ;;  %v2368_v62 = vld [vmem:[#allocation2 + $0x28] sm:$0xff] }
  0xee   :  { %v784_v44 = vld [vmem:[#allocation2 + $0x8] sm:$0xff] }
  0xef   :  { %v2341_v51 = vpop.f32.mrb[10].mxu1  ;;  %v2343_v52 = vpop.f32.mrb[10].mxu0 }
  0xf0   :  { %v390_v53 = vpop.f32.mrb[11].mxu1  ;;  %v663_v54 = vpop.f32.mrb[11].mxu0  ;;  %v854_v55 = vsel %vm2313_vm6, %v2307_v37, %v2343_v52  ;;  %v2395_v6 = vld [vmem:[#allocation2 + $0x98] sm:$0xff] }
  0xf1   :  { %397 = vst.msk [vmem:[#allocation2 + $0x78] sm:$0xff] %vm121_vm1, %v390_v53  ;;  %670 = vst.msk [vmem:[#allocation2 + $0xd8] sm:$0xff] %vm121_vm1, %v663_v54  ;;  %v2399_v9 = vld [vmem:[#allocation2 + $0x38] sm:$0xff] }
  0xf2   :  { %v786_v53 = vld [vmem:[#allocation2 + $0x18] sm:$0xff] }
  0xf3   :  { %v2366_v60 = vpop.f32.mrb[12].mxu1 }
  0xf4   :  { %v566_v61 = vpop.f32.mrb[13].mxu1  ;;  %v2370_v63 = vld [vmem:[#allocation2 + $0xc8] sm:$0xff] }
  0xf5   :  { %v2376_v1 = vld [vmem:[#allocation2 + $0x68] sm:$0xff]  ;;  %577 = vst.msk [vmem:[#allocation2 + $0xa8] sm:$0xff] %vm121_vm1, %v566_v61  ;;  %v2393_v5 = vsel %vm778_vm7, %v2370_v63, %v2368_v62 }
  0xf6   :  { %v2387_v4 = vsel %vm778_vm7, %v2364_v59, %v2376_v1 }
  0xf7   :  { %v2397_v7 = vpop.f32.mrb[14].mxu1 }
  0xf8   :  { %v572_v8 = vpop.f32.mrb[15].mxu1  ;;  %v2401_v10 = vld [vmem:[#allocation2 + $0xd8] sm:$0xff] }
  0xf9   :  { %v2407_v12 = vld [vmem:[#allocation2 + $0x78] sm:$0xff]  ;;  %579 = vst.msk [vmem:[#allocation2 + $0xb8] sm:$0xff] %vm121_vm1, %v572_v8  ;;  %v2424_v15 = vsel %vm778_vm7, %v2401_v10, %v2399_v9 }
  0xfa   :  { %v2418_v14 = vsel %vm778_vm7, %v2395_v6, %v2407_v12 }
  0xfb   :  { %v2428_v17 = vpop.f32.mrb[16].mxu1 }
  0xfc   :  { %v748_v19 = vpop.f32.mrb[17].mxu1  ;;  %v791_v20 = vsel %vm2313_vm6, %v2287_v23, %v2428_v17  ;;  %v2436_v21 = vld [vmem:[#allocation2 + $0xa8] sm:$0xff]  ;;  %v2453_v23 = vld [vmem:[#allocation2 + $0x10] sm:$0xff] }
  0xfd   :  { %759 = vst.msk [vmem:[#allocation2 + $0xe8] sm:$0xff] %vm121_vm1, %v748_v19  ;;  %v1871_v25 = vmul.f32 -1.442695, %v791_v20  ;;  %v2447_v26 = vsel %vm778_vm7, %v2436_v21, %v2426_v16 }
  0xff   :  { %v2451_v30 = vpop.f32.mrb[18].mxu1  ;;  %2075 = vpow2.f32 %v1871_v25 }
 0x100   :  { %v793_v31 = vsel %vm2313_vm6, %v2294_v28, %v2451_v30  ;;  %v754_v32 = vpop.f32.mrb[19].mxu1  ;;  %v2459_v35 = vld [vmem:[#allocation2 + $0xb8] sm:$0xff] }
 0x101   :  { %v1872_v39 = vmul.f32 -1.442695, %v793_v31  ;;  %761 = vst.msk [vmem:[#allocation2 + $0xf8] sm:$0xff] %vm121_vm1, %v754_v32  ;;  %v2470_v40 = vsel %vm778_vm7, %v2459_v35, %v2449_v27 }
 0x103   :  { %2077 = vpow2.f32 %v1872_v39 }
 0x104   :  { %v788_v28 = vld [vmem:[#allocation2 + $0xe8] sm:$0xff] }
 0x105   :  { %v2474_v45 = vsel %vm778_vm7, %v788_v28, %v784_v44  ;;  %v792_v39 = vsel %vm778_vm7, %v784_v44, %v788_v28  ;;  %v18_v44 = vld [vmem:[%s2894_s2] sm:$0xff] }
 0x108   :  { %v790_v54 = vld [vmem:[#allocation2 + $0xf8] sm:$0xff] }
 0x109   :  { %v2076_v61 = vpop.eup %2075  ;;  %v2478_v8 = vsel %vm778_vm7, %v790_v54, %v786_v53  ;;  %v794_v49 = vsel %vm778_vm7, %v786_v53, %v790_v54 }
 0x10a   :  { %v803_v19 = vadd.f32 1.0, %v2076_v61  ;;  %v19_v61 = vld [vmem:[%s2894_s2 + $0x8] sm:$0xff] }
 0x10c   :  { %2079 = vrcp.f32 %v803_v19  ;;  %v21_v19 = vld [vmem:[%s2894_s2 + $0x18] sm:$0xff] }
 0x10d   :  { %v2078_v20 = vpop.eup %2077  ;;  %v2493_v28 = vpack.c.bf16 %v21_v19, %v19_v61  ;;  %v29_v19 = vld [vmem:[%s2894_s2 + $0x58] sm:$0xff] }
 0x10e   :  { %v804_v25 = vadd.f32 1.0, %v2078_v20  ;;  %v22_v20 = vld [vmem:[%s2894_s2 + $0x20] sm:$0xff] }
 0x10f   :  { %1962 = vmatprep.subr.bf16.mxu0 %v2493_v28  ;;  %1978 = vmatprep.subr.bf16.mxu1 %v2493_v28 }
 0x110   :  { %2081 = vrcp.f32 %v804_v25  ;;  %v24_v25 = vld [vmem:[%s2894_s2 + $0x30] sm:$0xff] }
 0x116   :  { %v2080_v31 = vpop.eup %2079 }
 0x117   :  { %v809_v32 = vmul.f32 0.0, %v2080_v31 }
 0x119   :  { %v811_v36 = vadd.f32 %v809_v32, %v792_v39  ;;  %v27_v39 = vld [vmem:[%s2894_s2 + $0x48] sm:$0xff] }
 0x11a   :  { %v2082_v22 = vpop.eup %2081 }
 0x11b   :  { %2083 = vtanh.f32 %v811_v36  ;;  %v810_v58 = vmul.f32 0.0, %v2082_v22  ;;  %v20_v36 = vld [vmem:[%s2894_s2 + $0x10] sm:$0xff] }
 0x11c   :  { %v2504_v53 = vpack.c.bf16 %v20_v36, %v18_v44  ;;  %v2524_v44 = vpack.c.bf16 %v24_v25, %v22_v20  ;;  %v2527_v36 = vpack.c.bf16 %v29_v19, %v27_v39  ;;  %v33_v20 = vld [vmem:[%s2894_s2 + $0x78] sm:$0xff] }
 0x11d   :  { %v812_v13 = vadd.f32 %v810_v58, %v794_v49  ;;  %v23_v49 = vld [vmem:[%s2894_s2 + $0x28] sm:$0xff] }
 0x11e   :  { %1964 = vmatpush1.bf16.msra.mxu0 %v2504_v53  ;;  %1980 = vmatpush1.bf16.msra.mxu1 %v2504_v53 }
 0x11f   :  { %2085 = vtanh.f32 %v812_v13  ;;  %v25_v13 = vld [vmem:[%s2894_s2 + $0x38] sm:$0xff] }
 0x120   :  { %v2506_v54 = vpack.c.bf16 %v25_v13, %v23_v49  ;;  %v26_v49 = vld [vmem:[%s2894_s2 + $0x40] sm:$0xff]  ;;  %v28_v13 = vld [vmem:[%s2894_s2 + $0x50] sm:$0xff] }
 0x121   :  { %v2545_v39 = vpack.c.bf16 %v28_v13, %v26_v49  ;;  %v2559_v49 = vpack.c.bf16 %v32_v57, %v30_v2  ;;  %v815_v13 = vsub.f32 1.0, %v2080_v31 }
 0x122   :  { %1966 = vmatprep.subr.bf16.mxu0 %v2506_v54  ;;  %1982 = vmatprep.subr.bf16.mxu1 %v2506_v54 }
 0x123   :  { %1968 = vmatpush1.bf16.msra.mxu0 %v2524_v44  ;;  %1984 = vmatpush1.bf16.msra.mxu1 %v2524_v44 }
 0x124   :  { %1970 = vmatprep.subr.bf16.mxu0 %v2527_v36  ;;  %1986 = vmatprep.subr.bf16.mxu1 %v2527_v36 }
 0x125   :  { %v2084_v61 = vpop.eup %2083 }
 0x126   :  { %819 = vrot.lane.b32.xlu0 %v2084_v61, %s2172_s15  ;;  %v31_v61 = vld [vmem:[%s2894_s2 + $0x68] sm:$0xff] }
 0x127   :  { %v2548_v19 = vpack.c.bf16 %v33_v20, %v31_v61  ;;  %1972 = vmatpush1.bf16.msra.mxu0 %v2545_v39  ;;  %1988 = vmatpush1.bf16.msra.mxu1 %v2545_v39 }
 0x129   :  { %v2086_v25 = vpop.eup %2085  ;;  %1974 = vmatprep.subr.bf16.mxu0 %v2548_v19  ;;  %1990 = vmatprep.subr.bf16.mxu1 %v2548_v19 }
 0x12a   :  { %821 = vrot.lane.b32.xlu0 %v2086_v25, %s2172_s15  ;;  %v816_v25 = vsub.f32 1.0, %v2082_v22 }
 0x12b   :  { %1976 = vmatpush1.bf16.msra.mxu0 %v2559_v49  ;;  %1992 = vmatpush1.bf16.msra.mxu1 %v2559_v49 }
 0x12c   :  { %1994 = vmatprep.subr.bf16.mxu0 %v2493_v28  ;;  %2010 = vmatprep.subr.bf16.mxu1 %v2493_v28 }
 0x198   :  { %v820_v61 = vpop.permute.xlu0 %819 }
 0x199   :  { %v825_v20 = vmul.f32 %v820_v61, %v815_v13 }
 0x19b   :  { %v827_v57 = vadd.f32 %v825_v20, %v809_v32 }
 0x19c   :  { %v822_v2 = vpop.permute.xlu0 %821 }
 0x19d   :  { %v826_v48 = vmul.f32 %v822_v2, %v816_v25  ;;  %831 = vrot.lane.b32.xlu1 %v827_v57, %s2172_s15 }
 0x19f   :  { %v828_v56 = vadd.f32 %v826_v48, %v810_v58 }
 0x1a1   :  { %833 = vrot.lane.b32.xlu1 %v828_v56, %s2172_s15 }
 0x20f   :  { %v832_v47 = vpop.permute.xlu1 %831 }
 0x210   :  { %838 = vst.msk [vmem:[%s2895_s3] sm:$0xff] %vm837_vm8, %v832_v47  ;;  %1875 = vmatmul.mubr.msk.f32.vlgmr.msra.gmra.mrb[12].mxu0 %vm121_vm1, %v832_v47 }
 0x211   :  { %1873 = vst.msk [vmem:[%s2895_s3 + $0x70] sm:$0xff] %vm841_vm9, %v832_v47  ;;  %930 = vmatprep.mubr.f32.mxu0 %v2171_v3  ;;  %1996 = vmatpush1.bf16.msra.mxu0 %v2504_v53 }
 0x212   :  { %1998 = vmatprep.subr.bf16.mxu0 %v2506_v54 }
 0x213   :  { %v834_v48 = vpop.permute.xlu1 %833 }
 0x214   :  { %839 = vst.msk [vmem:[%s2895_s3 + $0x8] sm:$0xff] %vm837_vm8, %v834_v48  ;;  %1876 = vmatmul.mubr.msk.f32.gmra.mrb[14].mxu0 %vm121_vm1, %v834_v48 }
 0x215   :  { %1874 = vst.msk [vmem:[%s2895_s3 + $0x78] sm:$0xff] %vm841_vm9, %v834_v48  ;;  %2000 = vmatpush1.bf16.msra.mxu0 %v2524_v44  ;;  %1210 = vmatprep.mubr.f32.mxu0 %v2171_v3 }
 0x216   :  { %2002 = vmatprep.subr.bf16.mxu0 %v2527_v36 }
 0x219   :  { %2004 = vmatpush1.bf16.msra.mxu0 %v2545_v39 }
 0x21a   :  { %2006 = vmatprep.subr.bf16.mxu0 %v2548_v19 }
 0x21d   :  { %2008 = vmatpush1.bf16.msra.mxu0 %v2559_v49 }
 0x21e   :  { %2026 = vmatprep.subr.bf16.mxu0 %v2493_v28 }
 0x2e3   :  { %v926_v47 = vpop.f32.mrb[12].mxu0 }
 0x2e4   :  { %v937_v58 = vadd.f32 %v926_v47, %v852_v46  ;;  %v928_v22 = vpop.f32.mrb[13].mxu0 }
 0x2e6   :  { %v1877_v31 = vmul.f32 -1.442695, %v937_v58  ;;  %v853_v58 = vsel %vm778_vm7, %v2368_v62, %v2370_v63 }
 0x2e7   :  { %v932_v32 = vpop.f32.mrb[14].mxu0 }
 0x2e8   :  { %2087 = vpow2.f32 %v1877_v31  ;;  %v938_v13 = vadd.f32 %v932_v32, %v854_v55  ;;  %v934_v61 = vpop.f32.mrb[15].mxu0  ;;  %v855_v32 = vsel %vm778_vm7, %v2399_v9, %v2401_v10 }
 0x2ea   :  { %v1878_v20 = vmul.f32 -1.442695, %v938_v13 }
 0x2ec   :  { %2089 = vpow2.f32 %v1878_v20 }
 0x2f2   :  { %v2088_v25 = vpop.eup %2087 }
 0x2f3   :  { %v945_v2 = vadd.f32 1.0, %v2088_v25 }
 0x2f5   :  { %2091 = vrcp.f32 %v945_v2 }
 0x2f6   :  { %v2090_v48 = vpop.eup %2089 }
 0x2f7   :  { %v946_v11 = vadd.f32 1.0, %v2090_v48 }
 0x2f9   :  { %2093 = vrcp.f32 %v946_v11 }
 0x2ff   :  { %v2092_v46 = vpop.eup %2091 }
 0x300   :  { %v951_v47 = vmul.f32 %v2092_v46, %v928_v22  ;;  %v957_v22 = vsub.f32 1.0, %v2092_v46  ;;  %v969_v62 = vmul.f32 %v2092_v46, %v827_v57  ;;  %v2898_v57 = vsel %vm2313_vm6, %v2289_v24, %v2366_v60 }
 0x302   :  { %v953_v31 = vadd.f32 %v951_v47, %v853_v58 }
 0x303   :  { %v2094_v0 = vpop.eup %2093 }
 0x304   :  { %2095 = vtanh.f32 %v953_v31  ;;  %v952_v55 = vmul.f32 %v2094_v0, %v934_v61  ;;  %v958_v48 = vsub.f32 1.0, %v2094_v0  ;;  %v970_v47 = vmul.f32 %v2094_v0, %v828_v56 }
 0x306   :  { %v954_v13 = vadd.f32 %v952_v55, %v855_v32 }
 0x308   :  { %2097 = vtanh.f32 %v954_v13  ;;  %v2899_v13 = vsel %vm2313_vm6, %v2296_v29, %v2397_v7 }
 0x30e   :  { %v2096_v20 = vpop.eup %2095 }
 0x30f   :  { %961 = vrot.lane.b32.xlu0 %v2096_v20, %s2172_s15 }
 0x312   :  { %v2098_v11 = vpop.eup %2097 }
 0x313   :  { %963 = vrot.lane.b32.xlu1 %v2098_v11, %s2172_s15 }
 0x381   :  { %v962_v25 = vpop.permute.xlu0 %961 }
 0x382   :  { %v967_v63 = vmul.f32 %v962_v25, %v957_v22 }
 0x384   :  { %v971_v2 = vadd.f32 %v969_v62, %v967_v63 }
 0x385   :  { %v964_v61 = vpop.permute.xlu1 %963 }
 0x386   :  { %v968_v58 = vmul.f32 %v964_v61, %v958_v48  ;;  %975 = vrot.lane.b32.xlu0 %v971_v2, %s2172_s15 }
 0x388   :  { %v972_v9 = vadd.f32 %v970_v47, %v968_v58  ;;  %v996_v58 = vsel %vm778_vm7, %v2426_v16, %v2436_v21 }
 0x38a   :  { %977 = vrot.lane.b32.xlu1 %v972_v9, %s2172_s15 }
 0x3f8   :  { %v976_v10 = vpop.permute.xlu0 %975 }
 0x3f9   :  { %1879 = vst.msk [vmem:[%s2895_s3 + $0x10] sm:$0xff] %vm837_vm8, %v976_v10  ;;  %1883 = vmatmul.mubr.msk.f32.vlgmr.msra.gmra.mrb[20].mxu1 %vm121_vm1, %v976_v10 }
 0x3fa   :  { %1881 = vst.msk [vmem:[%s2895_s3 + $0x60] sm:$0xff] %vm841_vm9, %v976_v10  ;;  %1073 = vmatprep.mubr.f32.mxu1 %v2171_v3  ;;  %2012 = vmatpush1.bf16.msra.mxu1 %v2504_v53 }
 0x3fb   :  { %2014 = vmatprep.subr.bf16.mxu1 %v2506_v54 }
 0x3fc   :  { %v978_v56 = vpop.permute.xlu1 %977 }
 0x3fd   :  { %1880 = vst.msk [vmem:[%s2895_s3 + $0x18] sm:$0xff] %vm837_vm8, %v978_v56  ;;  %1884 = vmatmul.mubr.msk.f32.gmra.mrb[22].mxu1 %vm121_vm1, %v978_v56 }
 0x3fe   :  { %1882 = vst.msk [vmem:[%s2895_s3 + $0x68] sm:$0xff] %vm841_vm9, %v978_v56  ;;  %2016 = vmatpush1.bf16.msra.mxu1 %v2524_v44  ;;  %1353 = vmatprep.mubr.f32.mxu1 %v2171_v3 }
 0x3ff   :  { %2018 = vmatprep.subr.bf16.mxu1 %v2527_v36 }
 0x402   :  { %2020 = vmatpush1.bf16.msra.mxu1 %v2545_v39 }
 0x403   :  { %2022 = vmatprep.subr.bf16.mxu1 %v2548_v19 }
 0x406   :  { %2024 = vmatpush1.bf16.msra.mxu1 %v2559_v49 }
 0x407   :  { %2042 = vmatprep.subr.bf16.mxu1 %v2493_v28 }
 0x4cc   :  { %v1069_v0 = vpop.f32.mrb[20].mxu1 }
 0x4cd   :  { %v1080_v46 = vadd.f32 %v1069_v0, %v2898_v57  ;;  %v1071_v31 = vpop.f32.mrb[21].mxu1  ;;  %v998_v57 = vsel %vm778_vm7, %v2449_v27, %v2459_v35 }
 0x4cf   :  { %v1885_v55 = vmul.f32 -1.442695, %v1080_v46 }
 0x4d0   :  { %v1075_v32 = vpop.f32.mrb[22].mxu1 }
 0x4d1   :  { %2099 = vpow2.f32 %v1885_v55  ;;  %v1081_v20 = vadd.f32 %v1075_v32, %v2899_v13  ;;  %v1077_v11 = vpop.f32.mrb[23].mxu1 }
 0x4d3   :  { %v1886_v22 = vmul.f32 -1.442695, %v1081_v20 }
 0x4d5   :  { %2101 = vpow2.f32 %v1886_v22 }
 0x4db   :  { %v2100_v25 = vpop.eup %2099 }
 0x4dc   :  { %v1088_v62 = vadd.f32 1.0, %v2100_v25 }
 0x4de   :  { %2103 = vrcp.f32 %v1088_v62 }
 0x4df   :  { %v2102_v63 = vpop.eup %2101 }
 0x4e0   :  { %v1089_v48 = vadd.f32 1.0, %v2102_v63  ;;  %v2900_v63 = vsel %vm2313_vm6, %v2317_v42, %v2303_v34 }
 0x4e2   :  { %2105 = vrcp.f32 %v1089_v48 }
 0x4e8   :  { %v2104_v61 = vpop.eup %2103 }
 0x4e9   :  { %v1094_v47 = vmul.f32 %v2104_v61, %v1071_v31  ;;  %v1100_v32 = vsub.f32 1.0, %v2104_v61  ;;  %v1112_v16 = vmul.f32 %v2104_v61, %v971_v2 }
 0x4eb   :  { %v1096_v10 = vadd.f32 %v1094_v47, %v996_v58 }
 0x4ec   :  { %v2106_v56 = vpop.eup %2105 }
 0x4ed   :  { %2107 = vtanh.f32 %v1096_v10  ;;  %v1095_v0 = vmul.f32 %v2106_v56, %v1077_v11  ;;  %v1101_v22 = vsub.f32 1.0, %v2106_v56  ;;  %v1113_v25 = vmul.f32 %v2106_v56, %v972_v9 }
 0x4ee   :  { %v2901_v10 = vsel %vm2313_vm6, %v2341_v51, %v2309_v38 }
 0x4ef   :  { %v1097_v46 = vadd.f32 %v1095_v0, %v998_v57 }
 0x4f1   :  { %2109 = vtanh.f32 %v1097_v46 }
 0x4f7   :  { %v2108_v55 = vpop.eup %2107 }
 0x4f8   :  { %1104 = vrot.lane.b32.xlu0 %v2108_v55, %s2172_s15 }
 0x4fb   :  { %v2110_v31 = vpop.eup %2109 }
 0x4fc   :  { %1106 = vrot.lane.b32.xlu1 %v2110_v31, %s2172_s15 }
 0x56a   :  { %v1105_v13 = vpop.permute.xlu0 %1104 }
 0x56b   :  { %v1110_v21 = vmul.f32 %v1105_v13, %v1100_v32 }
 0x56d   :  { %v1114_v20 = vadd.f32 %v1112_v16, %v1110_v21  ;;  %v1139_v16 = vsel %vm778_vm7, %v2376_v1, %v2364_v59 }
 0x56e   :  { %v1107_v11 = vpop.permute.xlu1 %1106 }
 0x56f   :  { %v1111_v62 = vmul.f32 %v1107_v11, %v1101_v22  ;;  %1118 = vrot.lane.b32.xlu0 %v1114_v20, %s2172_s15 }
 0x571   :  { %v1115_v27 = vadd.f32 %v1113_v25, %v1111_v62  ;;  %v1141_v25 = vsel %vm778_vm7, %v2407_v12, %v2395_v6 }
 0x573   :  { %1120 = vrot.lane.b32.xlu1 %v1115_v27, %s2172_s15 }
 0x5e1   :  { %v1119_v35 = vpop.permute.xlu0 %1118 }
 0x5e2   :  { %1887 = vst.msk [vmem:[%s2895_s3 + $0x20] sm:$0xff] %vm837_vm8, %v1119_v35  ;;  %1891 = vmatmul.mubr.msk.f32.vlgmr.msra.gmra.mrb[16].mxu0 %vm121_vm1, %v1119_v35 }
 0x5e3   :  { %1889 = vst.msk [vmem:[%s2895_s3 + $0x50] sm:$0xff] %vm841_vm9, %v1119_v35  ;;  %1216 = vmatprep.mubr.f32.mxu0 %v2171_v3  ;;  %2028 = vmatpush1.bf16.msra.mxu0 %v2504_v53 }
 0x5e4   :  { %2030 = vmatprep.subr.bf16.mxu0 %v2506_v54 }
 0x5e5   :  { %v1121_v2 = vpop.permute.xlu1 %1120 }
 0x5e6   :  { %1888 = vst.msk [vmem:[%s2895_s3 + $0x28] sm:$0xff] %vm837_vm8, %v1121_v2  ;;  %1892 = vmatmul.mubr.msk.f32.gmra.mrb[18].mxu0 %vm121_vm1, %v1121_v2 }
 0x5e7   :  { %1890 = vst.msk [vmem:[%s2895_s3 + $0x58] sm:$0xff] %vm841_vm9, %v1121_v2  ;;  %2032 = vmatpush1.bf16.msra.mxu0 %v2524_v44  ;;  %1494 = vmatprep.mubr.f32.mxu0 %v2171_v3 }
 0x5e8   :  { %2034 = vmatprep.subr.bf16.mxu0 %v2527_v36 }
 0x5eb   :  { %2036 = vmatpush1.bf16.msra.mxu0 %v2545_v39 }
 0x5ec   :  { %2038 = vmatprep.subr.bf16.mxu0 %v2548_v19 }
 0x5ef   :  { %2040 = vmatpush1.bf16.msra.mxu0 %v2559_v49 }
 0x5f0   :  { %2058 = vmatprep.subr.bf16.mxu0 %v2493_v28 }
 0x6b5   :  { %v1212_v9 = vpop.f32.mrb[16].mxu0 }
 0x6b6   :  { %v1223_v48 = vadd.f32 %v1212_v9, %v2900_v63  ;;  %v1214_v61 = vpop.f32.mrb[17].mxu0 }
 0x6b8   :  { %v1893_v47 = vmul.f32 -1.442695, %v1223_v48 }
 0x6b9   :  { %v1218_v58 = vpop.f32.mrb[18].mxu0 }
 0x6ba   :  { %2111 = vpow2.f32 %v1893_v47  ;;  %v1224_v56 = vadd.f32 %v1218_v58, %v2901_v10  ;;  %v1220_v0 = vpop.f32.mrb[19].mxu0 }
 0x6bc   :  { %v1894_v57 = vmul.f32 -1.442695, %v1224_v56 }
 0x6be   :  { %2113 = vpow2.f32 %v1894_v57 }
 0x6c4   :  { %v2112_v28 = vpop.eup %2111 }
 0x6c5   :  { %v1231_v46 = vadd.f32 1.0, %v2112_v28 }
 0x6c7   :  { %2115 = vrcp.f32 %v1231_v46  ;;  %v2903_v46 = vsel %vm2313_vm6, %v2309_v38, %v2341_v51 }
 0x6c8   :  { %v2114_v55 = vpop.eup %2113 }
 0x6c9   :  { %v1232_v31 = vadd.f32 1.0, %v2114_v55 }
 0x6cb   :  { %2117 = vrcp.f32 %v1232_v31 }
 0x6d1   :  { %v2116_v32 = vpop.eup %2115 }
 0x6d2   :  { %v1237_v13 = vmul.f32 %v2116_v32, %v1214_v61  ;;  %v1243_v9 = vsub.f32 1.0, %v2116_v32  ;;  %v1255_v59 = vmul.f32 %v2116_v32, %v1114_v20 }
 0x6d4   :  { %v1239_v21 = vadd.f32 %v1237_v13, %v1139_v16 }
 0x6d5   :  { %v2118_v22 = vpop.eup %2117 }
 0x6d6   :  { %2119 = vtanh.f32 %v1239_v21  ;;  %v1238_v11 = vmul.f32 %v2118_v22, %v1220_v0  ;;  %v1244_v61 = vsub.f32 1.0, %v2118_v22  ;;  %v1256_v58 = vmul.f32 %v2118_v22, %v1115_v27 }
 0x6d7   :  { %v2902_v27 = vsel %vm2313_vm6, %v2303_v34, %v2317_v42 }
 0x6d8   :  { %v1240_v62 = vadd.f32 %v1238_v11, %v1141_v25 }
 0x6da   :  { %2121 = vtanh.f32 %v1240_v62 }
 0x6e0   :  { %v2120_v35 = vpop.eup %2119 }
 0x6e1   :  { %1247 = vrot.lane.b32.xlu0 %v2120_v35, %s2172_s15 }
 0x6e4   :  { %v2122_v2 = vpop.eup %2121 }
 0x6e5   :  { %1249 = vrot.lane.b32.xlu1 %v2122_v2, %s2172_s15 }
 0x753   :  { %v1248_v63 = vpop.permute.xlu0 %1247 }
 0x754   :  { %v1253_v1 = vmul.f32 %v1248_v63, %v1243_v9 }
 0x756   :  { %v1257_v48 = vadd.f32 %v1255_v59, %v1253_v1 }
 0x757   :  { %v1250_v47 = vpop.permute.xlu1 %1249 }
 0x758   :  { %v1254_v10 = vmul.f32 %v1250_v47, %v1244_v61  ;;  %1261 = vrot.lane.b32.xlu0 %v1257_v48, %s2172_s15 }
 0x75a   :  { %v1258_v50 = vadd.f32 %v1256_v58, %v1254_v10 }
 0x75c   :  { %1263 = vrot.lane.b32.xlu1 %v1258_v50, %s2172_s15 }
 0x7ca   :  { %v1262_v6 = vpop.permute.xlu0 %1261 }
 0x7cb   :  { %1895 = vst.msk [vmem:[%s2895_s3 + $0x30] sm:$0xff] %vm837_vm8, %v1262_v6  ;;  %1899 = vmatmul.mubr.msk.f32.vlgmr.msra.gmra.mrb[24].mxu1 %vm121_vm1, %v1262_v6 }
 0x7cc   :  { %1897 = vst.msk [vmem:[%s2895_s3 + $0x40] sm:$0xff] %vm841_vm9, %v1262_v6  ;;  %1359 = vmatprep.mubr.f32.mxu1 %v2171_v3  ;;  %2044 = vmatpush1.bf16.msra.mxu1 %v2504_v53 }
 0x7cd   :  { %2046 = vmatprep.subr.bf16.mxu1 %v2506_v54 }
 0x7ce   :  { %v1264_v12 = vpop.permute.xlu1 %1263 }
 0x7cf   :  { %1896 = vst.msk [vmem:[%s2895_s3 + $0x38] sm:$0xff] %vm837_vm8, %v1264_v12  ;;  %1900 = vmatmul.mubr.msk.f32.gmra.mrb[26].mxu1 %vm121_vm1, %v1264_v12 }
 0x7d0   :  { %1898 = vst.msk [vmem:[%s2895_s3 + $0x48] sm:$0xff] %vm841_vm9, %v1264_v12  ;;  %2048 = vmatpush1.bf16.msra.mxu1 %v2524_v44  ;;  %1635 = vmatprep.mubr.f32.mxu1 %v2171_v3 }
 0x7d1   :  { %2050 = vmatprep.subr.bf16.mxu1 %v2527_v36 }
 0x7d4   :  { %2052 = vmatpush1.bf16.msra.mxu1 %v2545_v39 }
 0x7d5   :  { %2054 = vmatprep.subr.bf16.mxu1 %v2548_v19 }
 0x7d8   :  { %2056 = vmatpush1.bf16.msra.mxu1 %v2559_v49 }
 0x89e   :  { %v1355_v20 = vpop.f32.mrb[24].mxu1 }
 0x89f   :  { %v1366_v56 = vadd.f32 %v1355_v20, %v2902_v27  ;;  %v1357_v0 = vpop.f32.mrb[25].mxu1 }
 0x8a1   :  { %v1901_v57 = vmul.f32 -1.442695, %v1366_v56 }
 0x8a2   :  { %v1361_v28 = vpop.f32.mrb[26].mxu1 }
 0x8a3   :  { %2123 = vpow2.f32 %v1901_v57  ;;  %v1367_v55 = vadd.f32 %v1361_v28, %v2903_v46  ;;  %v1363_v31 = vpop.f32.mrb[27].mxu1 }
 0x8a5   :  { %v1902_v32 = vmul.f32 -1.442695, %v1367_v55 }
 0x8a7   :  { %2125 = vpow2.f32 %v1902_v32 }
 0x8ad   :  { %v2124_v13 = vpop.eup %2123 }
 0x8ae   :  { %v1374_v16 = vadd.f32 1.0, %v2124_v13 }
 0x8b0   :  { %2127 = vrcp.f32 %v1374_v16 }
 0x8b1   :  { %v2126_v21 = vpop.eup %2125 }
 0x8b2   :  { %v1375_v22 = vadd.f32 1.0, %v2126_v21 }
 0x8b4   :  { %2129 = vrcp.f32 %v1375_v22 }
 0x8ba   :  { %v2128_v34 = vpop.eup %2127 }
 0x8bb   :  { %v1380_v42 = vmul.f32 %v2128_v34, %v1357_v0  ;;  %v1386_v2 = vsub.f32 1.0, %v2128_v34  ;;  %v1398_v63 = vmul.f32 %v2128_v34, %v1257_v48 }
 0x8bd   :  { %v1382_v11 = vadd.f32 %v1380_v42, %v2387_v4 }
 0x8be   :  { %v2130_v25 = vpop.eup %2129 }
 0x8bf   :  { %2131 = vtanh.f32 %v1382_v11  ;;  %v1381_v62 = vmul.f32 %v2130_v25, %v1363_v31  ;;  %v1387_v61 = vsub.f32 1.0, %v2130_v25  ;;  %v1399_v4 = vmul.f32 %v2130_v25, %v1258_v50 }
 0x8c1   :  { %v1383_v35 = vadd.f32 %v1381_v62, %v2418_v14 }
 0x8c3   :  { %2133 = vtanh.f32 %v1383_v35  ;;  %v2906_v35 = vsel %vm2313_vm6, %v2319_v43, %v2301_v33 }
 0x8c9   :  { %v2132_v38 = vpop.eup %2131 }
 0x8ca   :  { %1390 = vrot.lane.b32.xlu0 %v2132_v38, %s2172_s15 }
 0x8cd   :  { %v2134_v51 = vpop.eup %2133 }
 0x8ce   :  { %1392 = vrot.lane.b32.xlu1 %v2134_v51, %s2172_s15 }
 0x93c   :  { %v1391_v9 = vpop.permute.xlu0 %1390 }
 0x93d   :  { %v1396_v59 = vmul.f32 %v1391_v9, %v1386_v2 }
 0x93f   :  { %v1400_v1 = vadd.f32 %v1398_v63, %v1396_v59  ;;  %v2907_v63 = vsel %vm2313_vm6, %v2343_v52, %v2307_v37 }
 0x940   :  { %v1393_v47 = vpop.permute.xlu1 %1392 }
 0x941   :  { %v1397_v58 = vmul.f32 %v1393_v47, %v1387_v61  ;;  %1404 = vrot.lane.b32.xlu0 %v1400_v1, %s2172_s15 }
 0x943   :  { %v1401_v10 = vadd.f32 %v1399_v4, %v1397_v58 }
 0x945   :  { %1406 = vrot.lane.b32.xlu1 %v1401_v10, %s2172_s15 }
 0x9b3   :  { %v1405_v14 = vpop.permute.xlu0 %1404 }
 0x9b4   :  { %1903 = vst.msk [vmem:[%s2895_s3 + $0x40] sm:$0xff] %vm837_vm8, %v1405_v14  ;;  %1907 = vmatmul.mubr.msk.f32.vlgmr.msra.gmra.mrb[20].mxu0 %vm121_vm1, %v1405_v14 }
 0x9b5   :  { %1905 = vst.msk [vmem:[%s2895_s3 + $0x30] sm:$0xff] %vm841_vm9, %v1405_v14  ;;  %1500 = vmatprep.mubr.f32.mxu0 %v2171_v3  ;;  %2060 = vmatpush1.bf16.msra.mxu0 %v2504_v53 }
 0x9b6   :  { %2062 = vmatprep.subr.bf16.mxu0 %v2506_v54  ;;  %v2904_v54 = vsel %vm2313_vm6, %v2366_v60, %v2289_v24 }
 0x9b7   :  { %v1407_v48 = vpop.permute.xlu1 %1406 }
 0x9b8   :  { %1904 = vst.msk [vmem:[%s2895_s3 + $0x48] sm:$0xff] %vm837_vm8, %v1407_v48  ;;  %1908 = vmatmul.mubr.msk.f32.gmra.mrb[22].mxu0 %vm121_vm1, %v1407_v48 }
 0x9b9   :  { %1906 = vst.msk [vmem:[%s2895_s3 + $0x38] sm:$0xff] %vm841_vm9, %v1407_v48  ;;  %2064 = vmatpush1.bf16.msra.mxu0 %v2524_v44  ;;  %1776 = vmatprep.mubr.f32.mxu0 %v2171_v3 }
 0x9ba   :  { %2066 = vmatprep.subr.bf16.mxu0 %v2527_v36  ;;  %v2905_v36 = vsel %vm2313_vm6, %v2397_v7, %v2296_v29 }
 0x9bd   :  { %2068 = vmatpush1.bf16.msra.mxu0 %v2545_v39 }
 0x9be   :  { %2070 = vmatprep.subr.bf16.mxu0 %v2548_v19 }
 0x9c1   :  { %2072 = vmatpush1.bf16.msra.mxu0 %v2559_v49 }
 0xa87   :  { %v1496_v53 = vpop.f32.mrb[20].mxu0 }
 0xa88   :  { %v1507_v50 = vadd.f32 %v1496_v53, %v2904_v54  ;;  %v1498_v6 = vpop.f32.mrb[21].mxu0 }
 0xa8a   :  { %v1909_v12 = vmul.f32 -1.442695, %v1507_v50 }
 0xa8b   :  { %v1502_v44 = vpop.f32.mrb[22].mxu0 }
 0xa8c   :  { %2135 = vpow2.f32 %v1909_v12  ;;  %v1508_v39 = vadd.f32 %v1502_v44, %v2905_v36  ;;  %v1504_v19 = vpop.f32.mrb[23].mxu0 }
 0xa8e   :  { %v1910_v20 = vmul.f32 -1.442695, %v1508_v39 }
 0xa90   :  { %2137 = vpow2.f32 %v1910_v20 }
 0xa96   :  { %v2136_v49 = vpop.eup %2135 }
 0xa97   :  { %v1515_v27 = vadd.f32 1.0, %v2136_v49 }
 0xa99   :  { %2139 = vrcp.f32 %v1515_v27 }
 0xa9a   :  { %v2138_v56 = vpop.eup %2137 }
 0xa9b   :  { %v1516_v0 = vadd.f32 1.0, %v2138_v56 }
 0xa9d   :  { %2141 = vrcp.f32 %v1516_v0  ;;  %v2908_v0 = vsel %vm2313_vm6, %v2428_v17, %v2430_v18 }
 0xaa3   :  { %v2140_v24 = vpop.eup %2139 }
 0xaa4   :  { %v1521_v60 = vmul.f32 %v2140_v24, %v1498_v6  ;;  %v1527_v31 = vsub.f32 1.0, %v2140_v24  ;;  %v1539_v13 = vmul.f32 %v2140_v24, %v1400_v1 }
 0xaa6   :  { %v1523_v57 = vadd.f32 %v1521_v60, %v2447_v26 }
 0xaa7   :  { %v2142_v28 = vpop.eup %2141 }
 0xaa8   :  { %2143 = vtanh.f32 %v1523_v57  ;;  %v1522_v46 = vmul.f32 %v2142_v28, %v1504_v19  ;;  %v1528_v22 = vsub.f32 1.0, %v2142_v28  ;;  %v1540_v26 = vmul.f32 %v2142_v28, %v1401_v10 }
 0xaa9   :  { %v2909_v28 = vsel %vm2313_vm6, %v2451_v30, %v2453_v23 }
 0xaaa   :  { %v1524_v55 = vadd.f32 %v1522_v46, %v2470_v40 }
 0xaac   :  { %2145 = vtanh.f32 %v1524_v55 }
 0xab2   :  { %v2144_v29 = vpop.eup %2143 }
 0xab3   :  { %1531 = vrot.lane.b32.xlu0 %v2144_v29, %s2172_s15 }
 0xab6   :  { %v2146_v7 = vpop.eup %2145 }
 0xab7   :  { %1533 = vrot.lane.b32.xlu1 %v2146_v7, %s2172_s15 }
 0xb25   :  { %v1532_v32 = vpop.permute.xlu0 %1531 }
 0xb26   :  { %v1537_v16 = vmul.f32 %v1532_v32, %v1527_v31 }
 0xb28   :  { %v1541_v21 = vadd.f32 %v1539_v13, %v1537_v16 }
 0xb29   :  { %v1534_v34 = vpop.permute.xlu1 %1533 }
 0xb2a   :  { %v1538_v42 = vmul.f32 %v1534_v34, %v1528_v22  ;;  %1545 = vrot.lane.b32.xlu0 %v1541_v21, %s2172_s15 }
 0xb2c   :  { %v1542_v11 = vadd.f32 %v1540_v26, %v1538_v42 }
 0xb2e   :  { %1547 = vrot.lane.b32.xlu1 %v1542_v11, %s2172_s15 }
 0xb9c   :  { %v1546_v40 = vpop.permute.xlu0 %1545 }
 0xb9d   :  { %1911 = vst.msk [vmem:[%s2895_s3 + $0x50] sm:$0xff] %vm837_vm8, %v1546_v40  ;;  %1915 = vmatmul.mubr.msk.f32.vlgmr.msra.gmra.mrb[28].mxu1 %vm121_vm1, %v1546_v40 }
 0xb9e   :  { %1913 = vst.msk [vmem:[%s2895_s3 + $0x20] sm:$0xff] %vm841_vm9, %v1546_v40  ;;  %1641 = vmatprep.mubr.f32.mxu1 %v2171_v3 }
 0xba0   :  { %v1548_v25 = vpop.permute.xlu1 %1547 }
 0xba1   :  { %1912 = vst.msk [vmem:[%s2895_s3 + $0x58] sm:$0xff] %vm837_vm8, %v1548_v25  ;;  %1916 = vmatmul.mubr.msk.f32.gmra.mrb[30].mxu1 %vm121_vm1, %v1548_v25 }
 0xba2   :  { %1914 = vst.msk [vmem:[%s2895_s3 + $0x28] sm:$0xff] %vm841_vm9, %v1548_v25 }
 0xc70   :  { %v1637_v62 = vpop.f32.mrb[28].mxu1 }
 0xc71   :  { %v1648_v38 = vadd.f32 %v1637_v62, %v2906_v35  ;;  %v1639_v51 = vpop.f32.mrb[29].mxu1 }
 0xc73   :  { %v1917_v2 = vmul.f32 -1.442695, %v1648_v38 }
 0xc74   :  { %v1643_v9 = vpop.f32.mrb[30].mxu1 }
 0xc75   :  { %2147 = vpow2.f32 %v1917_v2  ;;  %v1649_v59 = vadd.f32 %v1643_v9, %v2907_v63  ;;  %v1645_v1 = vpop.f32.mrb[31].mxu1 }
 0xc77   :  { %v1918_v61 = vmul.f32 -1.442695, %v1649_v59 }
 0xc79   :  { %2149 = vpow2.f32 %v1918_v61 }
 0xc7f   :  { %v2148_v47 = vpop.eup %2147 }
 0xc80   :  { %v1656_v4 = vadd.f32 1.0, %v2148_v47 }
 0xc82   :  { %2151 = vrcp.f32 %v1656_v4 }
 0xc83   :  { %v2150_v58 = vpop.eup %2149 }
 0xc84   :  { %v1657_v10 = vadd.f32 1.0, %v2150_v58 }
 0xc86   :  { %2153 = vrcp.f32 %v1657_v10 }
 0xc8c   :  { %v2152_v33 = vpop.eup %2151 }
 0xc8d   :  { %v1662_v43 = vmul.f32 %v2152_v33, %v1639_v51  ;;  %v1668_v50 = vsub.f32 1.0, %v2152_v33  ;;  %v1680_v12 = vmul.f32 %v2152_v33, %v1541_v21 }
 0xc8f   :  { %v1664_v14 = vadd.f32 %v1662_v43, %v2393_v5 }
 0xc90   :  { %v2154_v48 = vpop.eup %2153 }
 0xc91   :  { %2155 = vtanh.f32 %v1664_v14  ;;  %v1663_v53 = vmul.f32 %v2154_v48, %v1645_v1  ;;  %v1669_v39 = vsub.f32 1.0, %v2154_v48  ;;  %v1681_v5 = vmul.f32 %v2154_v48, %v1542_v11 }
 0xc93   :  { %v1665_v54 = vadd.f32 %v1663_v53, %v2424_v15 }
 0xc95   :  { %2157 = vtanh.f32 %v1665_v54 }
 0xc9b   :  { %v2156_v37 = vpop.eup %2155 }
 0xc9c   :  { %1672 = vrot.lane.b32.xlu0 %v2156_v37, %s2172_s15 }
 0xc9f   :  { %v2158_v52 = vpop.eup %2157 }
 0xca0   :  { %1674 = vrot.lane.b32.xlu1 %v2158_v52, %s2172_s15 }
 0xd0e   :  { %v1673_v6 = vpop.permute.xlu0 %1672 }
 0xd0f   :  { %v1678_v44 = vmul.f32 %v1673_v6, %v1668_v50 }
 0xd11   :  { %v1682_v36 = vadd.f32 %v1680_v12, %v1678_v44 }
 0xd12   :  { %v1675_v19 = vpop.permute.xlu1 %1674 }
 0xd13   :  { %v1679_v20 = vmul.f32 %v1675_v19, %v1669_v39  ;;  %1686 = vrot.lane.b32.xlu0 %v1682_v36, %s2172_s15 }
 0xd15   :  { %v1683_v49 = vadd.f32 %v1681_v5, %v1679_v20 }
 0xd17   :  { %1688 = vrot.lane.b32.xlu1 %v1683_v49, %s2172_s15 }
 0xd85   :  { %v1687_v15 = vpop.permute.xlu0 %1686 }
 0xd86   :  { %1919 = vst.msk [vmem:[%s2895_s3 + $0x60] sm:$0xff] %vm837_vm8, %v1687_v15  ;;  %1923 = vmatmul.mubr.msk.f32.vlgmr.msra.gmra.mrb[24].mxu0 %vm121_vm1, %v1687_v15 }
 0xd87   :  { %1921 = vst.msk [vmem:[%s2895_s3 + $0x10] sm:$0xff] %vm841_vm9, %v1687_v15  ;;  %1782 = vmatprep.mubr.f32.mxu0 %v2171_v3 }
 0xd89   :  { %v1689_v27 = vpop.permute.xlu1 %1688 }
 0xd8a   :  { %1920 = vst.msk [vmem:[%s2895_s3 + $0x68] sm:$0xff] %vm837_vm8, %v1689_v27  ;;  %1924 = vmatmul.mubr.msk.f32.gmra.mrb[26].mxu0 %vm121_vm1, %v1689_v27 }
 0xd8b   :  { %1922 = vst.msk [vmem:[%s2895_s3 + $0x18] sm:$0xff] %vm841_vm9, %v1689_v27 }
 0xe59   :  { %v1778_v56 = vpop.f32.mrb[24].mxu0 }
 0xe5a   :  { %v1789_v3 = vadd.f32 %v1778_v56, %v2908_v0  ;;  %v1780_v24 = vpop.f32.mrb[25].mxu0 }
 0xe5c   :  { %v1925_v60 = vmul.f32 -1.442695, %v1789_v3 }
 0xe5d   :  { %v1784_v57 = vpop.f32.mrb[26].mxu0 }
 0xe5e   :  { %2159 = vpow2.f32 %v1925_v60  ;;  %v1790_v46 = vadd.f32 %v1784_v57, %v2909_v28  ;;  %v1786_v55 = vpop.f32.mrb[27].mxu0 }
 0xe60   :  { %v1926_v29 = vmul.f32 -1.442695, %v1790_v46 }
 0xe62   :  { %2161 = vpow2.f32 %v1926_v29 }
 0xe68   :  { %v2160_v7 = vpop.eup %2159 }
 0xe69   :  { %v1797_v31 = vadd.f32 1.0, %v2160_v7 }
 0xe6b   :  { %2163 = vrcp.f32 %v1797_v31 }
 0xe6c   :  { %v2162_v32 = vpop.eup %2161 }
 0xe6d   :  { %v1798_v13 = vadd.f32 1.0, %v2162_v32 }
 0xe6f   :  { %2165 = vrcp.f32 %v1798_v13 }
 0xe75   :  { %v2164_v17 = vpop.eup %2163 }
 0xe76   :  { %v1803_v18 = vmul.f32 %v2164_v17, %v1780_v24  ;;  %v1809_v34 = vsub.f32 1.0, %v2164_v17  ;;  %v1821_v42 = vmul.f32 %v2164_v17, %v1682_v36 }
 0xe78   :  { %v1805_v16 = vadd.f32 %v1803_v18, %v2474_v45 }
 0xe79   :  { %v2166_v21 = vpop.eup %2165 }
 0xe7a   :  { %2167 = vtanh.f32 %v1805_v16  ;;  %v1804_v41 = vmul.f32 %v2166_v21, %v1786_v55  ;;  %v1810_v25 = vsub.f32 1.0, %v2166_v21  ;;  %v1822_v45 = vmul.f32 %v2166_v21, %v1683_v49 }
 0xe7c   :  { %v1806_v22 = vadd.f32 %v1804_v41, %v2478_v8 }
 0xe7e   :  { %2169 = vtanh.f32 %v1806_v22 }
 0xe84   :  { %v2168_v30 = vpop.eup %2167 }
 0xe85   :  { %1813 = vrot.lane.b32.xlu0 %v2168_v30, %s2172_s15 }
 0xe88   :  { %v2170_v23 = vpop.eup %2169 }
 0xe89   :  { %1815 = vrot.lane.b32.xlu1 %v2170_v23, %s2172_s15 }
 0xef7   :  { %v1814_v26 = vpop.permute.xlu0 %1813 }
 0xef8   :  { %v1819_v11 = vmul.f32 %v1814_v26, %v1809_v34 }
 0xefa   :  { %v1823_v40 = vadd.f32 %v1821_v42, %v1819_v11 }
 0xefb   :  { %v1816_v62 = vpop.permute.xlu1 %1815 }
 0xefc   :  { %v1820_v35 = vmul.f32 %v1816_v62, %v1810_v25  ;;  %1827 = vrot.lane.b32.xlu0 %v1823_v40, %s2172_s15 }
 0xefe   :  { %v1824_v38 = vadd.f32 %v1822_v45, %v1820_v35 }
 0xf00   :  { %1829 = vrot.lane.b32.xlu1 %v1824_v38, %s2172_s15 }
 0xf6e   :  { %v1828_v8 = vpop.permute.xlu0 %1827 }
 0xf6f   :  { %1927 = vst.msk [vmem:[%s2895_s3 + $0x70] sm:$0xff] %vm837_vm8, %v1828_v8 }
 0xf70   :  { %1835 = vst.msk [vmem:[%s2895_s3] sm:$0xff] %vm841_vm9, %v1828_v8 }
 0xf72   :  { %v1830_v51 = vpop.permute.xlu1 %1829 }
 0xf73   :  { %1928 = vst.msk [vmem:[%s2895_s3 + $0x78] sm:$0xff] %vm837_vm8, %v1830_v51 }
 0xf74   :  { %1836 = vst.msk [vmem:[%s2895_s3 + $0x8] sm:$0xff] %vm841_vm9, %v1830_v51 }

</bundles_post_ra>
